<compile_context>
chip_gen: v7x
topology: tpu7x:2x2x1
jax: 0.10.0
libtpu: 0.0.40
codegen_flags: <defaults>
</compile_context>

<pallas_src>
import math

import jax
import jax.numpy as jnp
from jax import lax
from jax.experimental import pallas as pl
from jax.experimental.pallas import tpu as pltpu


# -----------------------------------------------------------------------------
# Single fused kernel: 3 BiLSTM passes + attention + 3 conv branches + linear.
# -----------------------------------------------------------------------------
def _abwim_kernel(qx_ref, wrx_ref, rrx_ref,
                  wih_ref, whhf_ref, whhb_ref, bias_ref, w_ref,
                  w1_ref, b1_ref, w2_ref, b2_ref, w3_ref, b3_ref, lin_ref,
                  score_ref,
                  pre_q, pre_wr, pre_rr, hs_q, hs_wr, hs_rr):
    H = whhf_ref.shape[0]
    B = qx_ref.shape[1]
    Tq = qx_ref.shape[0]

    wih = wih_ref[...]                       # (D, 8H)  columns = [fwd 4H | bwd 4H]
    bias = bias_ref[...]                     # (1, 8H)
    whh_f = whhf_ref[...]                    # (H, 4H)
    whh_b = whhb_ref[...]                    # (H, 4H)

    # ---- (1) hoisted input projection: one MXU pass per sequence, both dirs --
    def project(x_ref, pre_ref):
        pre = lax.dot_general(x_ref[...], wih, (((2,), (0,)), ((), ())),
                              preferred_element_type=jnp.float32)   # (T, B, 8H)
        pre_ref[...] = pre + bias
    project(qx_ref, pre_q)
    project(wrx_ref, pre_wr)
    project(rrx_ref, pre_rr)

    # ---- (2) BiLSTM recurrences (fwd + bwd share one fori_loop) --------------
    def lstm_cell(gates, c_prev):
        s = jax.nn.sigmoid(gates)            # one full-width EUP pass
        u = jnp.tanh(gates)                  # one full-width EUP pass
        i = s[:, 0:H]
        f = s[:, H:2 * H]
        g = u[:, 2 * H:3 * H]
        o = s[:, 3 * H:4 * H]
        c = f * c_prev + i * g
        h = o * jnp.tanh(c)
        return h, c

    def run_bilstm(pre_ref, hs_ref, h0f, c0f, h0b, c0b):
        T = pre_ref.shape[0]

        def step(t, carry):
            h_f, c_f, h_b, c_b = carry
            g_f = pre_ref[t, :, 0:4 * H] + jnp.dot(
                h_f, whh_f, preferred_element_type=jnp.float32)
            g_b = pre_ref[T - 1 - t, :, 4 * H:8 * H] + jnp.dot(
                h_b, whh_b, preferred_element_type=jnp.float32)
            h_f, c_f = lstm_cell(g_f, c_f)
            h_b, c_b = lstm_cell(g_b, c_b)
            hs_ref[t, :, 0:H] = h_f                      # forward hidden at t
            hs_ref[T - 1 - t, :, H:2 * H] = h_b          # backward hidden at T-1-t
            return h_f, c_f, h_b, c_b

        return lax.fori_loop(0, T, step, (h0f, c0f, h0b, c0b), unroll=True)

    z = jnp.zeros((B, H), jnp.float32)
    run_bilstm(pre_q, hs_q, z, z, z, z)
    hwf, cwf, hwb, cwb = run_bilstm(pre_wr, hs_wr, z, z, z, z)
    run_bilstm(pre_rr, hs_rr, hwf, cwf, hwb, cwb)        # init = wr final hidden

    # ---- (3) attention + conv branches + max + linear ------------------------
    Wm = w_ref[...]                                      # (2H, 2H)
    w1 = w1_ref[...]; b1 = b1_ref[...]
    w2 = w2_ref[...]; b2 = b2_ref[...]
    w3 = w3_ref[...]; b3 = b3_ref[...]
    lin = lin_ref[...]                                   # (1, Fp) lane-dense

    def conv_relu_pool(M, w, bvec):
        K = w.shape[0]
        L = Tq - K + 1
        acc = jnp.dot(M[0:L, :], w[0], preferred_element_type=jnp.float32)
        for k in range(1, K):                            # static unroll over taps
            acc = acc + jnp.dot(M[k:k + L, :], w[k],
                                preferred_element_type=jnp.float32)
        acc = jnp.maximum(acc + bvec, 0.0)               # (L, Fp)
        return jnp.max(acc, axis=0, keepdims=True)       # (1, Fp) max-pool over L

    scores = []
    for b in range(B):   # static unroll: everything stays plain 2-D matmuls
        q_b = hs_q[:, b, :]                                              # (Tq, 2H)
        rel_b = jnp.concatenate([hs_rr[:, b, :], hs_wr[:, b, :]], axis=0)  # (R, 2H)
        relW = jnp.dot(rel_b, Wm, preferred_element_type=jnp.float32)      # (R, 2H)
        # energy[r, t] = sum_h relW[r, h] * q_b[t, h]
        energy = lax.dot_general(relW, q_b, (((1,), (1,)), ((), ())),
                                 preferred_element_type=jnp.float32)       # (R, Tq)
        energy = energy - jnp.max(energy, axis=-1, keepdims=True)
        e = jnp.exp(energy)
        alpha = e * pl.reciprocal(jnp.sum(e, axis=-1, keepdims=True),
                                  approx=True)                             # (R, Tq)
        # atten[t, h] = sum_r alpha[r, t] * rel_b[r, h]
        atten = lax.dot_general(alpha, rel_b, (((0,), (0,)), ((), ())),
                                preferred_element_type=jnp.float32)        # (Tq, 2H)
        M = jnp.concatenate([q_b, atten], axis=1)                          # (Tq, 4H)
        h1 = conv_relu_pool(M, w1, b1)
        h2 = conv_relu_pool(M, w2, b2)
        h3 = conv_relu_pool(M, w3, b3)
        hmax = jnp.maximum(jnp.maximum(h1, h2), h3)                        # (1, Fp)
        scores.append(jnp.sum(hmax * lin, axis=-1, keepdims=True))         # (1, 1)

    score_ref[...] = jnp.concatenate(scores, axis=0)                       # (B, 1)


# -----------------------------------------------------------------------------
# Full ABWIM forward (plain-JAX glue: embedding gathers + weight repacking).
# -----------------------------------------------------------------------------
def abwim_forward(params, question, rela_relation, word_relation):
    # token ids (B, L) -> time-major embeddings (L, B, D); dropout = identity.
    q_x = params['word_emb'][question.T]               # (Tq,  B, D)
    rr_x = params['rela_emb'][rela_relation.T]         # (Trr, B, D)
    wr_x = params['word_emb'][word_relation.T]         # (Twr, B, D)

    lstm = params['lstm']
    H = lstm['w_hh_f'].shape[1]
    D = lstm['w_ih_f'].shape[1]
    B, Tq = question.shape
    Twr = word_relation.shape[1]
    Trr = rela_relation.shape[1]

    # LSTM weights pre-transposed; fwd/bwd input projections packed side-by-side
    # so the whole-sequence projection is one (T*B, D) @ (D, 8H) MXU pass.
    wih_cat = jnp.concatenate([lstm['w_ih_f'].T, lstm['w_ih_b'].T], axis=1)   # (D, 8H)
    b_cat = jnp.concatenate([lstm['b_f'], lstm['b_b']], axis=0).reshape(1, 8 * H)
    whh_f = lstm['w_hh_f'].T                                                  # (H, 4H)
    whh_b = lstm['w_hh_b'].T

    # Pad filter count 100 -> 128 for lane-dense conv/pool/linear (zero filters
    # stay exactly zero through ReLU/max and contribute nothing to the score).
    F = params['b1'].shape[-1]
    Fp = ((F + 127) // 128) * 128
    pad = Fp - F
    w1 = jnp.pad(params['w1'], ((0, 0), (0, 0), (0, pad)))
    w2 = jnp.pad(params['w2'], ((0, 0), (0, 0), (0, pad)))
    w3 = jnp.pad(params['w3'], ((0, 0), (0, 0), (0, pad)))
    b1 = jnp.pad(params['b1'], ((0, 0), (0, pad)))
    b2 = jnp.pad(params['b2'], ((0, 0), (0, pad)))
    b3 = jnp.pad(params['b3'], ((0, 0), (0, pad)))
    lin = jnp.pad(params['lin'], ((0, pad), (0, 0))).T                        # (1, Fp)

    R = Trr + Twr
    Tsum = Tq + Twr + Trr
    flops = 2 * (Tsum * B * D * 8 * H              # hoisted input projections
                 + Tsum * 2 * B * H * 4 * H        # recurrence h @ W_hh
                 + B * (R * 2 * H * 2 * H + 2 * R * 2 * H * Tq)   # attention
                 + B * 9 * Tq * 4 * H * Fp         # conv branches (upper bound)
                 + B * Fp)                         # final linear
    transcend = Tsum * 2 * B * 9 * H + B * R * Tq
    nbytes = sum(int(x.size) * x.dtype.itemsize for x in
                 (q_x, wr_x, rr_x, wih_cat, whh_f, whh_b, b_cat, params['W'],
                  w1, b1, w2, b2, w3, b3, lin)) + B * 4

    vmem = pl.BlockSpec(memory_space=pltpu.MemorySpace.VMEM)
    score = pl.pallas_call(
        _abwim_kernel,
        out_shape=jax.ShapeDtypeStruct((B, 1), jnp.float32),
        in_specs=[vmem] * 15,
        out_specs=vmem,
        scratch_shapes=[
            pltpu.VMEM((Tq, B, 8 * H), jnp.float32),    # pre_q  (x@W_ih + b, both dirs)
            pltpu.VMEM((Twr, B, 8 * H), jnp.float32),   # pre_wr
            pltpu.VMEM((Trr, B, 8 * H), jnp.float32),   # pre_rr
            pltpu.VMEM((Tq, B, 2 * H), jnp.float32),    # hs_q   (fwd|bwd hidden seq)
            pltpu.VMEM((Twr, B, 2 * H), jnp.float32),   # hs_wr
            pltpu.VMEM((Trr, B, 2 * H), jnp.float32),   # hs_rr
        ],
        cost_estimate=pl.CostEstimate(flops=int(flops),
                                      transcendentals=int(transcend),
                                      bytes_accessed=int(nbytes)),
    )(q_x, wr_x, rr_x, wih_cat, whh_f, whh_b, b_cat, params['W'],
      w1, b1, w2, b2, w3, b3, lin)
    return score[:, 0]                                                       # (B,)


# -----------------------------------------------------------------------------
# Deterministic parameter construction (shapes from ABWIM.__init__).
# -----------------------------------------------------------------------------
def init_params(key, *, vocab_w=50, vocab_r=20, emb_dim=32, hidden=32, filters=100):
    ks = jax.random.split(key, 16)
    H, D = hidden, emb_dim
    s = 1.0 / math.sqrt(H)

    def u(k, shape, scale):
        return jax.random.uniform(k, shape, jnp.float32, -scale, scale)

    return {
        'word_emb': jax.random.normal(ks[0], (vocab_w, D), jnp.float32) * 0.1,
        'rela_emb': jax.random.normal(ks[1], (vocab_r, D), jnp.float32) * 0.1,
        'lstm': {
            'w_ih_f': u(ks[2], (4 * H, D), s),
            'w_hh_f': u(ks[3], (4 * H, H), s),
            'b_f':    u(ks[4], (4 * H,), s),       # b_ih + b_hh merged
            'w_ih_b': u(ks[5], (4 * H, D), s),
            'w_hh_b': u(ks[6], (4 * H, H), s),
            'b_b':    u(ks[7], (4 * H,), s),
        },
        'W': jax.random.uniform(ks[8], (2 * H, 2 * H), jnp.float32),  # th.rand
        # Conv1d weights, pre-transposed to (K, C_in=4H, F); biases as (1, F).
        'w1': u(ks[9],  (1, 4 * H, filters), 0.05),
        'b1': u(ks[10], (1, filters), 0.05),
        'w2': u(ks[11], (3, 4 * H, filters), 0.05),
        'b2': u(ks[12], (1, filters), 0.05),
        'w3': u(ks[13], (5, 4 * H, filters), 0.05),
        'b3': u(ks[14], (1, filters), 0.05),
        'lin': u(ks[15], (filters, 1), 0.1),       # nn.Linear(100, 1, bias=False).T
    }


if __name__ == "__main__":
    key = jax.random.PRNGKey(0)
    pk, k1, k2, k3 = jax.random.split(key, 4)

    B, q_len, wr_len, rr_len = 2, 8, 6, 4          # q_len >= 5 for the width-5 conv
    params = init_params(pk, vocab_w=50, vocab_r=20, emb_dim=32, hidden=32)

    question = jax.random.randint(k1, (B, q_len), 0, 50, dtype=jnp.int32)
    word_relation = jax.random.randint(k2, (B, wr_len), 0, 50, dtype=jnp.int32)
    rela_relation = jax.random.randint(k3, (B, rr_len), 0, 20, dtype=jnp.int32)

    score = jax.jit(abwim_forward)(params, question, rela_relation, word_relation)
    jax.block_until_ready(score)
    assert score.shape == (B,)
    assert bool(jnp.all(jnp.isfinite(score)))
    print("KERNEL_OK")
</pallas_src>

<mosaic_0001>
module attributes {stable_mosaic.version = 11 : i64} {
  func.func @_abwim_kernel(%arg0: memref<8x2x32xf32, #tpu.memory_space<vmem>>, %arg1: memref<6x2x32xf32, #tpu.memory_space<vmem>>, %arg2: memref<4x2x32xf32, #tpu.memory_space<vmem>>, %arg3: memref<32x256xf32, #tpu.memory_space<vmem>>, %arg4: memref<32x128xf32, #tpu.memory_space<vmem>>, %arg5: memref<32x128xf32, #tpu.memory_space<vmem>>, %arg6: memref<1x256xf32, #tpu.memory_space<vmem>>, %arg7: memref<64x64xf32, #tpu.memory_space<vmem>>, %arg8: memref<1x128x128xf32, #tpu.memory_space<vmem>>, %arg9: memref<1x128xf32, #tpu.memory_space<vmem>>, %arg10: memref<3x128x128xf32, #tpu.memory_space<vmem>>, %arg11: memref<1x128xf32, #tpu.memory_space<vmem>>, %arg12: memref<5x128x128xf32, #tpu.memory_space<vmem>>, %arg13: memref<1x128xf32, #tpu.memory_space<vmem>>, %arg14: memref<1x128xf32, #tpu.memory_space<vmem>>, %arg15: memref<2x1xf32, #tpu.memory_space<vmem>>, %arg16: memref<8x2x256xf32, #tpu.memory_space<vmem>>, %arg17: memref<6x2x256xf32, #tpu.memory_space<vmem>>, %arg18: memref<4x2x256xf32, #tpu.memory_space<vmem>>, %arg19: memref<8x2x64xf32, #tpu.memory_space<vmem>>, %arg20: memref<6x2x64xf32, #tpu.memory_space<vmem>>, %arg21: memref<4x2x64xf32, #tpu.memory_space<vmem>>) attributes {dimension_semantics = [], scalar_prefetch = 0 : i64, scratch_operands = 6 : i64, tpu.core_type = #tpu.core_type<tc>} {
    %c0 = arith.constant 0 : index
    %c0_0 = arith.constant 0 : index
    %0 = vector.load %arg3[%c0, %c0_0] : memref<32x256xf32, #tpu.memory_space<vmem>>, vector<32x256xf32>
    %c0_1 = arith.constant 0 : index
    %c0_2 = arith.constant 0 : index
    %1 = vector.load %arg6[%c0_1, %c0_2] : memref<1x256xf32, #tpu.memory_space<vmem>>, vector<1x256xf32>
    %c0_3 = arith.constant 0 : index
    %c0_4 = arith.constant 0 : index
    %2 = vector.load %arg4[%c0_3, %c0_4] : memref<32x128xf32, #tpu.memory_space<vmem>>, vector<32x128xf32>
    %c0_5 = arith.constant 0 : index
    %c0_6 = arith.constant 0 : index
    %3 = vector.load %arg5[%c0_5, %c0_6] : memref<32x128xf32, #tpu.memory_space<vmem>>, vector<32x128xf32>
    %c0_7 = arith.constant 0 : index
    %c0_8 = arith.constant 0 : index
    %c0_9 = arith.constant 0 : index
    %4 = vector.load %arg0[%c0_7, %c0_8, %c0_9] : memref<8x2x32xf32, #tpu.memory_space<vmem>>, vector<8x2x32xf32>
    %cst = arith.constant dense<0.000000e+00> : vector<8x2x256xf32>
    %5 = tpu.matmul %4, %0, %cst {dimension_numbers = #tpu.dot_dimension_numbers<[2], [0], [0, 1], [1], [0, 0, 0, 1, 1, 1], [], []>} : vector<8x2x32xf32>, vector<32x256xf32>, vector<8x2x256xf32> -> vector<8x2x256xf32>
    %6 = vector.shape_cast %1 : vector<1x256xf32> to vector<1x1x256xf32>
    %7 = vector.broadcast %6 : vector<1x1x256xf32> to vector<8x2x256xf32>
    %8 = arith.addf %5, %7 : vector<8x2x256xf32>
    %c0_10 = arith.constant 0 : index
    %c0_11 = arith.constant 0 : index
    %c0_12 = arith.constant 0 : index
    %9 = vector.load %arg16[%c0_10, %c0_11, %c0_12] : memref<8x2x256xf32, #tpu.memory_space<vmem>>, vector<8x2x256xf32>
    tpu.vector_store %arg16[%c0_10, %c0_11, %c0_12], %8 {strides = array<i32>} : memref<8x2x256xf32, #tpu.memory_space<vmem>>, vector<8x2x256xf32>,
    %c0_13 = arith.constant 0 : index
    %c0_14 = arith.constant 0 : index
    %c0_15 = arith.constant 0 : index
    %10 = vector.load %arg1[%c0_13, %c0_14, %c0_15] : memref<6x2x32xf32, #tpu.memory_space<vmem>>, vector<6x2x32xf32>
    %cst_16 = arith.constant dense<0.000000e+00> : vector<6x2x256xf32>
    %11 = tpu.matmul %10, %0, %cst_16 {dimension_numbers = #tpu.dot_dimension_numbers<[2], [0], [0, 1], [1], [0, 0, 0, 1, 1, 1], [], []>} : vector<6x2x32xf32>, vector<32x256xf32>, vector<6x2x256xf32> -> vector<6x2x256xf32>
    %12 = vector.shape_cast %1 : vector<1x256xf32> to vector<1x1x256xf32>
    %13 = vector.broadcast %12 : vector<1x1x256xf32> to vector<6x2x256xf32>
    %14 = arith.addf %11, %13 : vector<6x2x256xf32>
    %c0_17 = arith.constant 0 : index
    %c0_18 = arith.constant 0 : index
    %c0_19 = arith.constant 0 : index
    %15 = vector.load %arg17[%c0_17, %c0_18, %c0_19] : memref<6x2x256xf32, #tpu.memory_space<vmem>>, vector<6x2x256xf32>
    tpu.vector_store %arg17[%c0_17, %c0_18, %c0_19], %14 {strides = array<i32>} : memref<6x2x256xf32, #tpu.memory_space<vmem>>, vector<6x2x256xf32>,
    %c0_20 = arith.constant 0 : index
    %c0_21 = arith.constant 0 : index
    %c0_22 = arith.constant 0 : index
    %16 = vector.load %arg2[%c0_20, %c0_21, %c0_22] : memref<4x2x32xf32, #tpu.memory_space<vmem>>, vector<4x2x32xf32>
    %cst_23 = arith.constant dense<0.000000e+00> : vector<4x2x256xf32>
    %17 = tpu.matmul %16, %0, %cst_23 {dimension_numbers = #tpu.dot_dimension_numbers<[2], [0], [0, 1], [1], [0, 0, 0, 1, 1, 1], [], []>} : vector<4x2x32xf32>, vector<32x256xf32>, vector<4x2x256xf32> -> vector<4x2x256xf32>
    %18 = vector.shape_cast %1 : vector<1x256xf32> to vector<1x1x256xf32>
    %19 = vector.broadcast %18 : vector<1x1x256xf32> to vector<4x2x256xf32>
    %20 = arith.addf %17, %19 : vector<4x2x256xf32>
    %c0_24 = arith.constant 0 : index
    %c0_25 = arith.constant 0 : index
    %c0_26 = arith.constant 0 : index
    %21 = vector.load %arg18[%c0_24, %c0_25, %c0_26] : memref<4x2x256xf32, #tpu.memory_space<vmem>>, vector<4x2x256xf32>
    tpu.vector_store %arg18[%c0_24, %c0_25, %c0_26], %20 {strides = array<i32>} : memref<4x2x256xf32, #tpu.memory_space<vmem>>, vector<4x2x256xf32>,
    %cst_27 = arith.constant 0.000000e+00 : f32
    %22 = vector.broadcast %cst_27 : f32 to vector<2x32xf32>
    %c0_i32 = arith.constant 0 : i32
    %23 = arith.index_cast %c0_i32 : i32 to index
    %c0_28 = arith.constant 0 : index
    %c0_29 = arith.constant 0 : index
    %24 = vector.load %arg16[%23, %c0_28, %c0_29] : memref<8x2x256xf32, #tpu.memory_space<vmem>>, vector<1x2x128xf32>
    %25 = vector.shape_cast %24 : vector<1x2x128xf32> to vector<2x128xf32>
    %cst_30 = arith.constant dense<0.000000e+00> : vector<2x128xf32>
    %26 = tpu.matmul %22, %2, %cst_30 {dimension_numbers = #tpu.dot_dimension_numbers<[1], [0], [0], [1], [0, 0, 1, 1], [], []>} : vector<2x32xf32>, vector<32x128xf32>, vector<2x128xf32> -> vector<2x128xf32>
    %27 = arith.addf %25, %26 : vector<2x128xf32>
    %c7_i32 = arith.constant 7 : i32
    %28 = arith.subi %c7_i32, %c0_i32 : i32
    %29 = arith.index_cast %28 : i32 to index
    %c0_31 = arith.constant 0 : index
    %c128 = arith.constant 128 : index
    %30 = vector.load %arg16[%29, %c0_31, %c128] : memref<8x2x256xf32, #tpu.memory_space<vmem>>, vector<1x2x128xf32>
    %31 = vector.shape_cast %30 : vector<1x2x128xf32> to vector<2x128xf32>
    %cst_32 = arith.constant dense<0.000000e+00> : vector<2x128xf32>
    %32 = tpu.matmul %22, %3, %cst_32 {dimension_numbers = #tpu.dot_dimension_numbers<[1], [0], [0], [1], [0, 0, 1, 1], [], []>} : vector<2x32xf32>, vector<32x128xf32>, vector<2x128xf32> -> vector<2x128xf32>
    %33 = arith.addf %31, %32 : vector<2x128xf32>
    %34 = arith.negf %27 : vector<2x128xf32>
    %35 = math.exp %34 : vector<2x128xf32>
    %cst_33 = arith.constant 1.000000e+00 : f32
    %36 = vector.broadcast %cst_33 : f32 to vector<2x128xf32>
    %37 = arith.addf %36, %35 : vector<2x128xf32>
    %38 = arith.divf %36, %37 : vector<2x128xf32>
    %39 = math.tanh %27 : vector<2x128xf32>
    %40 = vector.extract_strided_slice %38 {offsets = [0, 0], sizes = [2, 32], strides = [1, 1]} : vector<2x128xf32> to vector<2x32xf32>
    %41 = vector.extract_strided_slice %38 {offsets = [0, 32], sizes = [2, 32], strides = [1, 1]} : vector<2x128xf32> to vector<2x32xf32>
    %42 = vector.extract_strided_slice %39 {offsets = [0, 64], sizes = [2, 32], strides = [1, 1]} : vector<2x128xf32> to vector<2x32xf32>
    %43 = vector.extract_strided_slice %38 {offsets = [0, 96], sizes = [2, 32], strides = [1, 1]} : vector<2x128xf32> to vector<2x32xf32>
    %44 = arith.mulf %41, %22 : vector<2x32xf32>
    %45 = arith.mulf %40, %42 : vector<2x32xf32>
    %46 = arith.addf %44, %45 : vector<2x32xf32>
    %47 = math.tanh %46 : vector<2x32xf32>
    %48 = arith.mulf %43, %47 : vector<2x32xf32>
    %49 = arith.negf %33 : vector<2x128xf32>
    %50 = math.exp %49 : vector<2x128xf32>
    %cst_34 = arith.constant 1.000000e+00 : f32
    %51 = vector.broadcast %cst_34 : f32 to vector<2x128xf32>
    %52 = arith.addf %51, %50 : vector<2x128xf32>
    %53 = arith.divf %51, %52 : vector<2x128xf32>
    %54 = math.tanh %33 : vector<2x128xf32>
    %55 = vector.extract_strided_slice %53 {offsets = [0, 0], sizes = [2, 32], strides = [1, 1]} : vector<2x128xf32> to vector<2x32xf32>
    %56 = vector.extract_strided_slice %53 {offsets = [0, 32], sizes = [2, 32], strides = [1, 1]} : vector<2x128xf32> to vector<2x32xf32>
    %57 = vector.extract_strided_slice %54 {offsets = [0, 64], sizes = [2, 32], strides = [1, 1]} : vector<2x128xf32> to vector<2x32xf32>
    %58 = vector.extract_strided_slice %53 {offsets = [0, 96], sizes = [2, 32], strides = [1, 1]} : vector<2x128xf32> to vector<2x32xf32>
    %59 = arith.mulf %56, %22 : vector<2x32xf32>
    %60 = arith.mulf %55, %57 : vector<2x32xf32>
    %61 = arith.addf %59, %60 : vector<2x32xf32>
    %62 = math.tanh %61 : vector<2x32xf32>
    %63 = arith.mulf %58, %62 : vector<2x32xf32>
    %64 = arith.index_cast %c0_i32 : i32 to index
    %c0_35 = arith.constant 0 : index
    %c0_36 = arith.constant 0 : index
    %65 = vector.load %arg19[%64, %c0_35, %c0_36] : memref<8x2x64xf32, #tpu.memory_space<vmem>>, vector<1x2x32xf32>
    %66 = vector.shape_cast %65 : vector<1x2x32xf32> to vector<2x32xf32>
    %67 = vector.shape_cast %48 : vector<2x32xf32> to vector<1x2x32xf32>
    tpu.vector_store %arg19[%64, %c0_35, %c0_36], %67 {strides = array<i32>} : memref<8x2x64xf32, #tpu.memory_space<vmem>>, vector<1x2x32xf32>,
    %c7_i32_37 = arith.constant 7 : i32
    %68 = arith.subi %c7_i32_37, %c0_i32 : i32
    %69 = arith.index_cast %68 : i32 to index
    %c0_38 = arith.constant 0 : index
    %c32 = arith.constant 32 : index
    %70 = vector.load %arg19[%69, %c0_38, %c32] : memref<8x2x64xf32, #tpu.memory_space<vmem>>, vector<1x2x32xf32>
    %71 = vector.shape_cast %70 : vector<1x2x32xf32> to vector<2x32xf32>
    %72 = vector.shape_cast %63 : vector<2x32xf32> to vector<1x2x32xf32>
    tpu.vector_store %arg19[%69, %c0_38, %c32], %72 {strides = array<i32>} : memref<8x2x64xf32, #tpu.memory_space<vmem>>, vector<1x2x32xf32>,
    %c1_i32 = arith.constant 1 : i32
    %73 = arith.index_cast %c1_i32 : i32 to index
    %c0_39 = arith.constant 0 : index
    %c0_40 = arith.constant 0 : index
    %74 = vector.load %arg16[%73, %c0_39, %c0_40] : memref<8x2x256xf32, #tpu.memory_space<vmem>>, vector<1x2x128xf32>
    %75 = vector.shape_cast %74 : vector<1x2x128xf32> to vector<2x128xf32>
    %cst_41 = arith.constant dense<0.000000e+00> : vector<2x128xf32>
    %76 = tpu.matmul %48, %2, %cst_41 {dimension_numbers = #tpu.dot_dimension_numbers<[1], [0], [0], [1], [0, 0, 1, 1], [], []>} : vector<2x32xf32>, vector<32x128xf32>, vector<2x128xf32> -> vector<2x128xf32>
    %77 = arith.addf %75, %76 : vector<2x128xf32>
    %c7_i32_42 = arith.constant 7 : i32
    %78 = arith.subi %c7_i32_42, %c1_i32 : i32
    %79 = arith.index_cast %78 : i32 to index
    %c0_43 = arith.constant 0 : index
    %c128_44 = arith.constant 128 : index
    %80 = vector.load %arg16[%79, %c0_43, %c128_44] : memref<8x2x256xf32, #tpu.memory_space<vmem>>, vector<1x2x128xf32>
    %81 = vector.shape_cast %80 : vector<1x2x128xf32> to vector<2x128xf32>
    %cst_45 = arith.constant dense<0.000000e+00> : vector<2x128xf32>
    %82 = tpu.matmul %63, %3, %cst_45 {dimension_numbers = #tpu.dot_dimension_numbers<[1], [0], [0], [1], [0, 0, 1, 1], [], []>} : vector<2x32xf32>, vector<32x128xf32>, vector<2x128xf32> -> vector<2x128xf32>
    %83 = arith.addf %81, %82 : vector<2x128xf32>
    %84 = arith.negf %77 : vector<2x128xf32>
    %85 = math.exp %84 : vector<2x128xf32>
    %cst_46 = arith.constant 1.000000e+00 : f32
    %86 = vector.broadcast %cst_46 : f32 to vector<2x128xf32>
    %87 = arith.addf %86, %85 : vector<2x128xf32>
    %88 = arith.divf %86, %87 : vector<2x128xf32>
    %89 = math.tanh %77 : vector<2x128xf32>
    %90 = vector.extract_strided_slice %88 {offsets = [0, 0], sizes = [2, 32], strides = [1, 1]} : vector<2x128xf32> to vector<2x32xf32>
    %91 = vector.extract_strided_slice %88 {offsets = [0, 32], sizes = [2, 32], strides = [1, 1]} : vector<2x128xf32> to vector<2x32xf32>
    %92 = vector.extract_strided_slice %89 {offsets = [0, 64], sizes = [2, 32], strides = [1, 1]} : vector<2x128xf32> to vector<2x32xf32>
    %93 = vector.extract_strided_slice %88 {offsets = [0, 96], sizes = [2, 32], strides = [1, 1]} : vector<2x128xf32> to vector<2x32xf32>
    %94 = arith.mulf %91, %46 : vector<2x32xf32>
    %95 = arith.mulf %90, %92 : vector<2x32xf32>
    %96 = arith.addf %94, %95 : vector<2x32xf32>
    %97 = math.tanh %96 : vector<2x32xf32>
    %98 = arith.mulf %93, %97 : vector<2x32xf32>
    %99 = arith.negf %83 : vector<2x128xf32>
    %100 = math.exp %99 : vector<2x128xf32>
    %cst_47 = arith.constant 1.000000e+00 : f32
    %101 = vector.broadcast %cst_47 : f32 to vector<2x128xf32>
    %102 = arith.addf %101, %100 : vector<2x128xf32>
    %103 = arith.divf %101, %102 : vector<2x128xf32>
    %104 = math.tanh %83 : vector<2x128xf32>
    %105 = vector.extract_strided_slice %103 {offsets = [0, 0], sizes = [2, 32], strides = [1, 1]} : vector<2x128xf32> to vector<2x32xf32>
    %106 = vector.extract_strided_slice %103 {offsets = [0, 32], sizes = [2, 32], strides = [1, 1]} : vector<2x128xf32> to vector<2x32xf32>
    %107 = vector.extract_strided_slice %104 {offsets = [0, 64], sizes = [2, 32], strides = [1, 1]} : vector<2x128xf32> to vector<2x32xf32>
    %108 = vector.extract_strided_slice %103 {offsets = [0, 96], sizes = [2, 32], strides = [1, 1]} : vector<2x128xf32> to vector<2x32xf32>
    %109 = arith.mulf %106, %61 : vector<2x32xf32>
    %110 = arith.mulf %105, %107 : vector<2x32xf32>
    %111 = arith.addf %109, %110 : vector<2x32xf32>
    %112 = math.tanh %111 : vector<2x32xf32>
    %113 = arith.mulf %108, %112 : vector<2x32xf32>
    %114 = arith.index_cast %c1_i32 : i32 to index
    %c0_48 = arith.constant 0 : index
    %c0_49 = arith.constant 0 : index
    %115 = vector.load %arg19[%114, %c0_48, %c0_49] : memref<8x2x64xf32, #tpu.memory_space<vmem>>, vector<1x2x32xf32>
    %116 = vector.shape_cast %115 : vector<1x2x32xf32> to vector<2x32xf32>
    %117 = vector.shape_cast %98 : vector<2x32xf32> to vector<1x2x32xf32>
    tpu.vector_store %arg19[%114, %c0_48, %c0_49], %117 {strides = array<i32>} : memref<8x2x64xf32, #tpu.memory_space<vmem>>, vector<1x2x32xf32>,
    %c7_i32_50 = arith.constant 7 : i32
    %118 = arith.subi %c7_i32_50, %c1_i32 : i32
    %119 = arith.index_cast %118 : i32 to index
    %c0_51 = arith.constant 0 : index
    %c32_52 = arith.constant 32 : index
    %120 = vector.load %arg19[%119, %c0_51, %c32_52] : memref<8x2x64xf32, #tpu.memory_space<vmem>>, vector<1x2x32xf32>
    %121 = vector.shape_cast %120 : vector<1x2x32xf32> to vector<2x32xf32>
    %122 = vector.shape_cast %113 : vector<2x32xf32> to vector<1x2x32xf32>
    tpu.vector_store %arg19[%119, %c0_51, %c32_52], %122 {strides = array<i32>} : memref<8x2x64xf32, #tpu.memory_space<vmem>>, vector<1x2x32xf32>,
    %c2_i32 = arith.constant 2 : i32
    %123 = arith.index_cast %c2_i32 : i32 to index
    %c0_53 = arith.constant 0 : index
    %c0_54 = arith.constant 0 : index
    %124 = vector.load %arg16[%123, %c0_53, %c0_54] : memref<8x2x256xf32, #tpu.memory_space<vmem>>, vector<1x2x128xf32>
    %125 = vector.shape_cast %124 : vector<1x2x128xf32> to vector<2x128xf32>
    %cst_55 = arith.constant dense<0.000000e+00> : vector<2x128xf32>
    %126 = tpu.matmul %98, %2, %cst_55 {dimension_numbers = #tpu.dot_dimension_numbers<[1], [0], [0], [1], [0, 0, 1, 1], [], []>} : vector<2x32xf32>, vector<32x128xf32>, vector<2x128xf32> -> vector<2x128xf32>
    %127 = arith.addf %125, %126 : vector<2x128xf32>
    %c7_i32_56 = arith.constant 7 : i32
    %128 = arith.subi %c7_i32_56, %c2_i32 : i32
    %129 = arith.index_cast %128 : i32 to index
    %c0_57 = arith.constant 0 : index
    %c128_58 = arith.constant 128 : index
    %130 = vector.load %arg16[%129, %c0_57, %c128_58] : memref<8x2x256xf32, #tpu.memory_space<vmem>>, vector<1x2x128xf32>
    %131 = vector.shape_cast %130 : vector<1x2x128xf32> to vector<2x128xf32>
    %cst_59 = arith.constant dense<0.000000e+00> : vector<2x128xf32>
    %132 = tpu.matmul %113, %3, %cst_59 {dimension_numbers = #tpu.dot_dimension_numbers<[1], [0], [0], [1], [0, 0, 1, 1], [], []>} : vector<2x32xf32>, vector<32x128xf32>, vector<2x128xf32> -> vector<2x128xf32>
    %133 = arith.addf %131, %132 : vector<2x128xf32>
    %134 = arith.negf %127 : vector<2x128xf32>
    %135 = math.exp %134 : vector<2x128xf32>
    %cst_60 = arith.constant 1.000000e+00 : f32
    %136 = vector.broadcast %cst_60 : f32 to vector<2x128xf32>
    %137 = arith.addf %136, %135 : vector<2x128xf32>
    %138 = arith.divf %136, %137 : vector<2x128xf32>
    %139 = math.tanh %127 : vector<2x128xf32>
    %140 = vector.extract_strided_slice %138 {offsets = [0, 0], sizes = [2, 32], strides = [1, 1]} : vector<2x128xf32> to vector<2x32xf32>
    %141 = vector.extract_strided_slice %138 {offsets = [0, 32], sizes = [2, 32], strides = [1, 1]} : vector<2x128xf32> to vector<2x32xf32>
    %142 = vector.extract_strided_slice %139 {offsets = [0, 64], sizes = [2, 32], strides = [1, 1]} : vector<2x128xf32> to vector<2x32xf32>
    %143 = vector.extract_strided_slice %138 {offsets = [0, 96], sizes = [2, 32], strides = [1, 1]} : vector<2x128xf32> to vector<2x32xf32>
    %144 = arith.mulf %141, %96 : vector<2x32xf32>
    %145 = arith.mulf %140, %142 : vector<2x32xf32>
    %146 = arith.addf %144, %145 : vector<2x32xf32>
    %147 = math.tanh %146 : vector<2x32xf32>
    %148 = arith.mulf %143, %147 : vector<2x32xf32>
    %149 = arith.negf %133 : vector<2x128xf32>
    %150 = math.exp %149 : vector<2x128xf32>
    %cst_61 = arith.constant 1.000000e+00 : f32
    %151 = vector.broadcast %cst_61 : f32 to vector<2x128xf32>
    %152 = arith.addf %151, %150 : vector<2x128xf32>
    %153 = arith.divf %151, %152 : vector<2x128xf32>
    %154 = math.tanh %133 : vector<2x128xf32>
    %155 = vector.extract_strided_slice %153 {offsets = [0, 0], sizes = [2, 32], strides = [1, 1]} : vector<2x128xf32> to vector<2x32xf32>
    %156 = vector.extract_strided_slice %153 {offsets = [0, 32], sizes = [2, 32], strides = [1, 1]} : vector<2x128xf32> to vector<2x32xf32>
    %157 = vector.extract_strided_slice %154 {offsets = [0, 64], sizes = [2, 32], strides = [1, 1]} : vector<2x128xf32> to vector<2x32xf32>
    %158 = vector.extract_strided_slice %153 {offsets = [0, 96], sizes = [2, 32], strides = [1, 1]} : vector<2x128xf32> to vector<2x32xf32>
    %159 = arith.mulf %156, %111 : vector<2x32xf32>
    %160 = arith.mulf %155, %157 : vector<2x32xf32>
    %161 = arith.addf %159, %160 : vector<2x32xf32>
    %162 = math.tanh %161 : vector<2x32xf32>
    %163 = arith.mulf %158, %162 : vector<2x32xf32>
    %164 = arith.index_cast %c2_i32 : i32 to index
    %c0_62 = arith.constant 0 : index
    %c0_63 = arith.constant 0 : index
    %165 = vector.load %arg19[%164, %c0_62, %c0_63] : memref<8x2x64xf32, #tpu.memory_space<vmem>>, vector<1x2x32xf32>
    %166 = vector.shape_cast %165 : vector<1x2x32xf32> to vector<2x32xf32>
    %167 = vector.shape_cast %148 : vector<2x32xf32> to vector<1x2x32xf32>
    tpu.vector_store %arg19[%164, %c0_62, %c0_63], %167 {strides = array<i32>} : memref<8x2x64xf32, #tpu.memory_space<vmem>>, vector<1x2x32xf32>,
    %c7_i32_64 = arith.constant 7 : i32
    %168 = arith.subi %c7_i32_64, %c2_i32 : i32
    %169 = arith.index_cast %168 : i32 to index
    %c0_65 = arith.constant 0 : index
    %c32_66 = arith.constant 32 : index
    %170 = vector.load %arg19[%169, %c0_65, %c32_66] : memref<8x2x64xf32, #tpu.memory_space<vmem>>, vector<1x2x32xf32>
    %171 = vector.shape_cast %170 : vector<1x2x32xf32> to vector<2x32xf32>
    %172 = vector.shape_cast %163 : vector<2x32xf32> to vector<1x2x32xf32>
    tpu.vector_store %arg19[%169, %c0_65, %c32_66], %172 {strides = array<i32>} : memref<8x2x64xf32, #tpu.memory_space<vmem>>, vector<1x2x32xf32>,
    %c3_i32 = arith.constant 3 : i32
    %173 = arith.index_cast %c3_i32 : i32 to index
    %c0_67 = arith.constant 0 : index
    %c0_68 = arith.constant 0 : index
    %174 = vector.load %arg16[%173, %c0_67, %c0_68] : memref<8x2x256xf32, #tpu.memory_space<vmem>>, vector<1x2x128xf32>
    %175 = vector.shape_cast %174 : vector<1x2x128xf32> to vector<2x128xf32>
    %cst_69 = arith.constant dense<0.000000e+00> : vector<2x128xf32>
    %176 = tpu.matmul %148, %2, %cst_69 {dimension_numbers = #tpu.dot_dimension_numbers<[1], [0], [0], [1], [0, 0, 1, 1], [], []>} : vector<2x32xf32>, vector<32x128xf32>, vector<2x128xf32> -> vector<2x128xf32>
    %177 = arith.addf %175, %176 : vector<2x128xf32>
    %c7_i32_70 = arith.constant 7 : i32
    %178 = arith.subi %c7_i32_70, %c3_i32 : i32
    %179 = arith.index_cast %178 : i32 to index
    %c0_71 = arith.constant 0 : index
    %c128_72 = arith.constant 128 : index
    %180 = vector.load %arg16[%179, %c0_71, %c128_72] : memref<8x2x256xf32, #tpu.memory_space<vmem>>, vector<1x2x128xf32>
    %181 = vector.shape_cast %180 : vector<1x2x128xf32> to vector<2x128xf32>
    %cst_73 = arith.constant dense<0.000000e+00> : vector<2x128xf32>
    %182 = tpu.matmul %163, %3, %cst_73 {dimension_numbers = #tpu.dot_dimension_numbers<[1], [0], [0], [1], [0, 0, 1, 1], [], []>} : vector<2x32xf32>, vector<32x128xf32>, vector<2x128xf32> -> vector<2x128xf32>
    %183 = arith.addf %181, %182 : vector<2x128xf32>
    %184 = arith.negf %177 : vector<2x128xf32>
    %185 = math.exp %184 : vector<2x128xf32>
    %cst_74 = arith.constant 1.000000e+00 : f32
    %186 = vector.broadcast %cst_74 : f32 to vector<2x128xf32>
    %187 = arith.addf %186, %185 : vector<2x128xf32>
    %188 = arith.divf %186, %187 : vector<2x128xf32>
    %189 = math.tanh %177 : vector<2x128xf32>
    %190 = vector.extract_strided_slice %188 {offsets = [0, 0], sizes = [2, 32], strides = [1, 1]} : vector<2x128xf32> to vector<2x32xf32>
    %191 = vector.extract_strided_slice %188 {offsets = [0, 32], sizes = [2, 32], strides = [1, 1]} : vector<2x128xf32> to vector<2x32xf32>
    %192 = vector.extract_strided_slice %189 {offsets = [0, 64], sizes = [2, 32], strides = [1, 1]} : vector<2x128xf32> to vector<2x32xf32>
    %193 = vector.extract_strided_slice %188 {offsets = [0, 96], sizes = [2, 32], strides = [1, 1]} : vector<2x128xf32> to vector<2x32xf32>
    %194 = arith.mulf %191, %146 : vector<2x32xf32>
    %195 = arith.mulf %190, %192 : vector<2x32xf32>
    %196 = arith.addf %194, %195 : vector<2x32xf32>
    %197 = math.tanh %196 : vector<2x32xf32>
    %198 = arith.mulf %193, %197 : vector<2x32xf32>
    %199 = arith.negf %183 : vector<2x128xf32>
    %200 = math.exp %199 : vector<2x128xf32>
    %cst_75 = arith.constant 1.000000e+00 : f32
    %201 = vector.broadcast %cst_75 : f32 to vector<2x128xf32>
    %202 = arith.addf %201, %200 : vector<2x128xf32>
    %203 = arith.divf %201, %202 : vector<2x128xf32>
    %204 = math.tanh %183 : vector<2x128xf32>
    %205 = vector.extract_strided_slice %203 {offsets = [0, 0], sizes = [2, 32], strides = [1, 1]} : vector<2x128xf32> to vector<2x32xf32>
    %206 = vector.extract_strided_slice %203 {offsets = [0, 32], sizes = [2, 32], strides = [1, 1]} : vector<2x128xf32> to vector<2x32xf32>
    %207 = vector.extract_strided_slice %204 {offsets = [0, 64], sizes = [2, 32], strides = [1, 1]} : vector<2x128xf32> to vector<2x32xf32>
    %208 = vector.extract_strided_slice %203 {offsets = [0, 96], sizes = [2, 32], strides = [1, 1]} : vector<2x128xf32> to vector<2x32xf32>
    %209 = arith.mulf %206, %161 : vector<2x32xf32>
    %210 = arith.mulf %205, %207 : vector<2x32xf32>
    %211 = arith.addf %209, %210 : vector<2x32xf32>
    %212 = math.tanh %211 : vector<2x32xf32>
    %213 = arith.mulf %208, %212 : vector<2x32xf32>
    %214 = arith.index_cast %c3_i32 : i32 to index
    %c0_76 = arith.constant 0 : index
    %c0_77 = arith.constant 0 : index
    %215 = vector.load %arg19[%214, %c0_76, %c0_77] : memref<8x2x64xf32, #tpu.memory_space<vmem>>, vector<1x2x32xf32>
    %216 = vector.shape_cast %215 : vector<1x2x32xf32> to vector<2x32xf32>
    %217 = vector.shape_cast %198 : vector<2x32xf32> to vector<1x2x32xf32>
    tpu.vector_store %arg19[%214, %c0_76, %c0_77], %217 {strides = array<i32>} : memref<8x2x64xf32, #tpu.memory_space<vmem>>, vector<1x2x32xf32>,
    %c7_i32_78 = arith.constant 7 : i32
    %218 = arith.subi %c7_i32_78, %c3_i32 : i32
    %219 = arith.index_cast %218 : i32 to index
    %c0_79 = arith.constant 0 : index
    %c32_80 = arith.constant 32 : index
    %220 = vector.load %arg19[%219, %c0_79, %c32_80] : memref<8x2x64xf32, #tpu.memory_space<vmem>>, vector<1x2x32xf32>
    %221 = vector.shape_cast %220 : vector<1x2x32xf32> to vector<2x32xf32>
    %222 = vector.shape_cast %213 : vector<2x32xf32> to vector<1x2x32xf32>
    tpu.vector_store %arg19[%219, %c0_79, %c32_80], %222 {strides = array<i32>} : memref<8x2x64xf32, #tpu.memory_space<vmem>>, vector<1x2x32xf32>,
    %c4_i32 = arith.constant 4 : i32
    %223 = arith.index_cast %c4_i32 : i32 to index
    %c0_81 = arith.constant 0 : index
    %c0_82 = arith.constant 0 : index
    %224 = vector.load %arg16[%223, %c0_81, %c0_82] : memref<8x2x256xf32, #tpu.memory_space<vmem>>, vector<1x2x128xf32>
    %225 = vector.shape_cast %224 : vector<1x2x128xf32> to vector<2x128xf32>
    %cst_83 = arith.constant dense<0.000000e+00> : vector<2x128xf32>
    %226 = tpu.matmul %198, %2, %cst_83 {dimension_numbers = #tpu.dot_dimension_numbers<[1], [0], [0], [1], [0, 0, 1, 1], [], []>} : vector<2x32xf32>, vector<32x128xf32>, vector<2x128xf32> -> vector<2x128xf32>
    %227 = arith.addf %225, %226 : vector<2x128xf32>
    %c7_i32_84 = arith.constant 7 : i32
    %228 = arith.subi %c7_i32_84, %c4_i32 : i32
    %229 = arith.index_cast %228 : i32 to index
    %c0_85 = arith.constant 0 : index
    %c128_86 = arith.constant 128 : index
    %230 = vector.load %arg16[%229, %c0_85, %c128_86] : memref<8x2x256xf32, #tpu.memory_space<vmem>>, vector<1x2x128xf32>
    %231 = vector.shape_cast %230 : vector<1x2x128xf32> to vector<2x128xf32>
    %cst_87 = arith.constant dense<0.000000e+00> : vector<2x128xf32>
    %232 = tpu.matmul %213, %3, %cst_87 {dimension_numbers = #tpu.dot_dimension_numbers<[1], [0], [0], [1], [0, 0, 1, 1], [], []>} : vector<2x32xf32>, vector<32x128xf32>, vector<2x128xf32> -> vector<2x128xf32>
    %233 = arith.addf %231, %232 : vector<2x128xf32>
    %234 = arith.negf %227 : vector<2x128xf32>
    %235 = math.exp %234 : vector<2x128xf32>
    %cst_88 = arith.constant 1.000000e+00 : f32
    %236 = vector.broadcast %cst_88 : f32 to vector<2x128xf32>
    %237 = arith.addf %236, %235 : vector<2x128xf32>
    %238 = arith.divf %236, %237 : vector<2x128xf32>
    %239 = math.tanh %227 : vector<2x128xf32>
    %240 = vector.extract_strided_slice %238 {offsets = [0, 0], sizes = [2, 32], strides = [1, 1]} : vector<2x128xf32> to vector<2x32xf32>
    %241 = vector.extract_strided_slice %238 {offsets = [0, 32], sizes = [2, 32], strides = [1, 1]} : vector<2x128xf32> to vector<2x32xf32>
    %242 = vector.extract_strided_slice %239 {offsets = [0, 64], sizes = [2, 32], strides = [1, 1]} : vector<2x128xf32> to vector<2x32xf32>
    %243 = vector.extract_strided_slice %238 {offsets = [0, 96], sizes = [2, 32], strides = [1, 1]} : vector<2x128xf32> to vector<2x32xf32>
    %244 = arith.mulf %241, %196 : vector<2x32xf32>
    %245 = arith.mulf %240, %242 : vector<2x32xf32>
    %246 = arith.addf %244, %245 : vector<2x32xf32>
    %247 = math.tanh %246 : vector<2x32xf32>
    %248 = arith.mulf %243, %247 : vector<2x32xf32>
    %249 = arith.negf %233 : vector<2x128xf32>
    %250 = math.exp %249 : vector<2x128xf32>
    %cst_89 = arith.constant 1.000000e+00 : f32
    %251 = vector.broadcast %cst_89 : f32 to vector<2x128xf32>
    %252 = arith.addf %251, %250 : vector<2x128xf32>
    %253 = arith.divf %251, %252 : vector<2x128xf32>
    %254 = math.tanh %233 : vector<2x128xf32>
    %255 = vector.extract_strided_slice %253 {offsets = [0, 0], sizes = [2, 32], strides = [1, 1]} : vector<2x128xf32> to vector<2x32xf32>
    %256 = vector.extract_strided_slice %253 {offsets = [0, 32], sizes = [2, 32], strides = [1, 1]} : vector<2x128xf32> to vector<2x32xf32>
    %257 = vector.extract_strided_slice %254 {offsets = [0, 64], sizes = [2, 32], strides = [1, 1]} : vector<2x128xf32> to vector<2x32xf32>
    %258 = vector.extract_strided_slice %253 {offsets = [0, 96], sizes = [2, 32], strides = [1, 1]} : vector<2x128xf32> to vector<2x32xf32>
    %259 = arith.mulf %256, %211 : vector<2x32xf32>
    %260 = arith.mulf %255, %257 : vector<2x32xf32>
    %261 = arith.addf %259, %260 : vector<2x32xf32>
    %262 = math.tanh %261 : vector<2x32xf32>
    %263 = arith.mulf %258, %262 : vector<2x32xf32>
    %264 = arith.index_cast %c4_i32 : i32 to index
    %c0_90 = arith.constant 0 : index
    %c0_91 = arith.constant 0 : index
    %265 = vector.load %arg19[%264, %c0_90, %c0_91] : memref<8x2x64xf32, #tpu.memory_space<vmem>>, vector<1x2x32xf32>
    %266 = vector.shape_cast %265 : vector<1x2x32xf32> to vector<2x32xf32>
    %267 = vector.shape_cast %248 : vector<2x32xf32> to vector<1x2x32xf32>
    tpu.vector_store %arg19[%264, %c0_90, %c0_91], %267 {strides = array<i32>} : memref<8x2x64xf32, #tpu.memory_space<vmem>>, vector<1x2x32xf32>,
    %c7_i32_92 = arith.constant 7 : i32
    %268 = arith.subi %c7_i32_92, %c4_i32 : i32
    %269 = arith.index_cast %268 : i32 to index
    %c0_93 = arith.constant 0 : index
    %c32_94 = arith.constant 32 : index
    %270 = vector.load %arg19[%269, %c0_93, %c32_94] : memref<8x2x64xf32, #tpu.memory_space<vmem>>, vector<1x2x32xf32>
    %271 = vector.shape_cast %270 : vector<1x2x32xf32> to vector<2x32xf32>
    %272 = vector.shape_cast %263 : vector<2x32xf32> to vector<1x2x32xf32>
    tpu.vector_store %arg19[%269, %c0_93, %c32_94], %272 {strides = array<i32>} : memref<8x2x64xf32, #tpu.memory_space<vmem>>, vector<1x2x32xf32>,
    %c5_i32 = arith.constant 5 : i32
    %273 = arith.index_cast %c5_i32 : i32 to index
    %c0_95 = arith.constant 0 : index
    %c0_96 = arith.constant 0 : index
    %274 = vector.load %arg16[%273, %c0_95, %c0_96] : memref<8x2x256xf32, #tpu.memory_space<vmem>>, vector<1x2x128xf32>
    %275 = vector.shape_cast %274 : vector<1x2x128xf32> to vector<2x128xf32>
    %cst_97 = arith.constant dense<0.000000e+00> : vector<2x128xf32>
    %276 = tpu.matmul %248, %2, %cst_97 {dimension_numbers = #tpu.dot_dimension_numbers<[1], [0], [0], [1], [0, 0, 1, 1], [], []>} : vector<2x32xf32>, vector<32x128xf32>, vector<2x128xf32> -> vector<2x128xf32>
    %277 = arith.addf %275, %276 : vector<2x128xf32>
    %c7_i32_98 = arith.constant 7 : i32
    %278 = arith.subi %c7_i32_98, %c5_i32 : i32
    %279 = arith.index_cast %278 : i32 to index
    %c0_99 = arith.constant 0 : index
    %c128_100 = arith.constant 128 : index
    %280 = vector.load %arg16[%279, %c0_99, %c128_100] : memref<8x2x256xf32, #tpu.memory_space<vmem>>, vector<1x2x128xf32>
    %281 = vector.shape_cast %280 : vector<1x2x128xf32> to vector<2x128xf32>
    %cst_101 = arith.constant dense<0.000000e+00> : vector<2x128xf32>
    %282 = tpu.matmul %263, %3, %cst_101 {dimension_numbers = #tpu.dot_dimension_numbers<[1], [0], [0], [1], [0, 0, 1, 1], [], []>} : vector<2x32xf32>, vector<32x128xf32>, vector<2x128xf32> -> vector<2x128xf32>
    %283 = arith.addf %281, %282 : vector<2x128xf32>
    %284 = arith.negf %277 : vector<2x128xf32>
    %285 = math.exp %284 : vector<2x128xf32>
    %cst_102 = arith.constant 1.000000e+00 : f32
    %286 = vector.broadcast %cst_102 : f32 to vector<2x128xf32>
    %287 = arith.addf %286, %285 : vector<2x128xf32>
    %288 = arith.divf %286, %287 : vector<2x128xf32>
    %289 = math.tanh %277 : vector<2x128xf32>
    %290 = vector.extract_strided_slice %288 {offsets = [0, 0], sizes = [2, 32], strides = [1, 1]} : vector<2x128xf32> to vector<2x32xf32>
    %291 = vector.extract_strided_slice %288 {offsets = [0, 32], sizes = [2, 32], strides = [1, 1]} : vector<2x128xf32> to vector<2x32xf32>
    %292 = vector.extract_strided_slice %289 {offsets = [0, 64], sizes = [2, 32], strides = [1, 1]} : vector<2x128xf32> to vector<2x32xf32>
    %293 = vector.extract_strided_slice %288 {offsets = [0, 96], sizes = [2, 32], strides = [1, 1]} : vector<2x128xf32> to vector<2x32xf32>
    %294 = arith.mulf %291, %246 : vector<2x32xf32>
    %295 = arith.mulf %290, %292 : vector<2x32xf32>
    %296 = arith.addf %294, %295 : vector<2x32xf32>
    %297 = math.tanh %296 : vector<2x32xf32>
    %298 = arith.mulf %293, %297 : vector<2x32xf32>
    %299 = arith.negf %283 : vector<2x128xf32>
    %300 = math.exp %299 : vector<2x128xf32>
    %cst_103 = arith.constant 1.000000e+00 : f32
    %301 = vector.broadcast %cst_103 : f32 to vector<2x128xf32>
    %302 = arith.addf %301, %300 : vector<2x128xf32>
    %303 = arith.divf %301, %302 : vector<2x128xf32>
    %304 = math.tanh %283 : vector<2x128xf32>
    %305 = vector.extract_strided_slice %303 {offsets = [0, 0], sizes = [2, 32], strides = [1, 1]} : vector<2x128xf32> to vector<2x32xf32>
    %306 = vector.extract_strided_slice %303 {offsets = [0, 32], sizes = [2, 32], strides = [1, 1]} : vector<2x128xf32> to vector<2x32xf32>
    %307 = vector.extract_strided_slice %304 {offsets = [0, 64], sizes = [2, 32], strides = [1, 1]} : vector<2x128xf32> to vector<2x32xf32>
    %308 = vector.extract_strided_slice %303 {offsets = [0, 96], sizes = [2, 32], strides = [1, 1]} : vector<2x128xf32> to vector<2x32xf32>
    %309 = arith.mulf %306, %261 : vector<2x32xf32>
    %310 = arith.mulf %305, %307 : vector<2x32xf32>
    %311 = arith.addf %309, %310 : vector<2x32xf32>
    %312 = math.tanh %311 : vector<2x32xf32>
    %313 = arith.mulf %308, %312 : vector<2x32xf32>
    %314 = arith.index_cast %c5_i32 : i32 to index
    %c0_104 = arith.constant 0 : index
    %c0_105 = arith.constant 0 : index
    %315 = vector.load %arg19[%314, %c0_104, %c0_105] : memref<8x2x64xf32, #tpu.memory_space<vmem>>, vector<1x2x32xf32>
    %316 = vector.shape_cast %315 : vector<1x2x32xf32> to vector<2x32xf32>
    %317 = vector.shape_cast %298 : vector<2x32xf32> to vector<1x2x32xf32>
    tpu.vector_store %arg19[%314, %c0_104, %c0_105], %317 {strides = array<i32>} : memref<8x2x64xf32, #tpu.memory_space<vmem>>, vector<1x2x32xf32>,
    %c7_i32_106 = arith.constant 7 : i32
    %318 = arith.subi %c7_i32_106, %c5_i32 : i32
    %319 = arith.index_cast %318 : i32 to index
    %c0_107 = arith.constant 0 : index
    %c32_108 = arith.constant 32 : index
    %320 = vector.load %arg19[%319, %c0_107, %c32_108] : memref<8x2x64xf32, #tpu.memory_space<vmem>>, vector<1x2x32xf32>
    %321 = vector.shape_cast %320 : vector<1x2x32xf32> to vector<2x32xf32>
    %322 = vector.shape_cast %313 : vector<2x32xf32> to vector<1x2x32xf32>
    tpu.vector_store %arg19[%319, %c0_107, %c32_108], %322 {strides = array<i32>} : memref<8x2x64xf32, #tpu.memory_space<vmem>>, vector<1x2x32xf32>,
    %c6_i32 = arith.constant 6 : i32
    %323 = arith.index_cast %c6_i32 : i32 to index
    %c0_109 = arith.constant 0 : index
    %c0_110 = arith.constant 0 : index
    %324 = vector.load %arg16[%323, %c0_109, %c0_110] : memref<8x2x256xf32, #tpu.memory_space<vmem>>, vector<1x2x128xf32>
    %325 = vector.shape_cast %324 : vector<1x2x128xf32> to vector<2x128xf32>
    %cst_111 = arith.constant dense<0.000000e+00> : vector<2x128xf32>
    %326 = tpu.matmul %298, %2, %cst_111 {dimension_numbers = #tpu.dot_dimension_numbers<[1], [0], [0], [1], [0, 0, 1, 1], [], []>} : vector<2x32xf32>, vector<32x128xf32>, vector<2x128xf32> -> vector<2x128xf32>
    %327 = arith.addf %325, %326 : vector<2x128xf32>
    %c7_i32_112 = arith.constant 7 : i32
    %328 = arith.subi %c7_i32_112, %c6_i32 : i32
    %329 = arith.index_cast %328 : i32 to index
    %c0_113 = arith.constant 0 : index
    %c128_114 = arith.constant 128 : index
    %330 = vector.load %arg16[%329, %c0_113, %c128_114] : memref<8x2x256xf32, #tpu.memory_space<vmem>>, vector<1x2x128xf32>
    %331 = vector.shape_cast %330 : vector<1x2x128xf32> to vector<2x128xf32>
    %cst_115 = arith.constant dense<0.000000e+00> : vector<2x128xf32>
    %332 = tpu.matmul %313, %3, %cst_115 {dimension_numbers = #tpu.dot_dimension_numbers<[1], [0], [0], [1], [0, 0, 1, 1], [], []>} : vector<2x32xf32>, vector<32x128xf32>, vector<2x128xf32> -> vector<2x128xf32>
    %333 = arith.addf %331, %332 : vector<2x128xf32>
    %334 = arith.negf %327 : vector<2x128xf32>
    %335 = math.exp %334 : vector<2x128xf32>
    %cst_116 = arith.constant 1.000000e+00 : f32
    %336 = vector.broadcast %cst_116 : f32 to vector<2x128xf32>
    %337 = arith.addf %336, %335 : vector<2x128xf32>
    %338 = arith.divf %336, %337 : vector<2x128xf32>
    %339 = math.tanh %327 : vector<2x128xf32>
    %340 = vector.extract_strided_slice %338 {offsets = [0, 0], sizes = [2, 32], strides = [1, 1]} : vector<2x128xf32> to vector<2x32xf32>
    %341 = vector.extract_strided_slice %338 {offsets = [0, 32], sizes = [2, 32], strides = [1, 1]} : vector<2x128xf32> to vector<2x32xf32>
    %342 = vector.extract_strided_slice %339 {offsets = [0, 64], sizes = [2, 32], strides = [1, 1]} : vector<2x128xf32> to vector<2x32xf32>
    %343 = vector.extract_strided_slice %338 {offsets = [0, 96], sizes = [2, 32], strides = [1, 1]} : vector<2x128xf32> to vector<2x32xf32>
    %344 = arith.mulf %341, %296 : vector<2x32xf32>
    %345 = arith.mulf %340, %342 : vector<2x32xf32>
    %346 = arith.addf %344, %345 : vector<2x32xf32>
    %347 = math.tanh %346 : vector<2x32xf32>
    %348 = arith.mulf %343, %347 : vector<2x32xf32>
    %349 = arith.negf %333 : vector<2x128xf32>
    %350 = math.exp %349 : vector<2x128xf32>
    %cst_117 = arith.constant 1.000000e+00 : f32
    %351 = vector.broadcast %cst_117 : f32 to vector<2x128xf32>
    %352 = arith.addf %351, %350 : vector<2x128xf32>
    %353 = arith.divf %351, %352 : vector<2x128xf32>
    %354 = math.tanh %333 : vector<2x128xf32>
    %355 = vector.extract_strided_slice %353 {offsets = [0, 0], sizes = [2, 32], strides = [1, 1]} : vector<2x128xf32> to vector<2x32xf32>
    %356 = vector.extract_strided_slice %353 {offsets = [0, 32], sizes = [2, 32], strides = [1, 1]} : vector<2x128xf32> to vector<2x32xf32>
    %357 = vector.extract_strided_slice %354 {offsets = [0, 64], sizes = [2, 32], strides = [1, 1]} : vector<2x128xf32> to vector<2x32xf32>
    %358 = vector.extract_strided_slice %353 {offsets = [0, 96], sizes = [2, 32], strides = [1, 1]} : vector<2x128xf32> to vector<2x32xf32>
    %359 = arith.mulf %356, %311 : vector<2x32xf32>
    %360 = arith.mulf %355, %357 : vector<2x32xf32>
    %361 = arith.addf %359, %360 : vector<2x32xf32>
    %362 = math.tanh %361 : vector<2x32xf32>
    %363 = arith.mulf %358, %362 : vector<2x32xf32>
    %364 = arith.index_cast %c6_i32 : i32 to index
    %c0_118 = arith.constant 0 : index
    %c0_119 = arith.constant 0 : index
    %365 = vector.load %arg19[%364, %c0_118, %c0_119] : memref<8x2x64xf32, #tpu.memory_space<vmem>>, vector<1x2x32xf32>
    %366 = vector.shape_cast %365 : vector<1x2x32xf32> to vector<2x32xf32>
    %367 = vector.shape_cast %348 : vector<2x32xf32> to vector<1x2x32xf32>
    tpu.vector_store %arg19[%364, %c0_118, %c0_119], %367 {strides = array<i32>} : memref<8x2x64xf32, #tpu.memory_space<vmem>>, vector<1x2x32xf32>,
    %c7_i32_120 = arith.constant 7 : i32
    %368 = arith.subi %c7_i32_120, %c6_i32 : i32
    %369 = arith.index_cast %368 : i32 to index
    %c0_121 = arith.constant 0 : index
    %c32_122 = arith.constant 32 : index
    %370 = vector.load %arg19[%369, %c0_121, %c32_122] : memref<8x2x64xf32, #tpu.memory_space<vmem>>, vector<1x2x32xf32>
    %371 = vector.shape_cast %370 : vector<1x2x32xf32> to vector<2x32xf32>
    %372 = vector.shape_cast %363 : vector<2x32xf32> to vector<1x2x32xf32>
    tpu.vector_store %arg19[%369, %c0_121, %c32_122], %372 {strides = array<i32>} : memref<8x2x64xf32, #tpu.memory_space<vmem>>, vector<1x2x32xf32>,
    %c7_i32_123 = arith.constant 7 : i32
    %373 = arith.index_cast %c7_i32_123 : i32 to index
    %c0_124 = arith.constant 0 : index
    %c0_125 = arith.constant 0 : index
    %374 = vector.load %arg16[%373, %c0_124, %c0_125] : memref<8x2x256xf32, #tpu.memory_space<vmem>>, vector<1x2x128xf32>
    %375 = vector.shape_cast %374 : vector<1x2x128xf32> to vector<2x128xf32>
    %cst_126 = arith.constant dense<0.000000e+00> : vector<2x128xf32>
    %376 = tpu.matmul %348, %2, %cst_126 {dimension_numbers = #tpu.dot_dimension_numbers<[1], [0], [0], [1], [0, 0, 1, 1], [], []>} : vector<2x32xf32>, vector<32x128xf32>, vector<2x128xf32> -> vector<2x128xf32>
    %377 = arith.addf %375, %376 : vector<2x128xf32>
    %c7_i32_127 = arith.constant 7 : i32
    %378 = arith.subi %c7_i32_127, %c7_i32_123 : i32
    %379 = arith.index_cast %378 : i32 to index
    %c0_128 = arith.constant 0 : index
    %c128_129 = arith.constant 128 : index
    %380 = vector.load %arg16[%379, %c0_128, %c128_129] : memref<8x2x256xf32, #tpu.memory_space<vmem>>, vector<1x2x128xf32>
    %381 = vector.shape_cast %380 : vector<1x2x128xf32> to vector<2x128xf32>
    %cst_130 = arith.constant dense<0.000000e+00> : vector<2x128xf32>
    %382 = tpu.matmul %363, %3, %cst_130 {dimension_numbers = #tpu.dot_dimension_numbers<[1], [0], [0], [1], [0, 0, 1, 1], [], []>} : vector<2x32xf32>, vector<32x128xf32>, vector<2x128xf32> -> vector<2x128xf32>
    %383 = arith.addf %381, %382 : vector<2x128xf32>
    %384 = arith.negf %377 : vector<2x128xf32>
    %385 = math.exp %384 : vector<2x128xf32>
    %cst_131 = arith.constant 1.000000e+00 : f32
    %386 = vector.broadcast %cst_131 : f32 to vector<2x128xf32>
    %387 = arith.addf %386, %385 : vector<2x128xf32>
    %388 = arith.divf %386, %387 : vector<2x128xf32>
    %389 = math.tanh %377 : vector<2x128xf32>
    %390 = vector.extract_strided_slice %388 {offsets = [0, 0], sizes = [2, 32], strides = [1, 1]} : vector<2x128xf32> to vector<2x32xf32>
    %391 = vector.extract_strided_slice %388 {offsets = [0, 32], sizes = [2, 32], strides = [1, 1]} : vector<2x128xf32> to vector<2x32xf32>
    %392 = vector.extract_strided_slice %389 {offsets = [0, 64], sizes = [2, 32], strides = [1, 1]} : vector<2x128xf32> to vector<2x32xf32>
    %393 = vector.extract_strided_slice %388 {offsets = [0, 96], sizes = [2, 32], strides = [1, 1]} : vector<2x128xf32> to vector<2x32xf32>
    %394 = arith.mulf %391, %346 : vector<2x32xf32>
    %395 = arith.mulf %390, %392 : vector<2x32xf32>
    %396 = arith.addf %394, %395 : vector<2x32xf32>
    %397 = math.tanh %396 : vector<2x32xf32>
    %398 = arith.mulf %393, %397 : vector<2x32xf32>
    %399 = arith.negf %383 : vector<2x128xf32>
    %400 = math.exp %399 : vector<2x128xf32>
    %cst_132 = arith.constant 1.000000e+00 : f32
    %401 = vector.broadcast %cst_132 : f32 to vector<2x128xf32>
    %402 = arith.addf %401, %400 : vector<2x128xf32>
    %403 = arith.divf %401, %402 : vector<2x128xf32>
    %404 = math.tanh %383 : vector<2x128xf32>
    %405 = vector.extract_strided_slice %403 {offsets = [0, 0], sizes = [2, 32], strides = [1, 1]} : vector<2x128xf32> to vector<2x32xf32>
    %406 = vector.extract_strided_slice %403 {offsets = [0, 32], sizes = [2, 32], strides = [1, 1]} : vector<2x128xf32> to vector<2x32xf32>
    %407 = vector.extract_strided_slice %404 {offsets = [0, 64], sizes = [2, 32], strides = [1, 1]} : vector<2x128xf32> to vector<2x32xf32>
    %408 = vector.extract_strided_slice %403 {offsets = [0, 96], sizes = [2, 32], strides = [1, 1]} : vector<2x128xf32> to vector<2x32xf32>
    %409 = arith.mulf %406, %361 : vector<2x32xf32>
    %410 = arith.mulf %405, %407 : vector<2x32xf32>
    %411 = arith.addf %409, %410 : vector<2x32xf32>
    %412 = math.tanh %411 : vector<2x32xf32>
    %413 = arith.mulf %408, %412 : vector<2x32xf32>
    %414 = arith.index_cast %c7_i32_123 : i32 to index
    %c0_133 = arith.constant 0 : index
    %c0_134 = arith.constant 0 : index
    %415 = vector.load %arg19[%414, %c0_133, %c0_134] : memref<8x2x64xf32, #tpu.memory_space<vmem>>, vector<1x2x32xf32>
    %416 = vector.shape_cast %415 : vector<1x2x32xf32> to vector<2x32xf32>
    %417 = vector.shape_cast %398 : vector<2x32xf32> to vector<1x2x32xf32>
    tpu.vector_store %arg19[%414, %c0_133, %c0_134], %417 {strides = array<i32>} : memref<8x2x64xf32, #tpu.memory_space<vmem>>, vector<1x2x32xf32>,
    %c7_i32_135 = arith.constant 7 : i32
    %418 = arith.subi %c7_i32_135, %c7_i32_123 : i32
    %419 = arith.index_cast %418 : i32 to index
    %c0_136 = arith.constant 0 : index
    %c32_137 = arith.constant 32 : index
    %420 = vector.load %arg19[%419, %c0_136, %c32_137] : memref<8x2x64xf32, #tpu.memory_space<vmem>>, vector<1x2x32xf32>
    %421 = vector.shape_cast %420 : vector<1x2x32xf32> to vector<2x32xf32>
    %422 = vector.shape_cast %413 : vector<2x32xf32> to vector<1x2x32xf32>
    tpu.vector_store %arg19[%419, %c0_136, %c32_137], %422 {strides = array<i32>} : memref<8x2x64xf32, #tpu.memory_space<vmem>>, vector<1x2x32xf32>,
    %c8_i32 = arith.constant 8 : i32
    %c0_i32_138 = arith.constant 0 : i32
    %423 = arith.index_cast %c0_i32_138 : i32 to index
    %c0_139 = arith.constant 0 : index
    %c0_140 = arith.constant 0 : index
    %424 = vector.load %arg17[%423, %c0_139, %c0_140] : memref<6x2x256xf32, #tpu.memory_space<vmem>>, vector<1x2x128xf32>
    %425 = vector.shape_cast %424 : vector<1x2x128xf32> to vector<2x128xf32>
    %cst_141 = arith.constant dense<0.000000e+00> : vector<2x128xf32>
    %426 = tpu.matmul %22, %2, %cst_141 {dimension_numbers = #tpu.dot_dimension_numbers<[1], [0], [0], [1], [0, 0, 1, 1], [], []>} : vector<2x32xf32>, vector<32x128xf32>, vector<2x128xf32> -> vector<2x128xf32>
    %427 = arith.addf %425, %426 : vector<2x128xf32>
    %c5_i32_142 = arith.constant 5 : i32
    %428 = arith.subi %c5_i32_142, %c0_i32_138 : i32
    %429 = arith.index_cast %428 : i32 to index
    %c0_143 = arith.constant 0 : index
    %c128_144 = arith.constant 128 : index
    %430 = vector.load %arg17[%429, %c0_143, %c128_144] : memref<6x2x256xf32, #tpu.memory_space<vmem>>, vector<1x2x128xf32>
    %431 = vector.shape_cast %430 : vector<1x2x128xf32> to vector<2x128xf32>
    %cst_145 = arith.constant dense<0.000000e+00> : vector<2x128xf32>
    %432 = tpu.matmul %22, %3, %cst_145 {dimension_numbers = #tpu.dot_dimension_numbers<[1], [0], [0], [1], [0, 0, 1, 1], [], []>} : vector<2x32xf32>, vector<32x128xf32>, vector<2x128xf32> -> vector<2x128xf32>
    %433 = arith.addf %431, %432 : vector<2x128xf32>
    %434 = arith.negf %427 : vector<2x128xf32>
    %435 = math.exp %434 : vector<2x128xf32>
    %cst_146 = arith.constant 1.000000e+00 : f32
    %436 = vector.broadcast %cst_146 : f32 to vector<2x128xf32>
    %437 = arith.addf %436, %435 : vector<2x128xf32>
    %438 = arith.divf %436, %437 : vector<2x128xf32>
    %439 = math.tanh %427 : vector<2x128xf32>
    %440 = vector.extract_strided_slice %438 {offsets = [0, 0], sizes = [2, 32], strides = [1, 1]} : vector<2x128xf32> to vector<2x32xf32>
    %441 = vector.extract_strided_slice %438 {offsets = [0, 32], sizes = [2, 32], strides = [1, 1]} : vector<2x128xf32> to vector<2x32xf32>
    %442 = vector.extract_strided_slice %439 {offsets = [0, 64], sizes = [2, 32], strides = [1, 1]} : vector<2x128xf32> to vector<2x32xf32>
    %443 = vector.extract_strided_slice %438 {offsets = [0, 96], sizes = [2, 32], strides = [1, 1]} : vector<2x128xf32> to vector<2x32xf32>
    %444 = arith.mulf %441, %22 : vector<2x32xf32>
    %445 = arith.mulf %440, %442 : vector<2x32xf32>
    %446 = arith.addf %444, %445 : vector<2x32xf32>
    %447 = math.tanh %446 : vector<2x32xf32>
    %448 = arith.mulf %443, %447 : vector<2x32xf32>
    %449 = arith.negf %433 : vector<2x128xf32>
    %450 = math.exp %449 : vector<2x128xf32>
    %cst_147 = arith.constant 1.000000e+00 : f32
    %451 = vector.broadcast %cst_147 : f32 to vector<2x128xf32>
    %452 = arith.addf %451, %450 : vector<2x128xf32>
    %453 = arith.divf %451, %452 : vector<2x128xf32>
    %454 = math.tanh %433 : vector<2x128xf32>
    %455 = vector.extract_strided_slice %453 {offsets = [0, 0], sizes = [2, 32], strides = [1, 1]} : vector<2x128xf32> to vector<2x32xf32>
    %456 = vector.extract_strided_slice %453 {offsets = [0, 32], sizes = [2, 32], strides = [1, 1]} : vector<2x128xf32> to vector<2x32xf32>
    %457 = vector.extract_strided_slice %454 {offsets = [0, 64], sizes = [2, 32], strides = [1, 1]} : vector<2x128xf32> to vector<2x32xf32>
    %458 = vector.extract_strided_slice %453 {offsets = [0, 96], sizes = [2, 32], strides = [1, 1]} : vector<2x128xf32> to vector<2x32xf32>
    %459 = arith.mulf %456, %22 : vector<2x32xf32>
    %460 = arith.mulf %455, %457 : vector<2x32xf32>
    %461 = arith.addf %459, %460 : vector<2x32xf32>
    %462 = math.tanh %461 : vector<2x32xf32>
    %463 = arith.mulf %458, %462 : vector<2x32xf32>
    %464 = arith.index_cast %c0_i32_138 : i32 to index
    %c0_148 = arith.constant 0 : index
    %c0_149 = arith.constant 0 : index
    %465 = vector.load %arg20[%464, %c0_148, %c0_149] : memref<6x2x64xf32, #tpu.memory_space<vmem>>, vector<1x2x32xf32>
    %466 = vector.shape_cast %465 : vector<1x2x32xf32> to vector<2x32xf32>
    %467 = vector.shape_cast %448 : vector<2x32xf32> to vector<1x2x32xf32>
    tpu.vector_store %arg20[%464, %c0_148, %c0_149], %467 {strides = array<i32>} : memref<6x2x64xf32, #tpu.memory_space<vmem>>, vector<1x2x32xf32>,
    %c5_i32_150 = arith.constant 5 : i32
    %468 = arith.subi %c5_i32_150, %c0_i32_138 : i32
    %469 = arith.index_cast %468 : i32 to index
    %c0_151 = arith.constant 0 : index
    %c32_152 = arith.constant 32 : index
    %470 = vector.load %arg20[%469, %c0_151, %c32_152] : memref<6x2x64xf32, #tpu.memory_space<vmem>>, vector<1x2x32xf32>
    %471 = vector.shape_cast %470 : vector<1x2x32xf32> to vector<2x32xf32>
    %472 = vector.shape_cast %463 : vector<2x32xf32> to vector<1x2x32xf32>
    tpu.vector_store %arg20[%469, %c0_151, %c32_152], %472 {strides = array<i32>} : memref<6x2x64xf32, #tpu.memory_space<vmem>>, vector<1x2x32xf32>,
    %c1_i32_153 = arith.constant 1 : i32
    %473 = arith.index_cast %c1_i32_153 : i32 to index
    %c0_154 = arith.constant 0 : index
    %c0_155 = arith.constant 0 : index
    %474 = vector.load %arg17[%473, %c0_154, %c0_155] : memref<6x2x256xf32, #tpu.memory_space<vmem>>, vector<1x2x128xf32>
    %475 = vector.shape_cast %474 : vector<1x2x128xf32> to vector<2x128xf32>
    %cst_156 = arith.constant dense<0.000000e+00> : vector<2x128xf32>
    %476 = tpu.matmul %448, %2, %cst_156 {dimension_numbers = #tpu.dot_dimension_numbers<[1], [0], [0], [1], [0, 0, 1, 1], [], []>} : vector<2x32xf32>, vector<32x128xf32>, vector<2x128xf32> -> vector<2x128xf32>
    %477 = arith.addf %475, %476 : vector<2x128xf32>
    %c5_i32_157 = arith.constant 5 : i32
    %478 = arith.subi %c5_i32_157, %c1_i32_153 : i32
    %479 = arith.index_cast %478 : i32 to index
    %c0_158 = arith.constant 0 : index
    %c128_159 = arith.constant 128 : index
    %480 = vector.load %arg17[%479, %c0_158, %c128_159] : memref<6x2x256xf32, #tpu.memory_space<vmem>>, vector<1x2x128xf32>
    %481 = vector.shape_cast %480 : vector<1x2x128xf32> to vector<2x128xf32>
    %cst_160 = arith.constant dense<0.000000e+00> : vector<2x128xf32>
    %482 = tpu.matmul %463, %3, %cst_160 {dimension_numbers = #tpu.dot_dimension_numbers<[1], [0], [0], [1], [0, 0, 1, 1], [], []>} : vector<2x32xf32>, vector<32x128xf32>, vector<2x128xf32> -> vector<2x128xf32>
    %483 = arith.addf %481, %482 : vector<2x128xf32>
    %484 = arith.negf %477 : vector<2x128xf32>
    %485 = math.exp %484 : vector<2x128xf32>
    %cst_161 = arith.constant 1.000000e+00 : f32
    %486 = vector.broadcast %cst_161 : f32 to vector<2x128xf32>
    %487 = arith.addf %486, %485 : vector<2x128xf32>
    %488 = arith.divf %486, %487 : vector<2x128xf32>
    %489 = math.tanh %477 : vector<2x128xf32>
    %490 = vector.extract_strided_slice %488 {offsets = [0, 0], sizes = [2, 32], strides = [1, 1]} : vector<2x128xf32> to vector<2x32xf32>
    %491 = vector.extract_strided_slice %488 {offsets = [0, 32], sizes = [2, 32], strides = [1, 1]} : vector<2x128xf32> to vector<2x32xf32>
    %492 = vector.extract_strided_slice %489 {offsets = [0, 64], sizes = [2, 32], strides = [1, 1]} : vector<2x128xf32> to vector<2x32xf32>
    %493 = vector.extract_strided_slice %488 {offsets = [0, 96], sizes = [2, 32], strides = [1, 1]} : vector<2x128xf32> to vector<2x32xf32>
    %494 = arith.mulf %491, %446 : vector<2x32xf32>
    %495 = arith.mulf %490, %492 : vector<2x32xf32>
    %496 = arith.addf %494, %495 : vector<2x32xf32>
    %497 = math.tanh %496 : vector<2x32xf32>
    %498 = arith.mulf %493, %497 : vector<2x32xf32>
    %499 = arith.negf %483 : vector<2x128xf32>
    %500 = math.exp %499 : vector<2x128xf32>
    %cst_162 = arith.constant 1.000000e+00 : f32
    %501 = vector.broadcast %cst_162 : f32 to vector<2x128xf32>
    %502 = arith.addf %501, %500 : vector<2x128xf32>
    %503 = arith.divf %501, %502 : vector<2x128xf32>
    %504 = math.tanh %483 : vector<2x128xf32>
    %505 = vector.extract_strided_slice %503 {offsets = [0, 0], sizes = [2, 32], strides = [1, 1]} : vector<2x128xf32> to vector<2x32xf32>
    %506 = vector.extract_strided_slice %503 {offsets = [0, 32], sizes = [2, 32], strides = [1, 1]} : vector<2x128xf32> to vector<2x32xf32>
    %507 = vector.extract_strided_slice %504 {offsets = [0, 64], sizes = [2, 32], strides = [1, 1]} : vector<2x128xf32> to vector<2x32xf32>
    %508 = vector.extract_strided_slice %503 {offsets = [0, 96], sizes = [2, 32], strides = [1, 1]} : vector<2x128xf32> to vector<2x32xf32>
    %509 = arith.mulf %506, %461 : vector<2x32xf32>
    %510 = arith.mulf %505, %507 : vector<2x32xf32>
    %511 = arith.addf %509, %510 : vector<2x32xf32>
    %512 = math.tanh %511 : vector<2x32xf32>
    %513 = arith.mulf %508, %512 : vector<2x32xf32>
    %514 = arith.index_cast %c1_i32_153 : i32 to index
    %c0_163 = arith.constant 0 : index
    %c0_164 = arith.constant 0 : index
    %515 = vector.load %arg20[%514, %c0_163, %c0_164] : memref<6x2x64xf32, #tpu.memory_space<vmem>>, vector<1x2x32xf32>
    %516 = vector.shape_cast %515 : vector<1x2x32xf32> to vector<2x32xf32>
    %517 = vector.shape_cast %498 : vector<2x32xf32> to vector<1x2x32xf32>
    tpu.vector_store %arg20[%514, %c0_163, %c0_164], %517 {strides = array<i32>} : memref<6x2x64xf32, #tpu.memory_space<vmem>>, vector<1x2x32xf32>,
    %c5_i32_165 = arith.constant 5 : i32
    %518 = arith.subi %c5_i32_165, %c1_i32_153 : i32
    %519 = arith.index_cast %518 : i32 to index
    %c0_166 = arith.constant 0 : index
    %c32_167 = arith.constant 32 : index
    %520 = vector.load %arg20[%519, %c0_166, %c32_167] : memref<6x2x64xf32, #tpu.memory_space<vmem>>, vector<1x2x32xf32>
    %521 = vector.shape_cast %520 : vector<1x2x32xf32> to vector<2x32xf32>
    %522 = vector.shape_cast %513 : vector<2x32xf32> to vector<1x2x32xf32>
    tpu.vector_store %arg20[%519, %c0_166, %c32_167], %522 {strides = array<i32>} : memref<6x2x64xf32, #tpu.memory_space<vmem>>, vector<1x2x32xf32>,
    %c2_i32_168 = arith.constant 2 : i32
    %523 = arith.index_cast %c2_i32_168 : i32 to index
    %c0_169 = arith.constant 0 : index
    %c0_170 = arith.constant 0 : index
    %524 = vector.load %arg17[%523, %c0_169, %c0_170] : memref<6x2x256xf32, #tpu.memory_space<vmem>>, vector<1x2x128xf32>
    %525 = vector.shape_cast %524 : vector<1x2x128xf32> to vector<2x128xf32>
    %cst_171 = arith.constant dense<0.000000e+00> : vector<2x128xf32>
    %526 = tpu.matmul %498, %2, %cst_171 {dimension_numbers = #tpu.dot_dimension_numbers<[1], [0], [0], [1], [0, 0, 1, 1], [], []>} : vector<2x32xf32>, vector<32x128xf32>, vector<2x128xf32> -> vector<2x128xf32>
    %527 = arith.addf %525, %526 : vector<2x128xf32>
    %c5_i32_172 = arith.constant 5 : i32
    %528 = arith.subi %c5_i32_172, %c2_i32_168 : i32
    %529 = arith.index_cast %528 : i32 to index
    %c0_173 = arith.constant 0 : index
    %c128_174 = arith.constant 128 : index
    %530 = vector.load %arg17[%529, %c0_173, %c128_174] : memref<6x2x256xf32, #tpu.memory_space<vmem>>, vector<1x2x128xf32>
    %531 = vector.shape_cast %530 : vector<1x2x128xf32> to vector<2x128xf32>
    %cst_175 = arith.constant dense<0.000000e+00> : vector<2x128xf32>
    %532 = tpu.matmul %513, %3, %cst_175 {dimension_numbers = #tpu.dot_dimension_numbers<[1], [0], [0], [1], [0, 0, 1, 1], [], []>} : vector<2x32xf32>, vector<32x128xf32>, vector<2x128xf32> -> vector<2x128xf32>
    %533 = arith.addf %531, %532 : vector<2x128xf32>
    %534 = arith.negf %527 : vector<2x128xf32>
    %535 = math.exp %534 : vector<2x128xf32>
    %cst_176 = arith.constant 1.000000e+00 : f32
    %536 = vector.broadcast %cst_176 : f32 to vector<2x128xf32>
    %537 = arith.addf %536, %535 : vector<2x128xf32>
    %538 = arith.divf %536, %537 : vector<2x128xf32>
    %539 = math.tanh %527 : vector<2x128xf32>
    %540 = vector.extract_strided_slice %538 {offsets = [0, 0], sizes = [2, 32], strides = [1, 1]} : vector<2x128xf32> to vector<2x32xf32>
    %541 = vector.extract_strided_slice %538 {offsets = [0, 32], sizes = [2, 32], strides = [1, 1]} : vector<2x128xf32> to vector<2x32xf32>
    %542 = vector.extract_strided_slice %539 {offsets = [0, 64], sizes = [2, 32], strides = [1, 1]} : vector<2x128xf32> to vector<2x32xf32>
    %543 = vector.extract_strided_slice %538 {offsets = [0, 96], sizes = [2, 32], strides = [1, 1]} : vector<2x128xf32> to vector<2x32xf32>
    %544 = arith.mulf %541, %496 : vector<2x32xf32>
    %545 = arith.mulf %540, %542 : vector<2x32xf32>
    %546 = arith.addf %544, %545 : vector<2x32xf32>
    %547 = math.tanh %546 : vector<2x32xf32>
    %548 = arith.mulf %543, %547 : vector<2x32xf32>
    %549 = arith.negf %533 : vector<2x128xf32>
    %550 = math.exp %549 : vector<2x128xf32>
    %cst_177 = arith.constant 1.000000e+00 : f32
    %551 = vector.broadcast %cst_177 : f32 to vector<2x128xf32>
    %552 = arith.addf %551, %550 : vector<2x128xf32>
    %553 = arith.divf %551, %552 : vector<2x128xf32>
    %554 = math.tanh %533 : vector<2x128xf32>
    %555 = vector.extract_strided_slice %553 {offsets = [0, 0], sizes = [2, 32], strides = [1, 1]} : vector<2x128xf32> to vector<2x32xf32>
    %556 = vector.extract_strided_slice %553 {offsets = [0, 32], sizes = [2, 32], strides = [1, 1]} : vector<2x128xf32> to vector<2x32xf32>
    %557 = vector.extract_strided_slice %554 {offsets = [0, 64], sizes = [2, 32], strides = [1, 1]} : vector<2x128xf32> to vector<2x32xf32>
    %558 = vector.extract_strided_slice %553 {offsets = [0, 96], sizes = [2, 32], strides = [1, 1]} : vector<2x128xf32> to vector<2x32xf32>
    %559 = arith.mulf %556, %511 : vector<2x32xf32>
    %560 = arith.mulf %555, %557 : vector<2x32xf32>
    %561 = arith.addf %559, %560 : vector<2x32xf32>
    %562 = math.tanh %561 : vector<2x32xf32>
    %563 = arith.mulf %558, %562 : vector<2x32xf32>
    %564 = arith.index_cast %c2_i32_168 : i32 to index
    %c0_178 = arith.constant 0 : index
    %c0_179 = arith.constant 0 : index
    %565 = vector.load %arg20[%564, %c0_178, %c0_179] : memref<6x2x64xf32, #tpu.memory_space<vmem>>, vector<1x2x32xf32>
    %566 = vector.shape_cast %565 : vector<1x2x32xf32> to vector<2x32xf32>
    %567 = vector.shape_cast %548 : vector<2x32xf32> to vector<1x2x32xf32>
    tpu.vector_store %arg20[%564, %c0_178, %c0_179], %567 {strides = array<i32>} : memref<6x2x64xf32, #tpu.memory_space<vmem>>, vector<1x2x32xf32>,
    %c5_i32_180 = arith.constant 5 : i32
    %568 = arith.subi %c5_i32_180, %c2_i32_168 : i32
    %569 = arith.index_cast %568 : i32 to index
    %c0_181 = arith.constant 0 : index
    %c32_182 = arith.constant 32 : index
    %570 = vector.load %arg20[%569, %c0_181, %c32_182] : memref<6x2x64xf32, #tpu.memory_space<vmem>>, vector<1x2x32xf32>
    %571 = vector.shape_cast %570 : vector<1x2x32xf32> to vector<2x32xf32>
    %572 = vector.shape_cast %563 : vector<2x32xf32> to vector<1x2x32xf32>
    tpu.vector_store %arg20[%569, %c0_181, %c32_182], %572 {strides = array<i32>} : memref<6x2x64xf32, #tpu.memory_space<vmem>>, vector<1x2x32xf32>,
    %c3_i32_183 = arith.constant 3 : i32
    %573 = arith.index_cast %c3_i32_183 : i32 to index
    %c0_184 = arith.constant 0 : index
    %c0_185 = arith.constant 0 : index
    %574 = vector.load %arg17[%573, %c0_184, %c0_185] : memref<6x2x256xf32, #tpu.memory_space<vmem>>, vector<1x2x128xf32>
    %575 = vector.shape_cast %574 : vector<1x2x128xf32> to vector<2x128xf32>
    %cst_186 = arith.constant dense<0.000000e+00> : vector<2x128xf32>
    %576 = tpu.matmul %548, %2, %cst_186 {dimension_numbers = #tpu.dot_dimension_numbers<[1], [0], [0], [1], [0, 0, 1, 1], [], []>} : vector<2x32xf32>, vector<32x128xf32>, vector<2x128xf32> -> vector<2x128xf32>
    %577 = arith.addf %575, %576 : vector<2x128xf32>
    %c5_i32_187 = arith.constant 5 : i32
    %578 = arith.subi %c5_i32_187, %c3_i32_183 : i32
    %579 = arith.index_cast %578 : i32 to index
    %c0_188 = arith.constant 0 : index
    %c128_189 = arith.constant 128 : index
    %580 = vector.load %arg17[%579, %c0_188, %c128_189] : memref<6x2x256xf32, #tpu.memory_space<vmem>>, vector<1x2x128xf32>
    %581 = vector.shape_cast %580 : vector<1x2x128xf32> to vector<2x128xf32>
    %cst_190 = arith.constant dense<0.000000e+00> : vector<2x128xf32>
    %582 = tpu.matmul %563, %3, %cst_190 {dimension_numbers = #tpu.dot_dimension_numbers<[1], [0], [0], [1], [0, 0, 1, 1], [], []>} : vector<2x32xf32>, vector<32x128xf32>, vector<2x128xf32> -> vector<2x128xf32>
    %583 = arith.addf %581, %582 : vector<2x128xf32>
    %584 = arith.negf %577 : vector<2x128xf32>
    %585 = math.exp %584 : vector<2x128xf32>
    %cst_191 = arith.constant 1.000000e+00 : f32
    %586 = vector.broadcast %cst_191 : f32 to vector<2x128xf32>
    %587 = arith.addf %586, %585 : vector<2x128xf32>
    %588 = arith.divf %586, %587 : vector<2x128xf32>
    %589 = math.tanh %577 : vector<2x128xf32>
    %590 = vector.extract_strided_slice %588 {offsets = [0, 0], sizes = [2, 32], strides = [1, 1]} : vector<2x128xf32> to vector<2x32xf32>
    %591 = vector.extract_strided_slice %588 {offsets = [0, 32], sizes = [2, 32], strides = [1, 1]} : vector<2x128xf32> to vector<2x32xf32>
    %592 = vector.extract_strided_slice %589 {offsets = [0, 64], sizes = [2, 32], strides = [1, 1]} : vector<2x128xf32> to vector<2x32xf32>
    %593 = vector.extract_strided_slice %588 {offsets = [0, 96], sizes = [2, 32], strides = [1, 1]} : vector<2x128xf32> to vector<2x32xf32>
    %594 = arith.mulf %591, %546 : vector<2x32xf32>
    %595 = arith.mulf %590, %592 : vector<2x32xf32>
    %596 = arith.addf %594, %595 : vector<2x32xf32>
    %597 = math.tanh %596 : vector<2x32xf32>
    %598 = arith.mulf %593, %597 : vector<2x32xf32>
    %599 = arith.negf %583 : vector<2x128xf32>
    %600 = math.exp %599 : vector<2x128xf32>
    %cst_192 = arith.constant 1.000000e+00 : f32
    %601 = vector.broadcast %cst_192 : f32 to vector<2x128xf32>
    %602 = arith.addf %601, %600 : vector<2x128xf32>
    %603 = arith.divf %601, %602 : vector<2x128xf32>
    %604 = math.tanh %583 : vector<2x128xf32>
    %605 = vector.extract_strided_slice %603 {offsets = [0, 0], sizes = [2, 32], strides = [1, 1]} : vector<2x128xf32> to vector<2x32xf32>
    %606 = vector.extract_strided_slice %603 {offsets = [0, 32], sizes = [2, 32], strides = [1, 1]} : vector<2x128xf32> to vector<2x32xf32>
    %607 = vector.extract_strided_slice %604 {offsets = [0, 64], sizes = [2, 32], strides = [1, 1]} : vector<2x128xf32> to vector<2x32xf32>
    %608 = vector.extract_strided_slice %603 {offsets = [0, 96], sizes = [2, 32], strides = [1, 1]} : vector<2x128xf32> to vector<2x32xf32>
    %609 = arith.mulf %606, %561 : vector<2x32xf32>
    %610 = arith.mulf %605, %607 : vector<2x32xf32>
    %611 = arith.addf %609, %610 : vector<2x32xf32>
    %612 = math.tanh %611 : vector<2x32xf32>
    %613 = arith.mulf %608, %612 : vector<2x32xf32>
    %614 = arith.index_cast %c3_i32_183 : i32 to index
    %c0_193 = arith.constant 0 : index
    %c0_194 = arith.constant 0 : index
    %615 = vector.load %arg20[%614, %c0_193, %c0_194] : memref<6x2x64xf32, #tpu.memory_space<vmem>>, vector<1x2x32xf32>
    %616 = vector.shape_cast %615 : vector<1x2x32xf32> to vector<2x32xf32>
    %617 = vector.shape_cast %598 : vector<2x32xf32> to vector<1x2x32xf32>
    tpu.vector_store %arg20[%614, %c0_193, %c0_194], %617 {strides = array<i32>} : memref<6x2x64xf32, #tpu.memory_space<vmem>>, vector<1x2x32xf32>,
    %c5_i32_195 = arith.constant 5 : i32
    %618 = arith.subi %c5_i32_195, %c3_i32_183 : i32
    %619 = arith.index_cast %618 : i32 to index
    %c0_196 = arith.constant 0 : index
    %c32_197 = arith.constant 32 : index
    %620 = vector.load %arg20[%619, %c0_196, %c32_197] : memref<6x2x64xf32, #tpu.memory_space<vmem>>, vector<1x2x32xf32>
    %621 = vector.shape_cast %620 : vector<1x2x32xf32> to vector<2x32xf32>
    %622 = vector.shape_cast %613 : vector<2x32xf32> to vector<1x2x32xf32>
    tpu.vector_store %arg20[%619, %c0_196, %c32_197], %622 {strides = array<i32>} : memref<6x2x64xf32, #tpu.memory_space<vmem>>, vector<1x2x32xf32>,
    %c4_i32_198 = arith.constant 4 : i32
    %623 = arith.index_cast %c4_i32_198 : i32 to index
    %c0_199 = arith.constant 0 : index
    %c0_200 = arith.constant 0 : index
    %624 = vector.load %arg17[%623, %c0_199, %c0_200] : memref<6x2x256xf32, #tpu.memory_space<vmem>>, vector<1x2x128xf32>
    %625 = vector.shape_cast %624 : vector<1x2x128xf32> to vector<2x128xf32>
    %cst_201 = arith.constant dense<0.000000e+00> : vector<2x128xf32>
    %626 = tpu.matmul %598, %2, %cst_201 {dimension_numbers = #tpu.dot_dimension_numbers<[1], [0], [0], [1], [0, 0, 1, 1], [], []>} : vector<2x32xf32>, vector<32x128xf32>, vector<2x128xf32> -> vector<2x128xf32>
    %627 = arith.addf %625, %626 : vector<2x128xf32>
    %c5_i32_202 = arith.constant 5 : i32
    %628 = arith.subi %c5_i32_202, %c4_i32_198 : i32
    %629 = arith.index_cast %628 : i32 to index
    %c0_203 = arith.constant 0 : index
    %c128_204 = arith.constant 128 : index
    %630 = vector.load %arg17[%629, %c0_203, %c128_204] : memref<6x2x256xf32, #tpu.memory_space<vmem>>, vector<1x2x128xf32>
    %631 = vector.shape_cast %630 : vector<1x2x128xf32> to vector<2x128xf32>
    %cst_205 = arith.constant dense<0.000000e+00> : vector<2x128xf32>
    %632 = tpu.matmul %613, %3, %cst_205 {dimension_numbers = #tpu.dot_dimension_numbers<[1], [0], [0], [1], [0, 0, 1, 1], [], []>} : vector<2x32xf32>, vector<32x128xf32>, vector<2x128xf32> -> vector<2x128xf32>
    %633 = arith.addf %631, %632 : vector<2x128xf32>
    %634 = arith.negf %627 : vector<2x128xf32>
    %635 = math.exp %634 : vector<2x128xf32>
    %cst_206 = arith.constant 1.000000e+00 : f32
    %636 = vector.broadcast %cst_206 : f32 to vector<2x128xf32>
    %637 = arith.addf %636, %635 : vector<2x128xf32>
    %638 = arith.divf %636, %637 : vector<2x128xf32>
    %639 = math.tanh %627 : vector<2x128xf32>
    %640 = vector.extract_strided_slice %638 {offsets = [0, 0], sizes = [2, 32], strides = [1, 1]} : vector<2x128xf32> to vector<2x32xf32>
    %641 = vector.extract_strided_slice %638 {offsets = [0, 32], sizes = [2, 32], strides = [1, 1]} : vector<2x128xf32> to vector<2x32xf32>
    %642 = vector.extract_strided_slice %639 {offsets = [0, 64], sizes = [2, 32], strides = [1, 1]} : vector<2x128xf32> to vector<2x32xf32>
    %643 = vector.extract_strided_slice %638 {offsets = [0, 96], sizes = [2, 32], strides = [1, 1]} : vector<2x128xf32> to vector<2x32xf32>
    %644 = arith.mulf %641, %596 : vector<2x32xf32>
    %645 = arith.mulf %640, %642 : vector<2x32xf32>
    %646 = arith.addf %644, %645 : vector<2x32xf32>
    %647 = math.tanh %646 : vector<2x32xf32>
    %648 = arith.mulf %643, %647 : vector<2x32xf32>
    %649 = arith.negf %633 : vector<2x128xf32>
    %650 = math.exp %649 : vector<2x128xf32>
    %cst_207 = arith.constant 1.000000e+00 : f32
    %651 = vector.broadcast %cst_207 : f32 to vector<2x128xf32>
    %652 = arith.addf %651, %650 : vector<2x128xf32>
    %653 = arith.divf %651, %652 : vector<2x128xf32>
    %654 = math.tanh %633 : vector<2x128xf32>
    %655 = vector.extract_strided_slice %653 {offsets = [0, 0], sizes = [2, 32], strides = [1, 1]} : vector<2x128xf32> to vector<2x32xf32>
    %656 = vector.extract_strided_slice %653 {offsets = [0, 32], sizes = [2, 32], strides = [1, 1]} : vector<2x128xf32> to vector<2x32xf32>
    %657 = vector.extract_strided_slice %654 {offsets = [0, 64], sizes = [2, 32], strides = [1, 1]} : vector<2x128xf32> to vector<2x32xf32>
    %658 = vector.extract_strided_slice %653 {offsets = [0, 96], sizes = [2, 32], strides = [1, 1]} : vector<2x128xf32> to vector<2x32xf32>
    %659 = arith.mulf %656, %611 : vector<2x32xf32>
    %660 = arith.mulf %655, %657 : vector<2x32xf32>
    %661 = arith.addf %659, %660 : vector<2x32xf32>
    %662 = math.tanh %661 : vector<2x32xf32>
    %663 = arith.mulf %658, %662 : vector<2x32xf32>
    %664 = arith.index_cast %c4_i32_198 : i32 to index
    %c0_208 = arith.constant 0 : index
    %c0_209 = arith.constant 0 : index
    %665 = vector.load %arg20[%664, %c0_208, %c0_209] : memref<6x2x64xf32, #tpu.memory_space<vmem>>, vector<1x2x32xf32>
    %666 = vector.shape_cast %665 : vector<1x2x32xf32> to vector<2x32xf32>
    %667 = vector.shape_cast %648 : vector<2x32xf32> to vector<1x2x32xf32>
    tpu.vector_store %arg20[%664, %c0_208, %c0_209], %667 {strides = array<i32>} : memref<6x2x64xf32, #tpu.memory_space<vmem>>, vector<1x2x32xf32>,
    %c5_i32_210 = arith.constant 5 : i32
    %668 = arith.subi %c5_i32_210, %c4_i32_198 : i32
    %669 = arith.index_cast %668 : i32 to index
    %c0_211 = arith.constant 0 : index
    %c32_212 = arith.constant 32 : index
    %670 = vector.load %arg20[%669, %c0_211, %c32_212] : memref<6x2x64xf32, #tpu.memory_space<vmem>>, vector<1x2x32xf32>
    %671 = vector.shape_cast %670 : vector<1x2x32xf32> to vector<2x32xf32>
    %672 = vector.shape_cast %663 : vector<2x32xf32> to vector<1x2x32xf32>
    tpu.vector_store %arg20[%669, %c0_211, %c32_212], %672 {strides = array<i32>} : memref<6x2x64xf32, #tpu.memory_space<vmem>>, vector<1x2x32xf32>,
    %c5_i32_213 = arith.constant 5 : i32
    %673 = arith.index_cast %c5_i32_213 : i32 to index
    %c0_214 = arith.constant 0 : index
    %c0_215 = arith.constant 0 : index
    %674 = vector.load %arg17[%673, %c0_214, %c0_215] : memref<6x2x256xf32, #tpu.memory_space<vmem>>, vector<1x2x128xf32>
    %675 = vector.shape_cast %674 : vector<1x2x128xf32> to vector<2x128xf32>
    %cst_216 = arith.constant dense<0.000000e+00> : vector<2x128xf32>
    %676 = tpu.matmul %648, %2, %cst_216 {dimension_numbers = #tpu.dot_dimension_numbers<[1], [0], [0], [1], [0, 0, 1, 1], [], []>} : vector<2x32xf32>, vector<32x128xf32>, vector<2x128xf32> -> vector<2x128xf32>
    %677 = arith.addf %675, %676 : vector<2x128xf32>
    %c5_i32_217 = arith.constant 5 : i32
    %678 = arith.subi %c5_i32_217, %c5_i32_213 : i32
    %679 = arith.index_cast %678 : i32 to index
    %c0_218 = arith.constant 0 : index
    %c128_219 = arith.constant 128 : index
    %680 = vector.load %arg17[%679, %c0_218, %c128_219] : memref<6x2x256xf32, #tpu.memory_space<vmem>>, vector<1x2x128xf32>
    %681 = vector.shape_cast %680 : vector<1x2x128xf32> to vector<2x128xf32>
    %cst_220 = arith.constant dense<0.000000e+00> : vector<2x128xf32>
    %682 = tpu.matmul %663, %3, %cst_220 {dimension_numbers = #tpu.dot_dimension_numbers<[1], [0], [0], [1], [0, 0, 1, 1], [], []>} : vector<2x32xf32>, vector<32x128xf32>, vector<2x128xf32> -> vector<2x128xf32>
    %683 = arith.addf %681, %682 : vector<2x128xf32>
    %684 = arith.negf %677 : vector<2x128xf32>
    %685 = math.exp %684 : vector<2x128xf32>
    %cst_221 = arith.constant 1.000000e+00 : f32
    %686 = vector.broadcast %cst_221 : f32 to vector<2x128xf32>
    %687 = arith.addf %686, %685 : vector<2x128xf32>
    %688 = arith.divf %686, %687 : vector<2x128xf32>
    %689 = math.tanh %677 : vector<2x128xf32>
    %690 = vector.extract_strided_slice %688 {offsets = [0, 0], sizes = [2, 32], strides = [1, 1]} : vector<2x128xf32> to vector<2x32xf32>
    %691 = vector.extract_strided_slice %688 {offsets = [0, 32], sizes = [2, 32], strides = [1, 1]} : vector<2x128xf32> to vector<2x32xf32>
    %692 = vector.extract_strided_slice %689 {offsets = [0, 64], sizes = [2, 32], strides = [1, 1]} : vector<2x128xf32> to vector<2x32xf32>
    %693 = vector.extract_strided_slice %688 {offsets = [0, 96], sizes = [2, 32], strides = [1, 1]} : vector<2x128xf32> to vector<2x32xf32>
    %694 = arith.mulf %691, %646 : vector<2x32xf32>
    %695 = arith.mulf %690, %692 : vector<2x32xf32>
    %696 = arith.addf %694, %695 : vector<2x32xf32>
    %697 = math.tanh %696 : vector<2x32xf32>
    %698 = arith.mulf %693, %697 : vector<2x32xf32>
    %699 = arith.negf %683 : vector<2x128xf32>
    %700 = math.exp %699 : vector<2x128xf32>
    %cst_222 = arith.constant 1.000000e+00 : f32
    %701 = vector.broadcast %cst_222 : f32 to vector<2x128xf32>
    %702 = arith.addf %701, %700 : vector<2x128xf32>
    %703 = arith.divf %701, %702 : vector<2x128xf32>
    %704 = math.tanh %683 : vector<2x128xf32>
    %705 = vector.extract_strided_slice %703 {offsets = [0, 0], sizes = [2, 32], strides = [1, 1]} : vector<2x128xf32> to vector<2x32xf32>
    %706 = vector.extract_strided_slice %703 {offsets = [0, 32], sizes = [2, 32], strides = [1, 1]} : vector<2x128xf32> to vector<2x32xf32>
    %707 = vector.extract_strided_slice %704 {offsets = [0, 64], sizes = [2, 32], strides = [1, 1]} : vector<2x128xf32> to vector<2x32xf32>
    %708 = vector.extract_strided_slice %703 {offsets = [0, 96], sizes = [2, 32], strides = [1, 1]} : vector<2x128xf32> to vector<2x32xf32>
    %709 = arith.mulf %706, %661 : vector<2x32xf32>
    %710 = arith.mulf %705, %707 : vector<2x32xf32>
    %711 = arith.addf %709, %710 : vector<2x32xf32>
    %712 = math.tanh %711 : vector<2x32xf32>
    %713 = arith.mulf %708, %712 : vector<2x32xf32>
    %714 = arith.index_cast %c5_i32_213 : i32 to index
    %c0_223 = arith.constant 0 : index
    %c0_224 = arith.constant 0 : index
    %715 = vector.load %arg20[%714, %c0_223, %c0_224] : memref<6x2x64xf32, #tpu.memory_space<vmem>>, vector<1x2x32xf32>
    %716 = vector.shape_cast %715 : vector<1x2x32xf32> to vector<2x32xf32>
    %717 = vector.shape_cast %698 : vector<2x32xf32> to vector<1x2x32xf32>
    tpu.vector_store %arg20[%714, %c0_223, %c0_224], %717 {strides = array<i32>} : memref<6x2x64xf32, #tpu.memory_space<vmem>>, vector<1x2x32xf32>,
    %c5_i32_225 = arith.constant 5 : i32
    %718 = arith.subi %c5_i32_225, %c5_i32_213 : i32
    %719 = arith.index_cast %718 : i32 to index
    %c0_226 = arith.constant 0 : index
    %c32_227 = arith.constant 32 : index
    %720 = vector.load %arg20[%719, %c0_226, %c32_227] : memref<6x2x64xf32, #tpu.memory_space<vmem>>, vector<1x2x32xf32>
    %721 = vector.shape_cast %720 : vector<1x2x32xf32> to vector<2x32xf32>
    %722 = vector.shape_cast %713 : vector<2x32xf32> to vector<1x2x32xf32>
    tpu.vector_store %arg20[%719, %c0_226, %c32_227], %722 {strides = array<i32>} : memref<6x2x64xf32, #tpu.memory_space<vmem>>, vector<1x2x32xf32>,
    %c6_i32_228 = arith.constant 6 : i32
    %c0_i32_229 = arith.constant 0 : i32
    %723 = arith.index_cast %c0_i32_229 : i32 to index
    %c0_230 = arith.constant 0 : index
    %c0_231 = arith.constant 0 : index
    %724 = vector.load %arg18[%723, %c0_230, %c0_231] : memref<4x2x256xf32, #tpu.memory_space<vmem>>, vector<1x2x128xf32>
    %725 = vector.shape_cast %724 : vector<1x2x128xf32> to vector<2x128xf32>
    %cst_232 = arith.constant dense<0.000000e+00> : vector<2x128xf32>
    %726 = tpu.matmul %698, %2, %cst_232 {dimension_numbers = #tpu.dot_dimension_numbers<[1], [0], [0], [1], [0, 0, 1, 1], [], []>} : vector<2x32xf32>, vector<32x128xf32>, vector<2x128xf32> -> vector<2x128xf32>
    %727 = arith.addf %725, %726 : vector<2x128xf32>
    %c3_i32_233 = arith.constant 3 : i32
    %728 = arith.subi %c3_i32_233, %c0_i32_229 : i32
    %729 = arith.index_cast %728 : i32 to index
    %c0_234 = arith.constant 0 : index
    %c128_235 = arith.constant 128 : index
    %730 = vector.load %arg18[%729, %c0_234, %c128_235] : memref<4x2x256xf32, #tpu.memory_space<vmem>>, vector<1x2x128xf32>
    %731 = vector.shape_cast %730 : vector<1x2x128xf32> to vector<2x128xf32>
    %cst_236 = arith.constant dense<0.000000e+00> : vector<2x128xf32>
    %732 = tpu.matmul %713, %3, %cst_236 {dimension_numbers = #tpu.dot_dimension_numbers<[1], [0], [0], [1], [0, 0, 1, 1], [], []>} : vector<2x32xf32>, vector<32x128xf32>, vector<2x128xf32> -> vector<2x128xf32>
    %733 = arith.addf %731, %732 : vector<2x128xf32>
    %734 = arith.negf %727 : vector<2x128xf32>
    %735 = math.exp %734 : vector<2x128xf32>
    %cst_237 = arith.constant 1.000000e+00 : f32
    %736 = vector.broadcast %cst_237 : f32 to vector<2x128xf32>
    %737 = arith.addf %736, %735 : vector<2x128xf32>
    %738 = arith.divf %736, %737 : vector<2x128xf32>
    %739 = math.tanh %727 : vector<2x128xf32>
    %740 = vector.extract_strided_slice %738 {offsets = [0, 0], sizes = [2, 32], strides = [1, 1]} : vector<2x128xf32> to vector<2x32xf32>
    %741 = vector.extract_strided_slice %738 {offsets = [0, 32], sizes = [2, 32], strides = [1, 1]} : vector<2x128xf32> to vector<2x32xf32>
    %742 = vector.extract_strided_slice %739 {offsets = [0, 64], sizes = [2, 32], strides = [1, 1]} : vector<2x128xf32> to vector<2x32xf32>
    %743 = vector.extract_strided_slice %738 {offsets = [0, 96], sizes = [2, 32], strides = [1, 1]} : vector<2x128xf32> to vector<2x32xf32>
    %744 = arith.mulf %741, %696 : vector<2x32xf32>
    %745 = arith.mulf %740, %742 : vector<2x32xf32>
    %746 = arith.addf %744, %745 : vector<2x32xf32>
    %747 = math.tanh %746 : vector<2x32xf32>
    %748 = arith.mulf %743, %747 : vector<2x32xf32>
    %749 = arith.negf %733 : vector<2x128xf32>
    %750 = math.exp %749 : vector<2x128xf32>
    %cst_238 = arith.constant 1.000000e+00 : f32
    %751 = vector.broadcast %cst_238 : f32 to vector<2x128xf32>
    %752 = arith.addf %751, %750 : vector<2x128xf32>
    %753 = arith.divf %751, %752 : vector<2x128xf32>
    %754 = math.tanh %733 : vector<2x128xf32>
    %755 = vector.extract_strided_slice %753 {offsets = [0, 0], sizes = [2, 32], strides = [1, 1]} : vector<2x128xf32> to vector<2x32xf32>
    %756 = vector.extract_strided_slice %753 {offsets = [0, 32], sizes = [2, 32], strides = [1, 1]} : vector<2x128xf32> to vector<2x32xf32>
    %757 = vector.extract_strided_slice %754 {offsets = [0, 64], sizes = [2, 32], strides = [1, 1]} : vector<2x128xf32> to vector<2x32xf32>
    %758 = vector.extract_strided_slice %753 {offsets = [0, 96], sizes = [2, 32], strides = [1, 1]} : vector<2x128xf32> to vector<2x32xf32>
    %759 = arith.mulf %756, %711 : vector<2x32xf32>
    %760 = arith.mulf %755, %757 : vector<2x32xf32>
    %761 = arith.addf %759, %760 : vector<2x32xf32>
    %762 = math.tanh %761 : vector<2x32xf32>
    %763 = arith.mulf %758, %762 : vector<2x32xf32>
    %764 = arith.index_cast %c0_i32_229 : i32 to index
    %c0_239 = arith.constant 0 : index
    %c0_240 = arith.constant 0 : index
    %765 = vector.load %arg21[%764, %c0_239, %c0_240] : memref<4x2x64xf32, #tpu.memory_space<vmem>>, vector<1x2x32xf32>
    %766 = vector.shape_cast %765 : vector<1x2x32xf32> to vector<2x32xf32>
    %767 = vector.shape_cast %748 : vector<2x32xf32> to vector<1x2x32xf32>
    tpu.vector_store %arg21[%764, %c0_239, %c0_240], %767 {strides = array<i32>} : memref<4x2x64xf32, #tpu.memory_space<vmem>>, vector<1x2x32xf32>,
    %c3_i32_241 = arith.constant 3 : i32
    %768 = arith.subi %c3_i32_241, %c0_i32_229 : i32
    %769 = arith.index_cast %768 : i32 to index
    %c0_242 = arith.constant 0 : index
    %c32_243 = arith.constant 32 : index
    %770 = vector.load %arg21[%769, %c0_242, %c32_243] : memref<4x2x64xf32, #tpu.memory_space<vmem>>, vector<1x2x32xf32>
    %771 = vector.shape_cast %770 : vector<1x2x32xf32> to vector<2x32xf32>
    %772 = vector.shape_cast %763 : vector<2x32xf32> to vector<1x2x32xf32>
    tpu.vector_store %arg21[%769, %c0_242, %c32_243], %772 {strides = array<i32>} : memref<4x2x64xf32, #tpu.memory_space<vmem>>, vector<1x2x32xf32>,
    %c1_i32_244 = arith.constant 1 : i32
    %773 = arith.index_cast %c1_i32_244 : i32 to index
    %c0_245 = arith.constant 0 : index
    %c0_246 = arith.constant 0 : index
    %774 = vector.load %arg18[%773, %c0_245, %c0_246] : memref<4x2x256xf32, #tpu.memory_space<vmem>>, vector<1x2x128xf32>
    %775 = vector.shape_cast %774 : vector<1x2x128xf32> to vector<2x128xf32>
    %cst_247 = arith.constant dense<0.000000e+00> : vector<2x128xf32>
    %776 = tpu.matmul %748, %2, %cst_247 {dimension_numbers = #tpu.dot_dimension_numbers<[1], [0], [0], [1], [0, 0, 1, 1], [], []>} : vector<2x32xf32>, vector<32x128xf32>, vector<2x128xf32> -> vector<2x128xf32>
    %777 = arith.addf %775, %776 : vector<2x128xf32>
    %c3_i32_248 = arith.constant 3 : i32
    %778 = arith.subi %c3_i32_248, %c1_i32_244 : i32
    %779 = arith.index_cast %778 : i32 to index
    %c0_249 = arith.constant 0 : index
    %c128_250 = arith.constant 128 : index
    %780 = vector.load %arg18[%779, %c0_249, %c128_250] : memref<4x2x256xf32, #tpu.memory_space<vmem>>, vector<1x2x128xf32>
    %781 = vector.shape_cast %780 : vector<1x2x128xf32> to vector<2x128xf32>
    %cst_251 = arith.constant dense<0.000000e+00> : vector<2x128xf32>
    %782 = tpu.matmul %763, %3, %cst_251 {dimension_numbers = #tpu.dot_dimension_numbers<[1], [0], [0], [1], [0, 0, 1, 1], [], []>} : vector<2x32xf32>, vector<32x128xf32>, vector<2x128xf32> -> vector<2x128xf32>
    %783 = arith.addf %781, %782 : vector<2x128xf32>
    %784 = arith.negf %777 : vector<2x128xf32>
    %785 = math.exp %784 : vector<2x128xf32>
    %cst_252 = arith.constant 1.000000e+00 : f32
    %786 = vector.broadcast %cst_252 : f32 to vector<2x128xf32>
    %787 = arith.addf %786, %785 : vector<2x128xf32>
    %788 = arith.divf %786, %787 : vector<2x128xf32>
    %789 = math.tanh %777 : vector<2x128xf32>
    %790 = vector.extract_strided_slice %788 {offsets = [0, 0], sizes = [2, 32], strides = [1, 1]} : vector<2x128xf32> to vector<2x32xf32>
    %791 = vector.extract_strided_slice %788 {offsets = [0, 32], sizes = [2, 32], strides = [1, 1]} : vector<2x128xf32> to vector<2x32xf32>
    %792 = vector.extract_strided_slice %789 {offsets = [0, 64], sizes = [2, 32], strides = [1, 1]} : vector<2x128xf32> to vector<2x32xf32>
    %793 = vector.extract_strided_slice %788 {offsets = [0, 96], sizes = [2, 32], strides = [1, 1]} : vector<2x128xf32> to vector<2x32xf32>
    %794 = arith.mulf %791, %746 : vector<2x32xf32>
    %795 = arith.mulf %790, %792 : vector<2x32xf32>
    %796 = arith.addf %794, %795 : vector<2x32xf32>
    %797 = math.tanh %796 : vector<2x32xf32>
    %798 = arith.mulf %793, %797 : vector<2x32xf32>
    %799 = arith.negf %783 : vector<2x128xf32>
    %800 = math.exp %799 : vector<2x128xf32>
    %cst_253 = arith.constant 1.000000e+00 : f32
    %801 = vector.broadcast %cst_253 : f32 to vector<2x128xf32>
    %802 = arith.addf %801, %800 : vector<2x128xf32>
    %803 = arith.divf %801, %802 : vector<2x128xf32>
    %804 = math.tanh %783 : vector<2x128xf32>
    %805 = vector.extract_strided_slice %803 {offsets = [0, 0], sizes = [2, 32], strides = [1, 1]} : vector<2x128xf32> to vector<2x32xf32>
    %806 = vector.extract_strided_slice %803 {offsets = [0, 32], sizes = [2, 32], strides = [1, 1]} : vector<2x128xf32> to vector<2x32xf32>
    %807 = vector.extract_strided_slice %804 {offsets = [0, 64], sizes = [2, 32], strides = [1, 1]} : vector<2x128xf32> to vector<2x32xf32>
    %808 = vector.extract_strided_slice %803 {offsets = [0, 96], sizes = [2, 32], strides = [1, 1]} : vector<2x128xf32> to vector<2x32xf32>
    %809 = arith.mulf %806, %761 : vector<2x32xf32>
    %810 = arith.mulf %805, %807 : vector<2x32xf32>
    %811 = arith.addf %809, %810 : vector<2x32xf32>
    %812 = math.tanh %811 : vector<2x32xf32>
    %813 = arith.mulf %808, %812 : vector<2x32xf32>
    %814 = arith.index_cast %c1_i32_244 : i32 to index
    %c0_254 = arith.constant 0 : index
    %c0_255 = arith.constant 0 : index
    %815 = vector.load %arg21[%814, %c0_254, %c0_255] : memref<4x2x64xf32, #tpu.memory_space<vmem>>, vector<1x2x32xf32>
    %816 = vector.shape_cast %815 : vector<1x2x32xf32> to vector<2x32xf32>
    %817 = vector.shape_cast %798 : vector<2x32xf32> to vector<1x2x32xf32>
    tpu.vector_store %arg21[%814, %c0_254, %c0_255], %817 {strides = array<i32>} : memref<4x2x64xf32, #tpu.memory_space<vmem>>, vector<1x2x32xf32>,
    %c3_i32_256 = arith.constant 3 : i32
    %818 = arith.subi %c3_i32_256, %c1_i32_244 : i32
    %819 = arith.index_cast %818 : i32 to index
    %c0_257 = arith.constant 0 : index
    %c32_258 = arith.constant 32 : index
    %820 = vector.load %arg21[%819, %c0_257, %c32_258] : memref<4x2x64xf32, #tpu.memory_space<vmem>>, vector<1x2x32xf32>
    %821 = vector.shape_cast %820 : vector<1x2x32xf32> to vector<2x32xf32>
    %822 = vector.shape_cast %813 : vector<2x32xf32> to vector<1x2x32xf32>
    tpu.vector_store %arg21[%819, %c0_257, %c32_258], %822 {strides = array<i32>} : memref<4x2x64xf32, #tpu.memory_space<vmem>>, vector<1x2x32xf32>,
    %c2_i32_259 = arith.constant 2 : i32
    %823 = arith.index_cast %c2_i32_259 : i32 to index
    %c0_260 = arith.constant 0 : index
    %c0_261 = arith.constant 0 : index
    %824 = vector.load %arg18[%823, %c0_260, %c0_261] : memref<4x2x256xf32, #tpu.memory_space<vmem>>, vector<1x2x128xf32>
    %825 = vector.shape_cast %824 : vector<1x2x128xf32> to vector<2x128xf32>
    %cst_262 = arith.constant dense<0.000000e+00> : vector<2x128xf32>
    %826 = tpu.matmul %798, %2, %cst_262 {dimension_numbers = #tpu.dot_dimension_numbers<[1], [0], [0], [1], [0, 0, 1, 1], [], []>} : vector<2x32xf32>, vector<32x128xf32>, vector<2x128xf32> -> vector<2x128xf32>
    %827 = arith.addf %825, %826 : vector<2x128xf32>
    %c3_i32_263 = arith.constant 3 : i32
    %828 = arith.subi %c3_i32_263, %c2_i32_259 : i32
    %829 = arith.index_cast %828 : i32 to index
    %c0_264 = arith.constant 0 : index
    %c128_265 = arith.constant 128 : index
    %830 = vector.load %arg18[%829, %c0_264, %c128_265] : memref<4x2x256xf32, #tpu.memory_space<vmem>>, vector<1x2x128xf32>
    %831 = vector.shape_cast %830 : vector<1x2x128xf32> to vector<2x128xf32>
    %cst_266 = arith.constant dense<0.000000e+00> : vector<2x128xf32>
    %832 = tpu.matmul %813, %3, %cst_266 {dimension_numbers = #tpu.dot_dimension_numbers<[1], [0], [0], [1], [0, 0, 1, 1], [], []>} : vector<2x32xf32>, vector<32x128xf32>, vector<2x128xf32> -> vector<2x128xf32>
    %833 = arith.addf %831, %832 : vector<2x128xf32>
    %834 = arith.negf %827 : vector<2x128xf32>
    %835 = math.exp %834 : vector<2x128xf32>
    %cst_267 = arith.constant 1.000000e+00 : f32
    %836 = vector.broadcast %cst_267 : f32 to vector<2x128xf32>
    %837 = arith.addf %836, %835 : vector<2x128xf32>
    %838 = arith.divf %836, %837 : vector<2x128xf32>
    %839 = math.tanh %827 : vector<2x128xf32>
    %840 = vector.extract_strided_slice %838 {offsets = [0, 0], sizes = [2, 32], strides = [1, 1]} : vector<2x128xf32> to vector<2x32xf32>
    %841 = vector.extract_strided_slice %838 {offsets = [0, 32], sizes = [2, 32], strides = [1, 1]} : vector<2x128xf32> to vector<2x32xf32>
    %842 = vector.extract_strided_slice %839 {offsets = [0, 64], sizes = [2, 32], strides = [1, 1]} : vector<2x128xf32> to vector<2x32xf32>
    %843 = vector.extract_strided_slice %838 {offsets = [0, 96], sizes = [2, 32], strides = [1, 1]} : vector<2x128xf32> to vector<2x32xf32>
    %844 = arith.mulf %841, %796 : vector<2x32xf32>
    %845 = arith.mulf %840, %842 : vector<2x32xf32>
    %846 = arith.addf %844, %845 : vector<2x32xf32>
    %847 = math.tanh %846 : vector<2x32xf32>
    %848 = arith.mulf %843, %847 : vector<2x32xf32>
    %849 = arith.negf %833 : vector<2x128xf32>
    %850 = math.exp %849 : vector<2x128xf32>
    %cst_268 = arith.constant 1.000000e+00 : f32
    %851 = vector.broadcast %cst_268 : f32 to vector<2x128xf32>
    %852 = arith.addf %851, %850 : vector<2x128xf32>
    %853 = arith.divf %851, %852 : vector<2x128xf32>
    %854 = math.tanh %833 : vector<2x128xf32>
    %855 = vector.extract_strided_slice %853 {offsets = [0, 0], sizes = [2, 32], strides = [1, 1]} : vector<2x128xf32> to vector<2x32xf32>
    %856 = vector.extract_strided_slice %853 {offsets = [0, 32], sizes = [2, 32], strides = [1, 1]} : vector<2x128xf32> to vector<2x32xf32>
    %857 = vector.extract_strided_slice %854 {offsets = [0, 64], sizes = [2, 32], strides = [1, 1]} : vector<2x128xf32> to vector<2x32xf32>
    %858 = vector.extract_strided_slice %853 {offsets = [0, 96], sizes = [2, 32], strides = [1, 1]} : vector<2x128xf32> to vector<2x32xf32>
    %859 = arith.mulf %856, %811 : vector<2x32xf32>
    %860 = arith.mulf %855, %857 : vector<2x32xf32>
    %861 = arith.addf %859, %860 : vector<2x32xf32>
    %862 = math.tanh %861 : vector<2x32xf32>
    %863 = arith.mulf %858, %862 : vector<2x32xf32>
    %864 = arith.index_cast %c2_i32_259 : i32 to index
    %c0_269 = arith.constant 0 : index
    %c0_270 = arith.constant 0 : index
    %865 = vector.load %arg21[%864, %c0_269, %c0_270] : memref<4x2x64xf32, #tpu.memory_space<vmem>>, vector<1x2x32xf32>
    %866 = vector.shape_cast %865 : vector<1x2x32xf32> to vector<2x32xf32>
    %867 = vector.shape_cast %848 : vector<2x32xf32> to vector<1x2x32xf32>
    tpu.vector_store %arg21[%864, %c0_269, %c0_270], %867 {strides = array<i32>} : memref<4x2x64xf32, #tpu.memory_space<vmem>>, vector<1x2x32xf32>,
    %c3_i32_271 = arith.constant 3 : i32
    %868 = arith.subi %c3_i32_271, %c2_i32_259 : i32
    %869 = arith.index_cast %868 : i32 to index
    %c0_272 = arith.constant 0 : index
    %c32_273 = arith.constant 32 : index
    %870 = vector.load %arg21[%869, %c0_272, %c32_273] : memref<4x2x64xf32, #tpu.memory_space<vmem>>, vector<1x2x32xf32>
    %871 = vector.shape_cast %870 : vector<1x2x32xf32> to vector<2x32xf32>
    %872 = vector.shape_cast %863 : vector<2x32xf32> to vector<1x2x32xf32>
    tpu.vector_store %arg21[%869, %c0_272, %c32_273], %872 {strides = array<i32>} : memref<4x2x64xf32, #tpu.memory_space<vmem>>, vector<1x2x32xf32>,
    %c3_i32_274 = arith.constant 3 : i32
    %873 = arith.index_cast %c3_i32_274 : i32 to index
    %c0_275 = arith.constant 0 : index
    %c0_276 = arith.constant 0 : index
    %874 = vector.load %arg18[%873, %c0_275, %c0_276] : memref<4x2x256xf32, #tpu.memory_space<vmem>>, vector<1x2x128xf32>
    %875 = vector.shape_cast %874 : vector<1x2x128xf32> to vector<2x128xf32>
    %cst_277 = arith.constant dense<0.000000e+00> : vector<2x128xf32>
    %876 = tpu.matmul %848, %2, %cst_277 {dimension_numbers = #tpu.dot_dimension_numbers<[1], [0], [0], [1], [0, 0, 1, 1], [], []>} : vector<2x32xf32>, vector<32x128xf32>, vector<2x128xf32> -> vector<2x128xf32>
    %877 = arith.addf %875, %876 : vector<2x128xf32>
    %c3_i32_278 = arith.constant 3 : i32
    %878 = arith.subi %c3_i32_278, %c3_i32_274 : i32
    %879 = arith.index_cast %878 : i32 to index
    %c0_279 = arith.constant 0 : index
    %c128_280 = arith.constant 128 : index
    %880 = vector.load %arg18[%879, %c0_279, %c128_280] : memref<4x2x256xf32, #tpu.memory_space<vmem>>, vector<1x2x128xf32>
    %881 = vector.shape_cast %880 : vector<1x2x128xf32> to vector<2x128xf32>
    %cst_281 = arith.constant dense<0.000000e+00> : vector<2x128xf32>
    %882 = tpu.matmul %863, %3, %cst_281 {dimension_numbers = #tpu.dot_dimension_numbers<[1], [0], [0], [1], [0, 0, 1, 1], [], []>} : vector<2x32xf32>, vector<32x128xf32>, vector<2x128xf32> -> vector<2x128xf32>
    %883 = arith.addf %881, %882 : vector<2x128xf32>
    %884 = arith.negf %877 : vector<2x128xf32>
    %885 = math.exp %884 : vector<2x128xf32>
    %cst_282 = arith.constant 1.000000e+00 : f32
    %886 = vector.broadcast %cst_282 : f32 to vector<2x128xf32>
    %887 = arith.addf %886, %885 : vector<2x128xf32>
    %888 = arith.divf %886, %887 : vector<2x128xf32>
    %889 = math.tanh %877 : vector<2x128xf32>
    %890 = vector.extract_strided_slice %888 {offsets = [0, 0], sizes = [2, 32], strides = [1, 1]} : vector<2x128xf32> to vector<2x32xf32>
    %891 = vector.extract_strided_slice %888 {offsets = [0, 32], sizes = [2, 32], strides = [1, 1]} : vector<2x128xf32> to vector<2x32xf32>
    %892 = vector.extract_strided_slice %889 {offsets = [0, 64], sizes = [2, 32], strides = [1, 1]} : vector<2x128xf32> to vector<2x32xf32>
    %893 = vector.extract_strided_slice %888 {offsets = [0, 96], sizes = [2, 32], strides = [1, 1]} : vector<2x128xf32> to vector<2x32xf32>
    %894 = arith.mulf %891, %846 : vector<2x32xf32>
    %895 = arith.mulf %890, %892 : vector<2x32xf32>
    %896 = arith.addf %894, %895 : vector<2x32xf32>
    %897 = math.tanh %896 : vector<2x32xf32>
    %898 = arith.mulf %893, %897 : vector<2x32xf32>
    %899 = arith.negf %883 : vector<2x128xf32>
    %900 = math.exp %899 : vector<2x128xf32>
    %cst_283 = arith.constant 1.000000e+00 : f32
    %901 = vector.broadcast %cst_283 : f32 to vector<2x128xf32>
    %902 = arith.addf %901, %900 : vector<2x128xf32>
    %903 = arith.divf %901, %902 : vector<2x128xf32>
    %904 = math.tanh %883 : vector<2x128xf32>
    %905 = vector.extract_strided_slice %903 {offsets = [0, 0], sizes = [2, 32], strides = [1, 1]} : vector<2x128xf32> to vector<2x32xf32>
    %906 = vector.extract_strided_slice %903 {offsets = [0, 32], sizes = [2, 32], strides = [1, 1]} : vector<2x128xf32> to vector<2x32xf32>
    %907 = vector.extract_strided_slice %904 {offsets = [0, 64], sizes = [2, 32], strides = [1, 1]} : vector<2x128xf32> to vector<2x32xf32>
    %908 = vector.extract_strided_slice %903 {offsets = [0, 96], sizes = [2, 32], strides = [1, 1]} : vector<2x128xf32> to vector<2x32xf32>
    %909 = arith.mulf %906, %861 : vector<2x32xf32>
    %910 = arith.mulf %905, %907 : vector<2x32xf32>
    %911 = arith.addf %909, %910 : vector<2x32xf32>
    %912 = math.tanh %911 : vector<2x32xf32>
    %913 = arith.mulf %908, %912 : vector<2x32xf32>
    %914 = arith.index_cast %c3_i32_274 : i32 to index
    %c0_284 = arith.constant 0 : index
    %c0_285 = arith.constant 0 : index
    %915 = vector.load %arg21[%914, %c0_284, %c0_285] : memref<4x2x64xf32, #tpu.memory_space<vmem>>, vector<1x2x32xf32>
    %916 = vector.shape_cast %915 : vector<1x2x32xf32> to vector<2x32xf32>
    %917 = vector.shape_cast %898 : vector<2x32xf32> to vector<1x2x32xf32>
    tpu.vector_store %arg21[%914, %c0_284, %c0_285], %917 {strides = array<i32>} : memref<4x2x64xf32, #tpu.memory_space<vmem>>, vector<1x2x32xf32>,
    %c3_i32_286 = arith.constant 3 : i32
    %918 = arith.subi %c3_i32_286, %c3_i32_274 : i32
    %919 = arith.index_cast %918 : i32 to index
    %c0_287 = arith.constant 0 : index
    %c32_288 = arith.constant 32 : index
    %920 = vector.load %arg21[%919, %c0_287, %c32_288] : memref<4x2x64xf32, #tpu.memory_space<vmem>>, vector<1x2x32xf32>
    %921 = vector.shape_cast %920 : vector<1x2x32xf32> to vector<2x32xf32>
    %922 = vector.shape_cast %913 : vector<2x32xf32> to vector<1x2x32xf32>
    tpu.vector_store %arg21[%919, %c0_287, %c32_288], %922 {strides = array<i32>} : memref<4x2x64xf32, #tpu.memory_space<vmem>>, vector<1x2x32xf32>,
    %c4_i32_289 = arith.constant 4 : i32
    %c0_290 = arith.constant 0 : index
    %c0_291 = arith.constant 0 : index
    %923 = vector.load %arg7[%c0_290, %c0_291] : memref<64x64xf32, #tpu.memory_space<vmem>>, vector<64x64xf32>
    %c0_292 = arith.constant 0 : index
    %c0_293 = arith.constant 0 : index
    %c0_294 = arith.constant 0 : index
    %924 = vector.load %arg8[%c0_292, %c0_293, %c0_294] : memref<1x128x128xf32, #tpu.memory_space<vmem>>, vector<1x128x128xf32>
    %c0_295 = arith.constant 0 : index
    %c0_296 = arith.constant 0 : index
    %925 = vector.load %arg9[%c0_295, %c0_296] : memref<1x128xf32, #tpu.memory_space<vmem>>, vector<1x128xf32>
    %c0_297 = arith.constant 0 : index
    %c0_298 = arith.constant 0 : index
    %c0_299 = arith.constant 0 : index
    %926 = vector.load %arg10[%c0_297, %c0_298, %c0_299] : memref<3x128x128xf32, #tpu.memory_space<vmem>>, vector<3x128x128xf32>
    %c0_300 = arith.constant 0 : index
    %c0_301 = arith.constant 0 : index
    %927 = vector.load %arg11[%c0_300, %c0_301] : memref<1x128xf32, #tpu.memory_space<vmem>>, vector<1x128xf32>
    %c0_302 = arith.constant 0 : index
    %c0_303 = arith.constant 0 : index
    %c0_304 = arith.constant 0 : index
    %928 = vector.load %arg12[%c0_302, %c0_303, %c0_304] : memref<5x128x128xf32, #tpu.memory_space<vmem>>, vector<5x128x128xf32>
    %c0_305 = arith.constant 0 : index
    %c0_306 = arith.constant 0 : index
    %929 = vector.load %arg13[%c0_305, %c0_306] : memref<1x128xf32, #tpu.memory_space<vmem>>, vector<1x128xf32>
    %c0_307 = arith.constant 0 : index
    %c0_308 = arith.constant 0 : index
    %930 = vector.load %arg14[%c0_307, %c0_308] : memref<1x128xf32, #tpu.memory_space<vmem>>, vector<1x128xf32>
    %c0_309 = arith.constant 0 : index
    %c0_310 = arith.constant 0 : index
    %c0_311 = arith.constant 0 : index
    %931 = vector.load %arg19[%c0_309, %c0_310, %c0_311] : memref<8x2x64xf32, #tpu.memory_space<vmem>>, vector<8x1x64xf32>
    %932 = vector.shape_cast %931 : vector<8x1x64xf32> to vector<8x64xf32>
    %c0_312 = arith.constant 0 : index
    %c0_313 = arith.constant 0 : index
    %c0_314 = arith.constant 0 : index
    %933 = vector.load %arg21[%c0_312, %c0_313, %c0_314] : memref<4x2x64xf32, #tpu.memory_space<vmem>>, vector<4x1x64xf32>
    %934 = vector.shape_cast %933 : vector<4x1x64xf32> to vector<4x64xf32>
    %c0_315 = arith.constant 0 : index
    %c0_316 = arith.constant 0 : index
    %c0_317 = arith.constant 0 : index
    %935 = vector.load %arg20[%c0_315, %c0_316, %c0_317] : memref<6x2x64xf32, #tpu.memory_space<vmem>>, vector<6x1x64xf32>
    %936 = vector.shape_cast %935 : vector<6x1x64xf32> to vector<6x64xf32>
    %937 = tpu.concatenate %934, %936 in 0 : vector<4x64xf32>, vector<6x64xf32> -> vector<10x64xf32>
    %cst_318 = arith.constant dense<0.000000e+00> : vector<10x64xf32>
    %938 = tpu.matmul %937, %923, %cst_318 {dimension_numbers = #tpu.dot_dimension_numbers<[1], [0], [0], [1], [0, 0, 1, 1], [], []>} : vector<10x64xf32>, vector<64x64xf32>, vector<10x64xf32> -> vector<10x64xf32>
    %cst_319 = arith.constant dense<0.000000e+00> : vector<10x8xf32>
    %939 = tpu.matmul %938, %932, %cst_319 {dimension_numbers = #tpu.dot_dimension_numbers<[1], [1], [0], [0], [0, 0, 1, 0], [], []>} : vector<10x64xf32>, vector<8x64xf32>, vector<10x8xf32> -> vector<10x8xf32>
    %cst_320 = arith.constant dense<0xFF800000> : vector<10xf32>
    %940 = vector.multi_reduction <maximumf>, %939, %cst_320 [1] : vector<10x8xf32> to vector<10xf32>
    %941 = vector.shape_cast %940 : vector<10xf32> to vector<10x1xf32>
    %942 = vector.broadcast %941 : vector<10x1xf32> to vector<10x8xf32>
    %943 = arith.subf %939, %942 : vector<10x8xf32>
    %944 = math.exp %943 : vector<10x8xf32>
    %cst_321 = arith.constant dense<0.000000e+00> : vector<10xf32>
    %945 = vector.multi_reduction <add>, %944, %cst_321 [1] : vector<10x8xf32> to vector<10xf32>
    %946 = vector.shape_cast %945 : vector<10xf32> to vector<10x1xf32>
    %947 = tpu.reciprocal %946 {approx = true} : vector<10x1xf32> -> vector<10x1xf32>
    %948 = vector.broadcast %947 : vector<10x1xf32> to vector<10x8xf32>
    %949 = arith.mulf %944, %948 : vector<10x8xf32>
    %cst_322 = arith.constant dense<0.000000e+00> : vector<8x64xf32>
    %950 = tpu.matmul %949, %937, %cst_322 {dimension_numbers = #tpu.dot_dimension_numbers<[0], [0], [1], [1], [0, 1, 1, 1], [], []>} : vector<10x8xf32>, vector<10x64xf32>, vector<8x64xf32> -> vector<8x64xf32>
    %951 = tpu.concatenate %932, %950 in 1 : vector<8x64xf32>, vector<8x64xf32> -> vector<8x128xf32>
    %952 = vector.shape_cast %924 : vector<1x128x128xf32> to vector<128x128xf32>
    %cst_323 = arith.constant dense<0.000000e+00> : vector<8x128xf32>
    %953 = tpu.matmul %951, %952, %cst_323 {dimension_numbers = #tpu.dot_dimension_numbers<[1], [0], [0], [1], [0, 0, 1, 1], [], []>} : vector<8x128xf32>, vector<128x128xf32>, vector<8x128xf32> -> vector<8x128xf32>
    %954 = vector.broadcast %925 : vector<1x128xf32> to vector<8x128xf32>
    %955 = arith.addf %953, %954 : vector<8x128xf32>
    %cst_324 = arith.constant 0.000000e+00 : f32
    %956 = vector.broadcast %cst_324 : f32 to vector<8x128xf32>
    %957 = arith.maximumf %955, %956 : vector<8x128xf32>
    %cst_325 = arith.constant dense<0xFF800000> : vector<128xf32>
    %958 = vector.multi_reduction <maximumf>, %957, %cst_325 [0] : vector<8x128xf32> to vector<128xf32>
    %959 = vector.shape_cast %958 : vector<128xf32> to vector<1x128xf32>
    %960 = vector.extract_strided_slice %951 {offsets = [0, 0], sizes = [6, 128], strides = [1, 1]} : vector<8x128xf32> to vector<6x128xf32>
    %961 = vector.extract_strided_slice %926 {offsets = [0, 0, 0], sizes = [1, 128, 128], strides = [1, 1, 1]} : vector<3x128x128xf32> to vector<1x128x128xf32>
    %962 = vector.shape_cast %961 : vector<1x128x128xf32> to vector<128x128xf32>
    %cst_326 = arith.constant dense<0.000000e+00> : vector<6x128xf32>
    %963 = tpu.matmul %960, %962, %cst_326 {dimension_numbers = #tpu.dot_dimension_numbers<[1], [0], [0], [1], [0, 0, 1, 1], [], []>} : vector<6x128xf32>, vector<128x128xf32>, vector<6x128xf32> -> vector<6x128xf32>
    %964 = vector.extract_strided_slice %951 {offsets = [1, 0], sizes = [6, 128], strides = [1, 1]} : vector<8x128xf32> to vector<6x128xf32>
    %965 = vector.extract_strided_slice %926 {offsets = [1, 0, 0], sizes = [1, 128, 128], strides = [1, 1, 1]} : vector<3x128x128xf32> to vector<1x128x128xf32>
    %966 = vector.shape_cast %965 : vector<1x128x128xf32> to vector<128x128xf32>
    %cst_327 = arith.constant dense<0.000000e+00> : vector<6x128xf32>
    %967 = tpu.matmul %964, %966, %cst_327 {dimension_numbers = #tpu.dot_dimension_numbers<[1], [0], [0], [1], [0, 0, 1, 1], [], []>} : vector<6x128xf32>, vector<128x128xf32>, vector<6x128xf32> -> vector<6x128xf32>
    %968 = arith.addf %963, %967 : vector<6x128xf32>
    %969 = vector.extract_strided_slice %951 {offsets = [2, 0], sizes = [6, 128], strides = [1, 1]} : vector<8x128xf32> to vector<6x128xf32>
    %970 = vector.extract_strided_slice %926 {offsets = [2, 0, 0], sizes = [1, 128, 128], strides = [1, 1, 1]} : vector<3x128x128xf32> to vector<1x128x128xf32>
    %971 = vector.shape_cast %970 : vector<1x128x128xf32> to vector<128x128xf32>
    %cst_328 = arith.constant dense<0.000000e+00> : vector<6x128xf32>
    %972 = tpu.matmul %969, %971, %cst_328 {dimension_numbers = #tpu.dot_dimension_numbers<[1], [0], [0], [1], [0, 0, 1, 1], [], []>} : vector<6x128xf32>, vector<128x128xf32>, vector<6x128xf32> -> vector<6x128xf32>
    %973 = arith.addf %968, %972 : vector<6x128xf32>
    %974 = vector.broadcast %927 : vector<1x128xf32> to vector<6x128xf32>
    %975 = arith.addf %973, %974 : vector<6x128xf32>
    %cst_329 = arith.constant 0.000000e+00 : f32
    %976 = vector.broadcast %cst_329 : f32 to vector<6x128xf32>
    %977 = arith.maximumf %975, %976 : vector<6x128xf32>
    %cst_330 = arith.constant dense<0xFF800000> : vector<128xf32>
    %978 = vector.multi_reduction <maximumf>, %977, %cst_330 [0] : vector<6x128xf32> to vector<128xf32>
    %979 = vector.shape_cast %978 : vector<128xf32> to vector<1x128xf32>
    %980 = vector.extract_strided_slice %951 {offsets = [0, 0], sizes = [4, 128], strides = [1, 1]} : vector<8x128xf32> to vector<4x128xf32>
    %981 = vector.extract_strided_slice %928 {offsets = [0, 0, 0], sizes = [1, 128, 128], strides = [1, 1, 1]} : vector<5x128x128xf32> to vector<1x128x128xf32>
    %982 = vector.shape_cast %981 : vector<1x128x128xf32> to vector<128x128xf32>
    %cst_331 = arith.constant dense<0.000000e+00> : vector<4x128xf32>
    %983 = tpu.matmul %980, %982, %cst_331 {dimension_numbers = #tpu.dot_dimension_numbers<[1], [0], [0], [1], [0, 0, 1, 1], [], []>} : vector<4x128xf32>, vector<128x128xf32>, vector<4x128xf32> -> vector<4x128xf32>
    %984 = vector.extract_strided_slice %951 {offsets = [1, 0], sizes = [4, 128], strides = [1, 1]} : vector<8x128xf32> to vector<4x128xf32>
    %985 = vector.extract_strided_slice %928 {offsets = [1, 0, 0], sizes = [1, 128, 128], strides = [1, 1, 1]} : vector<5x128x128xf32> to vector<1x128x128xf32>
    %986 = vector.shape_cast %985 : vector<1x128x128xf32> to vector<128x128xf32>
    %cst_332 = arith.constant dense<0.000000e+00> : vector<4x128xf32>
    %987 = tpu.matmul %984, %986, %cst_332 {dimension_numbers = #tpu.dot_dimension_numbers<[1], [0], [0], [1], [0, 0, 1, 1], [], []>} : vector<4x128xf32>, vector<128x128xf32>, vector<4x128xf32> -> vector<4x128xf32>
    %988 = arith.addf %983, %987 : vector<4x128xf32>
    %989 = vector.extract_strided_slice %951 {offsets = [2, 0], sizes = [4, 128], strides = [1, 1]} : vector<8x128xf32> to vector<4x128xf32>
    %990 = vector.extract_strided_slice %928 {offsets = [2, 0, 0], sizes = [1, 128, 128], strides = [1, 1, 1]} : vector<5x128x128xf32> to vector<1x128x128xf32>
    %991 = vector.shape_cast %990 : vector<1x128x128xf32> to vector<128x128xf32>
    %cst_333 = arith.constant dense<0.000000e+00> : vector<4x128xf32>
    %992 = tpu.matmul %989, %991, %cst_333 {dimension_numbers = #tpu.dot_dimension_numbers<[1], [0], [0], [1], [0, 0, 1, 1], [], []>} : vector<4x128xf32>, vector<128x128xf32>, vector<4x128xf32> -> vector<4x128xf32>
    %993 = arith.addf %988, %992 : vector<4x128xf32>
    %994 = vector.extract_strided_slice %951 {offsets = [3, 0], sizes = [4, 128], strides = [1, 1]} : vector<8x128xf32> to vector<4x128xf32>
    %995 = vector.extract_strided_slice %928 {offsets = [3, 0, 0], sizes = [1, 128, 128], strides = [1, 1, 1]} : vector<5x128x128xf32> to vector<1x128x128xf32>
    %996 = vector.shape_cast %995 : vector<1x128x128xf32> to vector<128x128xf32>
    %cst_334 = arith.constant dense<0.000000e+00> : vector<4x128xf32>
    %997 = tpu.matmul %994, %996, %cst_334 {dimension_numbers = #tpu.dot_dimension_numbers<[1], [0], [0], [1], [0, 0, 1, 1], [], []>} : vector<4x128xf32>, vector<128x128xf32>, vector<4x128xf32> -> vector<4x128xf32>
    %998 = arith.addf %993, %997 : vector<4x128xf32>
    %999 = vector.extract_strided_slice %951 {offsets = [4, 0], sizes = [4, 128], strides = [1, 1]} : vector<8x128xf32> to vector<4x128xf32>
    %1000 = vector.extract_strided_slice %928 {offsets = [4, 0, 0], sizes = [1, 128, 128], strides = [1, 1, 1]} : vector<5x128x128xf32> to vector<1x128x128xf32>
    %1001 = vector.shape_cast %1000 : vector<1x128x128xf32> to vector<128x128xf32>
    %cst_335 = arith.constant dense<0.000000e+00> : vector<4x128xf32>
    %1002 = tpu.matmul %999, %1001, %cst_335 {dimension_numbers = #tpu.dot_dimension_numbers<[1], [0], [0], [1], [0, 0, 1, 1], [], []>} : vector<4x128xf32>, vector<128x128xf32>, vector<4x128xf32> -> vector<4x128xf32>
    %1003 = arith.addf %998, %1002 : vector<4x128xf32>
    %1004 = vector.broadcast %929 : vector<1x128xf32> to vector<4x128xf32>
    %1005 = arith.addf %1003, %1004 : vector<4x128xf32>
    %cst_336 = arith.constant 0.000000e+00 : f32
    %1006 = vector.broadcast %cst_336 : f32 to vector<4x128xf32>
    %1007 = arith.maximumf %1005, %1006 : vector<4x128xf32>
    %cst_337 = arith.constant dense<0xFF800000> : vector<128xf32>
    %1008 = vector.multi_reduction <maximumf>, %1007, %cst_337 [0] : vector<4x128xf32> to vector<128xf32>
    %1009 = vector.shape_cast %1008 : vector<128xf32> to vector<1x128xf32>
    %1010 = arith.maximumf %959, %979 : vector<1x128xf32>
    %1011 = arith.maximumf %1010, %1009 : vector<1x128xf32>
    %1012 = arith.mulf %1011, %930 : vector<1x128xf32>
    %cst_338 = arith.constant dense<0.000000e+00> : vector<1xf32>
    %1013 = vector.multi_reduction <add>, %1012, %cst_338 [1] : vector<1x128xf32> to vector<1xf32>
    %1014 = vector.shape_cast %1013 : vector<1xf32> to vector<1x1xf32>
    %c0_339 = arith.constant 0 : index
    %c1 = arith.constant 1 : index
    %c0_340 = arith.constant 0 : index
    %1015 = vector.load %arg19[%c0_339, %c1, %c0_340] : memref<8x2x64xf32, #tpu.memory_space<vmem>>, vector<8x1x64xf32>
    %1016 = vector.shape_cast %1015 : vector<8x1x64xf32> to vector<8x64xf32>
    %c0_341 = arith.constant 0 : index
    %c1_342 = arith.constant 1 : index
    %c0_343 = arith.constant 0 : index
    %1017 = vector.load %arg21[%c0_341, %c1_342, %c0_343] : memref<4x2x64xf32, #tpu.memory_space<vmem>>, vector<4x1x64xf32>
    %1018 = vector.shape_cast %1017 : vector<4x1x64xf32> to vector<4x64xf32>
    %c0_344 = arith.constant 0 : index
    %c1_345 = arith.constant 1 : index
    %c0_346 = arith.constant 0 : index
    %1019 = vector.load %arg20[%c0_344, %c1_345, %c0_346] : memref<6x2x64xf32, #tpu.memory_space<vmem>>, vector<6x1x64xf32>
    %1020 = vector.shape_cast %1019 : vector<6x1x64xf32> to vector<6x64xf32>
    %1021 = tpu.concatenate %1018, %1020 in 0 : vector<4x64xf32>, vector<6x64xf32> -> vector<10x64xf32>
    %cst_347 = arith.constant dense<0.000000e+00> : vector<10x64xf32>
    %1022 = tpu.matmul %1021, %923, %cst_347 {dimension_numbers = #tpu.dot_dimension_numbers<[1], [0], [0], [1], [0, 0, 1, 1], [], []>} : vector<10x64xf32>, vector<64x64xf32>, vector<10x64xf32> -> vector<10x64xf32>
    %cst_348 = arith.constant dense<0.000000e+00> : vector<10x8xf32>
    %1023 = tpu.matmul %1022, %1016, %cst_348 {dimension_numbers = #tpu.dot_dimension_numbers<[1], [1], [0], [0], [0, 0, 1, 0], [], []>} : vector<10x64xf32>, vector<8x64xf32>, vector<10x8xf32> -> vector<10x8xf32>
    %cst_349 = arith.constant dense<0xFF800000> : vector<10xf32>
    %1024 = vector.multi_reduction <maximumf>, %1023, %cst_349 [1] : vector<10x8xf32> to vector<10xf32>
    %1025 = vector.shape_cast %1024 : vector<10xf32> to vector<10x1xf32>
    %1026 = vector.broadcast %1025 : vector<10x1xf32> to vector<10x8xf32>
    %1027 = arith.subf %1023, %1026 : vector<10x8xf32>
    %1028 = math.exp %1027 : vector<10x8xf32>
    %cst_350 = arith.constant dense<0.000000e+00> : vector<10xf32>
    %1029 = vector.multi_reduction <add>, %1028, %cst_350 [1] : vector<10x8xf32> to vector<10xf32>
    %1030 = vector.shape_cast %1029 : vector<10xf32> to vector<10x1xf32>
    %1031 = tpu.reciprocal %1030 {approx = true} : vector<10x1xf32> -> vector<10x1xf32>
    %1032 = vector.broadcast %1031 : vector<10x1xf32> to vector<10x8xf32>
    %1033 = arith.mulf %1028, %1032 : vector<10x8xf32>
    %cst_351 = arith.constant dense<0.000000e+00> : vector<8x64xf32>
    %1034 = tpu.matmul %1033, %1021, %cst_351 {dimension_numbers = #tpu.dot_dimension_numbers<[0], [0], [1], [1], [0, 1, 1, 1], [], []>} : vector<10x8xf32>, vector<10x64xf32>, vector<8x64xf32> -> vector<8x64xf32>
    %1035 = tpu.concatenate %1016, %1034 in 1 : vector<8x64xf32>, vector<8x64xf32> -> vector<8x128xf32>
    %1036 = vector.shape_cast %924 : vector<1x128x128xf32> to vector<128x128xf32>
    %cst_352 = arith.constant dense<0.000000e+00> : vector<8x128xf32>
    %1037 = tpu.matmul %1035, %1036, %cst_352 {dimension_numbers = #tpu.dot_dimension_numbers<[1], [0], [0], [1], [0, 0, 1, 1], [], []>} : vector<8x128xf32>, vector<128x128xf32>, vector<8x128xf32> -> vector<8x128xf32>
    %1038 = vector.broadcast %925 : vector<1x128xf32> to vector<8x128xf32>
    %1039 = arith.addf %1037, %1038 : vector<8x128xf32>
    %cst_353 = arith.constant 0.000000e+00 : f32
    %1040 = vector.broadcast %cst_353 : f32 to vector<8x128xf32>
    %1041 = arith.maximumf %1039, %1040 : vector<8x128xf32>
    %cst_354 = arith.constant dense<0xFF800000> : vector<128xf32>
    %1042 = vector.multi_reduction <maximumf>, %1041, %cst_354 [0] : vector<8x128xf32> to vector<128xf32>
    %1043 = vector.shape_cast %1042 : vector<128xf32> to vector<1x128xf32>
    %1044 = vector.extract_strided_slice %1035 {offsets = [0, 0], sizes = [6, 128], strides = [1, 1]} : vector<8x128xf32> to vector<6x128xf32>
    %1045 = vector.extract_strided_slice %926 {offsets = [0, 0, 0], sizes = [1, 128, 128], strides = [1, 1, 1]} : vector<3x128x128xf32> to vector<1x128x128xf32>
    %1046 = vector.shape_cast %1045 : vector<1x128x128xf32> to vector<128x128xf32>
    %cst_355 = arith.constant dense<0.000000e+00> : vector<6x128xf32>
    %1047 = tpu.matmul %1044, %1046, %cst_355 {dimension_numbers = #tpu.dot_dimension_numbers<[1], [0], [0], [1], [0, 0, 1, 1], [], []>} : vector<6x128xf32>, vector<128x128xf32>, vector<6x128xf32> -> vector<6x128xf32>
    %1048 = vector.extract_strided_slice %1035 {offsets = [1, 0], sizes = [6, 128], strides = [1, 1]} : vector<8x128xf32> to vector<6x128xf32>
    %1049 = vector.extract_strided_slice %926 {offsets = [1, 0, 0], sizes = [1, 128, 128], strides = [1, 1, 1]} : vector<3x128x128xf32> to vector<1x128x128xf32>
    %1050 = vector.shape_cast %1049 : vector<1x128x128xf32> to vector<128x128xf32>
    %cst_356 = arith.constant dense<0.000000e+00> : vector<6x128xf32>
    %1051 = tpu.matmul %1048, %1050, %cst_356 {dimension_numbers = #tpu.dot_dimension_numbers<[1], [0], [0], [1], [0, 0, 1, 1], [], []>} : vector<6x128xf32>, vector<128x128xf32>, vector<6x128xf32> -> vector<6x128xf32>
    %1052 = arith.addf %1047, %1051 : vector<6x128xf32>
    %1053 = vector.extract_strided_slice %1035 {offsets = [2, 0], sizes = [6, 128], strides = [1, 1]} : vector<8x128xf32> to vector<6x128xf32>
    %1054 = vector.extract_strided_slice %926 {offsets = [2, 0, 0], sizes = [1, 128, 128], strides = [1, 1, 1]} : vector<3x128x128xf32> to vector<1x128x128xf32>
    %1055 = vector.shape_cast %1054 : vector<1x128x128xf32> to vector<128x128xf32>
    %cst_357 = arith.constant dense<0.000000e+00> : vector<6x128xf32>
    %1056 = tpu.matmul %1053, %1055, %cst_357 {dimension_numbers = #tpu.dot_dimension_numbers<[1], [0], [0], [1], [0, 0, 1, 1], [], []>} : vector<6x128xf32>, vector<128x128xf32>, vector<6x128xf32> -> vector<6x128xf32>
    %1057 = arith.addf %1052, %1056 : vector<6x128xf32>
    %1058 = vector.broadcast %927 : vector<1x128xf32> to vector<6x128xf32>
    %1059 = arith.addf %1057, %1058 : vector<6x128xf32>
    %cst_358 = arith.constant 0.000000e+00 : f32
    %1060 = vector.broadcast %cst_358 : f32 to vector<6x128xf32>
    %1061 = arith.maximumf %1059, %1060 : vector<6x128xf32>
    %cst_359 = arith.constant dense<0xFF800000> : vector<128xf32>
    %1062 = vector.multi_reduction <maximumf>, %1061, %cst_359 [0] : vector<6x128xf32> to vector<128xf32>
    %1063 = vector.shape_cast %1062 : vector<128xf32> to vector<1x128xf32>
    %1064 = vector.extract_strided_slice %1035 {offsets = [0, 0], sizes = [4, 128], strides = [1, 1]} : vector<8x128xf32> to vector<4x128xf32>
    %1065 = vector.extract_strided_slice %928 {offsets = [0, 0, 0], sizes = [1, 128, 128], strides = [1, 1, 1]} : vector<5x128x128xf32> to vector<1x128x128xf32>
    %1066 = vector.shape_cast %1065 : vector<1x128x128xf32> to vector<128x128xf32>
    %cst_360 = arith.constant dense<0.000000e+00> : vector<4x128xf32>
    %1067 = tpu.matmul %1064, %1066, %cst_360 {dimension_numbers = #tpu.dot_dimension_numbers<[1], [0], [0], [1], [0, 0, 1, 1], [], []>} : vector<4x128xf32>, vector<128x128xf32>, vector<4x128xf32> -> vector<4x128xf32>
    %1068 = vector.extract_strided_slice %1035 {offsets = [1, 0], sizes = [4, 128], strides = [1, 1]} : vector<8x128xf32> to vector<4x128xf32>
    %1069 = vector.extract_strided_slice %928 {offsets = [1, 0, 0], sizes = [1, 128, 128], strides = [1, 1, 1]} : vector<5x128x128xf32> to vector<1x128x128xf32>
    %1070 = vector.shape_cast %1069 : vector<1x128x128xf32> to vector<128x128xf32>
    %cst_361 = arith.constant dense<0.000000e+00> : vector<4x128xf32>
    %1071 = tpu.matmul %1068, %1070, %cst_361 {dimension_numbers = #tpu.dot_dimension_numbers<[1], [0], [0], [1], [0, 0, 1, 1], [], []>} : vector<4x128xf32>, vector<128x128xf32>, vector<4x128xf32> -> vector<4x128xf32>
    %1072 = arith.addf %1067, %1071 : vector<4x128xf32>
    %1073 = vector.extract_strided_slice %1035 {offsets = [2, 0], sizes = [4, 128], strides = [1, 1]} : vector<8x128xf32> to vector<4x128xf32>
    %1074 = vector.extract_strided_slice %928 {offsets = [2, 0, 0], sizes = [1, 128, 128], strides = [1, 1, 1]} : vector<5x128x128xf32> to vector<1x128x128xf32>
    %1075 = vector.shape_cast %1074 : vector<1x128x128xf32> to vector<128x128xf32>
    %cst_362 = arith.constant dense<0.000000e+00> : vector<4x128xf32>
    %1076 = tpu.matmul %1073, %1075, %cst_362 {dimension_numbers = #tpu.dot_dimension_numbers<[1], [0], [0], [1], [0, 0, 1, 1], [], []>} : vector<4x128xf32>, vector<128x128xf32>, vector<4x128xf32> -> vector<4x128xf32>
    %1077 = arith.addf %1072, %1076 : vector<4x128xf32>
    %1078 = vector.extract_strided_slice %1035 {offsets = [3, 0], sizes = [4, 128], strides = [1, 1]} : vector<8x128xf32> to vector<4x128xf32>
    %1079 = vector.extract_strided_slice %928 {offsets = [3, 0, 0], sizes = [1, 128, 128], strides = [1, 1, 1]} : vector<5x128x128xf32> to vector<1x128x128xf32>
    %1080 = vector.shape_cast %1079 : vector<1x128x128xf32> to vector<128x128xf32>
    %cst_363 = arith.constant dense<0.000000e+00> : vector<4x128xf32>
    %1081 = tpu.matmul %1078, %1080, %cst_363 {dimension_numbers = #tpu.dot_dimension_numbers<[1], [0], [0], [1], [0, 0, 1, 1], [], []>} : vector<4x128xf32>, vector<128x128xf32>, vector<4x128xf32> -> vector<4x128xf32>
    %1082 = arith.addf %1077, %1081 : vector<4x128xf32>
    %1083 = vector.extract_strided_slice %1035 {offsets = [4, 0], sizes = [4, 128], strides = [1, 1]} : vector<8x128xf32> to vector<4x128xf32>
    %1084 = vector.extract_strided_slice %928 {offsets = [4, 0, 0], sizes = [1, 128, 128], strides = [1, 1, 1]} : vector<5x128x128xf32> to vector<1x128x128xf32>
    %1085 = vector.shape_cast %1084 : vector<1x128x128xf32> to vector<128x128xf32>
    %cst_364 = arith.constant dense<0.000000e+00> : vector<4x128xf32>
    %1086 = tpu.matmul %1083, %1085, %cst_364 {dimension_numbers = #tpu.dot_dimension_numbers<[1], [0], [0], [1], [0, 0, 1, 1], [], []>} : vector<4x128xf32>, vector<128x128xf32>, vector<4x128xf32> -> vector<4x128xf32>
    %1087 = arith.addf %1082, %1086 : vector<4x128xf32>
    %1088 = vector.broadcast %929 : vector<1x128xf32> to vector<4x128xf32>
    %1089 = arith.addf %1087, %1088 : vector<4x128xf32>
    %cst_365 = arith.constant 0.000000e+00 : f32
    %1090 = vector.broadcast %cst_365 : f32 to vector<4x128xf32>
    %1091 = arith.maximumf %1089, %1090 : vector<4x128xf32>
    %cst_366 = arith.constant dense<0xFF800000> : vector<128xf32>
    %1092 = vector.multi_reduction <maximumf>, %1091, %cst_366 [0] : vector<4x128xf32> to vector<128xf32>
    %1093 = vector.shape_cast %1092 : vector<128xf32> to vector<1x128xf32>
    %1094 = arith.maximumf %1043, %1063 : vector<1x128xf32>
    %1095 = arith.maximumf %1094, %1093 : vector<1x128xf32>
    %1096 = arith.mulf %1095, %930 : vector<1x128xf32>
    %cst_367 = arith.constant dense<0.000000e+00> : vector<1xf32>
    %1097 = vector.multi_reduction <add>, %1096, %cst_367 [1] : vector<1x128xf32> to vector<1xf32>
    %1098 = vector.shape_cast %1097 : vector<1xf32> to vector<1x1xf32>
    %1099 = tpu.concatenate %1014, %1098 in 0 : vector<1x1xf32>, vector<1x1xf32> -> vector<2x1xf32>
    %c0_368 = arith.constant 0 : index
    %c0_369 = arith.constant 0 : index
    %1100 = vector.load %arg15[%c0_368, %c0_369] : memref<2x1xf32, #tpu.memory_space<vmem>>, vector<2x1xf32>
    tpu.vector_store %arg15[%c0_368, %c0_369], %1099 {strides = array<i32>} : memref<2x1xf32, #tpu.memory_space<vmem>>, vector<2x1xf32>,
    return
  }
}

</mosaic_0001>

<bundles_post_ra>
// kernel: abwim_forward.1
= control target key start
LH: loop header
LB: loop body
LE: loop exit
PB: predicated region body
PF: predicated region fallthrough
CT: control target
= control target key end

     0   :  { %v76_v0 = vlaneseq  ;;  %v11496_v4 = vmov 0.0   ;;  %v9415_v5 = vmov 1983009808   ;;  %v11524_v12 = vmov 0.0|0.0   ;;  %s9419_s18 = smov 32   ;;  %s11479_s3 = inlined_call_operand.vmem [shape: f32[32,256], index: 3, kind: input, shape index: {}]   ;;  %s11480_s0 = inlined_call_operand.vmem [shape: f32[8,2,32], index: 0, kind: input, shape index: {}]   ;;  %s11481_s4 = inlined_call_operand.vmem [shape: f32[32,128], index: 4, kind: input, shape index: {}]   ;;  %s11482_s1 = inlined_call_operand.vmem [shape: f32[6,2,32], index: 1, kind: input, shape index: {}]   ;;  %s11483_s2 = inlined_call_operand.vmem [shape: f32[4,2,32], index: 2, kind: input, shape index: {}]   ;;  %s11484_s5 = inlined_call_operand.vmem [shape: f32[32,128], index: 5, kind: input, shape index: {}]   ;;  %s11485_s6 = inlined_call_operand.vmem [shape: f32[1,256], index: 6, kind: input, shape index: {}]   ;;  %s11486_s7 = inlined_call_operand.vmem [shape: f32[64,64], index: 7, kind: input, shape index: {}]   ;;  %s11487_s8 = inlined_call_operand.vmem [shape: f32[1,128,128], index: 8, kind: input, shape index: {}]   ;;  %s11488_s10 = inlined_call_operand.vmem [shape: f32[3,128,128], index: 10, kind: input, shape index: {}]   ;;  %s11489_s12 = inlined_call_operand.vmem [shape: f32[5,128,128], index: 12, kind: input, shape index: {}]   ;;  %s11490_s9 = inlined_call_operand.vmem [shape: f32[1,128], index: 9, kind: input, shape index: {}]   ;;  %s11491_s11 = inlined_call_operand.vmem [shape: f32[1,128], index: 11, kind: input, shape index: {}]   ;;  %s11492_s13 = inlined_call_operand.vmem [shape: f32[1,128], index: 13, kind: input, shape index: {}]   ;;  %s11493_s14 = inlined_call_operand.vmem [shape: f32[1,128], index: 14, kind: input, shape index: {}]   ;;  %s11494_s15 = inlined_call_operand.vmem [shape: f32[2,1], index: 15, kind: output, shape index: {}]  }
   0x1   :  { %v51_v1 = vld [vmem:[%s11479_s3 + $0x8] sm:$0xff]  ;;  %v53_v2 = vld [vmem:[%s11479_s3 + $0x18] sm:$0xff]  ;;  %v50_v3 = vld [vmem:[%s11479_s3] sm:$0xff]  ;;  %215 = vmatprep.mubr.f32.mxu0 %v11496_v4  ;;  %v86_v6 = vunpack.c.l.s4 %v9415_v5  ;;  %8427 = vmatprep.subr.bf16.mxu1 %v11524_v12  ;;  %vm9417_vm0 = vmmov 0   ;;  %vm146_vm1 = vcmask 261120   ;;  %vm779_vm2 = vcmask 254976  }
   0x2   :  { %v9511_v7 = vpack.c.bf16 %v53_v2, %v51_v1  ;;  %v52_v8 = vld [vmem:[%s11479_s3 + $0x10] sm:$0xff]  ;;  %v55_v9 = vld [vmem:[%s11479_s3 + $0x28] sm:$0xff]  ;;  %v57_v10 = vld [vmem:[%s11479_s3 + $0x38] sm:$0xff]  ;;  %v9522_v11 = vshrl.u32 %v76_v0, 7  ;;  %7345 = vmatprep.mubr.msk.f32.mxu1 %vm9417_vm0, %v11496_v4  ;;  %vm793_vm3 = vcmask 517376   ;;  %vm4647_vm4 = vcmask 1045509  }
   0x3   :  { %v9527_v13 = vpack.c.bf16 %v52_v8, %v50_v3  ;;  %v9529_v14 = vpack.c.bf16 %v57_v10, %v55_v9  ;;  %v54_v15 = vld [vmem:[%s11479_s3 + $0x20] sm:$0xff]  ;;  %v56_v16 = vld [vmem:[%s11479_s3 + $0x30] sm:$0xff]  ;;  %v87_v18 = vunpack.c.0.s8 %v86_v6  ;;  %v71_v26 = vld [vmem:[%s11480_s0 + $0x8] sm:$0x3]  ;;  %vm4650_vm5 = vcmask 1046534  }
   0x4   :  { %v67_v17 = vld [vmem:[%s11480_s0] sm:$0x3]  ;;  %8404 = vmatprep.subr.bf16.mxu0 %v9511_v7  ;;  %v68_v19 = vld [vmem:[%s11480_s0 + $0x2] sm:$0x3]  ;;  %v69_v20 = vld [vmem:[%s11480_s0 + $0x4] sm:$0x3]  ;;  %v9551_v22 = vpack.c.bf16 %v56_v16, %v54_v15 }
   0x5   :  { %v70_v21 = vld [vmem:[%s11480_s0 + $0x6] sm:$0x3]  ;;  %8406 = vmatpush1.bf16.msra.mxu0 %v9527_v13  ;;  %v9554_v23 = vsub.s32 %v87_v18, %v9522_v11  ;;  %v100_v24 = vcombine.low %v67_v17, %v68_v19  ;;  %v72_v27 = vld [vmem:[%s11480_s0 + $0xa] sm:$0x3]  ;;  %v73_v28 = vld [vmem:[%s11480_s0 + $0xc] sm:$0x3] }
   0x6   :  { %v101_v25 = vcombine.low %v69_v20, %v70_v21  ;;  %8408 = vmatprep.subr.bf16.mxu0 %v9529_v14  ;;  %v74_v29 = vld [vmem:[%s11480_s0 + $0xe] sm:$0x3]  ;;  %v117_v30 = vcombine.low %v71_v26, %v72_v27  ;;  %v59_v31 = vld [vmem:[%s11481_s4] sm:$0xff]  ;;  %v61_v43 = vld [vmem:[%s11481_s4 + $0x10] sm:$0xff]  ;;  %v78_v9 = vsub.s32 0, %v9522_v11  ;;  %v82_v10 = vsub.s32 1, %v9522_v11 }
   0x7   :  { %v60_v32 = vld [vmem:[%s11481_s4 + $0x8] sm:$0xff]  ;;  %v108_v33 = vrot.slane %v100_v24, %v9554_v23  ;;  %v118_v35 = vcombine.low %v73_v28, %v74_v29  ;;  %v284_v37 = vld [vmem:[%s11482_s1] sm:$0x3]  ;;  %v285_v38 = vld [vmem:[%s11482_s1 + $0x2] sm:$0x3]  ;;  %vm4630_vm6 = vcmask 1041409  }
   0x8   :  { %v115_v34 = vrot.slane %v101_v25, %v9554_v23  ;;  %v9577_v36 = vpack.c.bf16 %v60_v32, %v59_v31  ;;  %v286_v39 = vld [vmem:[%s11482_s1 + $0x4] sm:$0x3]  ;;  %v125_v40 = vrot.slane %v117_v30, %v9554_v23  ;;  %v287_v41 = vld [vmem:[%s11482_s1 + $0x6] sm:$0x3]  ;;  %v296_v42 = vcombine.low %v284_v37, %v285_v38  ;;  %v62_v44 = vld [vmem:[%s11481_s4 + $0x18] sm:$0xff] }
   0x9   :  { %8410 = vmatpush1.bf16.msra.mxu0 %v9551_v22  ;;  %v132_v46 = vrot.slane %v118_v35, %v9554_v23  ;;  %v297_v47 = vcombine.low %v286_v39, %v287_v41  ;;  %v9603_v48 = vpack.c.bf16 %v62_v44, %v61_v43  ;;  %v288_v52 = vld [vmem:[%s11482_s1 + $0x8] sm:$0x3]  ;;  %v289_v53 = vld [vmem:[%s11482_s1 + $0xa] sm:$0x3]  ;;  %v446_v54 = vld [vmem:[%s11483_s2] sm:$0x3] }
   0xa   :  { %v116_v45 = vcombine.low %v108_v33, %v115_v34  ;;  %8429 = vmatpush3.bf16.msra.mxu1 %v9577_v36  ;;  %8412 = vmatprep.subr.bf16.mxu0 %v9511_v7  ;;  %v304_v50 = vrot.slane %v296_v42, %v9554_v23  ;;  %v447_v55 = vld [vmem:[%s11483_s2 + $0x2] sm:$0x3]  ;;  %v448_v56 = vld [vmem:[%s11483_s2 + $0x4] sm:$0x3]  ;;  %v449_v57 = vld [vmem:[%s11483_s2 + $0x6] sm:$0x3]  ;;  %v313_v59 = vcombine.low %v288_v52, %v289_v53 }
   0xb   :  { %8430 = vmatprep.subr.bf16.mxu1 %v11524_v12  ;;  %v133_v49 = vcombine.low %v125_v40, %v132_v46  ;;  %v311_v51 = vrot.slane %v297_v47, %v9554_v23  ;;  %v454_v60 = vcombine.low %v446_v54, %v447_v55  ;;  %v455_v61 = vcombine.low %v448_v56, %v449_v57  ;;  %v63_v1 = vld [vmem:[%s11484_s5] sm:$0xff]  ;;  %v64_v2 = vld [vmem:[%s11484_s5 + $0x8] sm:$0xff]  ;;  %v65_v6 = vld [vmem:[%s11484_s5 + $0x10] sm:$0xff] }
   0xc   :  { %6730 = vmatmul.mubr.msk.f32.vlgmr.msra.gmra.mrb[0].mxu0 %vm146_vm1, %v116_v45  ;;  %v320_v62 = vrot.slane %v313_v59, %v9554_v23  ;;  %v9658_v5 = vpack.c.bf16 %v64_v2, %v63_v1  ;;  %vm4633_vm7 = vcmask 1042434   ;;  %vm4653_vm8 = vcmask 1047559  }
   0xd   :  { %8414 = vmatpush1.bf16.msra.mxu0 %v9527_v13  ;;  %221 = vmatprep.mubr.f32.mxu0 %v11496_v4  ;;  %v312_v58 = vcombine.low %v304_v50, %v311_v51  ;;  %v462_v63 = vrot.slane %v454_v60, %v9554_v23  ;;  %v469_v0 = vrot.slane %v455_v61, %v9554_v23  ;;  %vm4636_vm9 = vcmask 1043459  }
   0xe   :  { %8416 = vmatprep.subr.bf16.mxu0 %v9529_v14  ;;  %8432 = vmatpush3.bf16.msra.mxu1 %v9603_v48  ;;  %vm4658_vm10 = vcmask 1043456   ;;  %vm4660_vm11 = vcmask 523264   ;;  %vm4756_vm12 = vcmask 1044484   ;;  %vm4907_vm13 = vcmask 1041408  }
   0xf   :  { %8439 = vmatprep.subr.bf16.mxu1 %v11524_v12  ;;  %v470_v3 = vcombine.low %v462_v63, %v469_v0  ;;  %vm9420_vm14 = vmmov 1  }
  0x10   :  { %6731 = vmatmul.mubr.msk.f32.gmra.mrb[2].mxu0 %vm146_vm1, %v133_v49  ;;  %vm10444_vm15 = vmpackc.low %vm4907_vm13, %vm9420_vm14 }
  0x11   :  { %8418 = vmatpush1.bf16.msra.mxu0 %v9551_v22  ;;  %390 = vmatprep.mubr.f32.mxu0 %v11496_v4 }
  0x12   :  { %8420 = vmatprep.subr.bf16.mxu0 %v9511_v7  ;;  %7346 = vmatmul.mubr.f32.vlgmr.msra.gmra.mrb[0].mxu1 %v11496_v4  ;;  %v66_v7 = vld [vmem:[%s11484_s5 + $0x18] sm:$0xff] }
  0x13   :  { %8441 = vmatpush3.bf16.msra.mxu1 %v9577_v36  ;;  %7367 = vmatprep.mubr.msk.f32.mxu1 %vm9417_vm0, %v11496_v4  ;;  %v9669_v8 = vpack.c.bf16 %v66_v7, %v65_v6 }
  0x14   :  { %6736 = vmatmul.mubr.msk.f32.vlgmr.msra.gmra.mrb[4].mxu0 %vm146_vm1, %v312_v58  ;;  %8442 = vmatprep.subr.bf16.mxu1 %v11524_v12 }
  0x15   :  { %8422 = vmatpush1.bf16.msra.mxu0 %v9527_v13  ;;  %396 = vmatprep.mubr.f32.mxu0 %v11496_v4  ;;  %v58_v13 = vld [vmem:[%s11485_s6] sm:$0x3]  ;;  %s9418_s6 = smov 64  }
  0x16   :  { %8424 = vmatprep.subr.bf16.mxu0 %v9529_v14  ;;  %v79_v14 = vrot.slane %v58_v13, %v78_v9  ;;  %v83_v15 = vrot.slane %v58_v13, %v82_v10 }
  0x17   :  { %8444 = vmatpush3.bf16.msra.mxu1 %v9603_v48 }
  0x18   :  { %6737 = vmatmul.mubr.msk.f32.gmra.mrb[6].mxu0 %vm146_vm1, %v320_v62  ;;  %8451 = vmatprep.subr.bf16.mxu1 %v11524_v12  ;;  %v84_v16 = vcombine.low %v79_v14, %v83_v15 }
  0x19   :  { %8426 = vmatpush1.bf16.msra.mxu0 %v9551_v22  ;;  %537 = vmatprep.mubr.f32.mxu0 %v11496_v4 }
  0x1a   :  { %8433 = vmatprep.subr.bf16.mxu0 %v11524_v12  ;;  %v91_v17 = vrot.slane %v84_v16, %v9554_v23 }
  0x1c   :  { %6741 = vmatmul.mubr.msk.f32.vlgmr.msra.gmra.mrb[8].mxu0 %vm146_vm1, %v470_v3  ;;  %v134_v18 = vcombine.low %v91_v17, %v91_v17 }
  0x1d   :  { %8435 = vmatpush3.bf16.msra.mxu0 %v9658_v5  ;;  %7356 = vmatprep.mubr.msk.f32.mxu0 %vm9417_vm0, %v11496_v4 }
  0x1e   :  { %8436 = vmatprep.subr.bf16.mxu0 %v11524_v12  ;;  %v141_v19 = vrot.slane %v134_v18, %v9554_v23 }
  0x20   :  { %v142_v20 = vcombine.low %v141_v19, %v141_v19  ;;  %v143_v21 = vcombine.high %v141_v19, %v141_v19 }
  0x21   :  { %8438 = vmatpush3.bf16.msra.mxu0 %v9669_v8 }
  0x22   :  { %8445 = vmatprep.subr.bf16.mxu0 %v11524_v12 }
  0x24   :  { %7357 = vmatmul.mubr.f32.vlgmr.msra.gmra.mrb[10].mxu0 %v11496_v4 }
  0x25   :  { %8447 = vmatpush3.bf16.msra.mxu0 %v9658_v5  ;;  %7378 = vmatprep.mubr.msk.f32.mxu0 %vm9417_vm0, %v11496_v4 }
  0x26   :  { %8448 = vmatprep.subr.bf16.mxu0 %v11524_v12 }
  0x29   :  { %8450 = vmatpush3.bf16.msra.mxu0 %v9669_v8 }
  0x2a   :  { %8457 = vmatprep.subr.bf16.mxu0 %v11524_v12 }
  0xdf   :  { %v217_v22 = vpop.f32.mrb[0].mxu0 }
  0xe0   :  { %v218_v24 = vadd.f32 %v217_v22, %v142_v20  ;;  %v219_v25 = vpop.f32.mrb[1].mxu0 }
  0xe1   :  { %v220_v26 = vadd.f32 %v219_v25, %v143_v21 }
  0xe3   :  { %v232_v27 = vcombine.low %v218_v24, %v220_v26  ;;  %v233_v11 = vcombine.high %v218_v24, %v220_v26  ;;  %v223_v28 = vpop.f32.mrb[2].mxu0 }
  0xe4   :  { %v224_v29 = vadd.f32 %v223_v28, %v142_v20  ;;  %v225_v30 = vpop.f32.mrb[3].mxu0 }
  0xe5   :  { %v240_v31 = vrot.slane %v232_v27, %v9554_v23  ;;  %v247_v32 = vrot.slane %v233_v11, %v9554_v23  ;;  %6732 = vst.sshfl [vmem:[#allocation2] sm:$0x33 pattern:$0x76325410] %v232_v27  ;;  %v226_v33 = vadd.f32 %v225_v30, %v143_v21  ;;  %v9692_v34 = vpop.f32.mrb[0].mxu1 }
  0xe6   :  { %6733 = vst.sshfl [vmem:[#allocation2 + $0x8] sm:$0x33 pattern:$0x76325410] %v233_v11  ;;  %v7347_v35 = vpop.f32.mrb[1].mxu1 }
  0xe7   :  { %v248_v37 = vcombine.high %v240_v31, %v240_v31  ;;  %v249_v38 = vcombine.high %v247_v32, %v247_v32  ;;  %v250_v39 = vcombine.low %v224_v29, %v226_v33  ;;  %v251_v40 = vcombine.high %v224_v29, %v226_v33  ;;  %v392_v41 = vpop.f32.mrb[4].mxu0 }
  0xe8   :  { %v393_v42 = vadd.f32 %v392_v41, %v142_v20  ;;  %v394_v43 = vpop.f32.mrb[5].mxu0 }
  0xe9   :  { %277 = vst [vmem:[#allocation2 + $0x4] sm:$0xf] %v248_v37  ;;  %279 = vst [vmem:[#allocation2 + $0xc] sm:$0xf] %v249_v38  ;;  %v258_v44 = vrot.slane %v250_v39, %v9554_v23  ;;  %v265_v45 = vrot.slane %v251_v40, %v9554_v23  ;;  %v395_v46 = vadd.f32 %v394_v43, %v143_v21 }
  0xea   :  { %6734 = vst.sshfl [vmem:[#allocation2 + $0x10] sm:$0x33 pattern:$0x76325410] %v250_v39 }
  0xeb   :  { %6735 = vst.sshfl [vmem:[#allocation2 + $0x18] sm:$0x33 pattern:$0x76325410] %v251_v40  ;;  %v266_v47 = vcombine.high %v258_v44, %v258_v44  ;;  %v267_v49 = vcombine.high %v265_v45, %v265_v45  ;;  %v407_v50 = vcombine.low %v393_v42, %v395_v46  ;;  %v408_v51 = vcombine.high %v393_v42, %v395_v46  ;;  %v398_v52 = vpop.f32.mrb[6].mxu0 }
  0xec   :  { %v399_v53 = vadd.f32 %v398_v52, %v141_v19  ;;  %v400_v54 = vpop.f32.mrb[7].mxu0  ;;  %v572_v55 = vld [vmem:[#allocation2] sm:$0x3] }
  0xed   :  { %281 = vst [vmem:[#allocation2 + $0x14] sm:$0xf] %v266_v47  ;;  %283 = vst [vmem:[#allocation2 + $0x1c] sm:$0xf] %v267_v49  ;;  %v415_v56 = vrot.slane %v407_v50, %v9554_v23  ;;  %v422_v57 = vrot.slane %v408_v51, %v9554_v23  ;;  %v401_v58 = vadd.f32 %v400_v54, %v143_v21 }
  0xee   :  { %6738 = vst.sshfl [vmem:[#allocation3] sm:$0x33 pattern:$0x76325410] %v407_v50  ;;  %v646_v59 = vadd.f32 %v9692_v34, %v572_v55 }
  0xef   :  { %6739 = vst.sshfl [vmem:[#allocation3 + $0x8] sm:$0x33 pattern:$0x76325410] %v408_v51  ;;  %v423_v60 = vcombine.high %v415_v56, %v415_v56  ;;  %v424_v61 = vcombine.high %v422_v57, %v422_v57  ;;  %v425_v62 = vcombine.low %v399_v53, %v401_v58  ;;  %v539_v63 = vpop.f32.mrb[8].mxu0 }
  0xf0   :  { %9110 = vtanh.f32 %v646_v59  ;;  %v540_v0 = vadd.f32 %v539_v63, %v142_v20  ;;  %v541_v1 = vpop.f32.mrb[9].mxu0  ;;  %v6744_v22 = vmul.f32 -1.442695, %v646_v59  ;;  %v796_v53 = vld [vmem:[#allocation2 + $0x4] sm:$0x3] }
  0xf1   :  { %441 = vst [vmem:[#allocation3 + $0x4] sm:$0xf] %v423_v60  ;;  %443 = vst [vmem:[#allocation3 + $0xc] sm:$0xf] %v424_v61  ;;  %v432_v2 = vrot.slane %v425_v62, %v9554_v23  ;;  %v542_v3 = vadd.f32 %v541_v1, %v143_v21 }
  0xf2   :  { %6740 = vst.sshfl [vmem:[#allocation3 + $0x10] sm:$0x33 pattern:$0x76325410] %v425_v62  ;;  %v871_v57 = vld [vmem:[#allocation2 + $0x1a] sm:$0x3] }
  0xf3   :  { %v433_v6 = vcombine.high %v432_v2, %v432_v2  ;;  %v546_v7 = vcombine.low %v540_v0, %v542_v3  ;;  %v547_v9 = vcombine.high %v540_v0, %v542_v3 }
  0xf4   :  { %v648_v16 = vld [vmem:[#allocation2 + $0x1e] sm:$0x3] }
  0xf5   :  { %445 = vst [vmem:[#allocation3 + $0x14] sm:$0xf] %v433_v6  ;;  %v554_v10 = vrot.slane %v546_v7, %v9554_v23  ;;  %v561_v13 = vrot.slane %v547_v9, %v9554_v23  ;;  %6742 = vst.sshfl [vmem:[#allocation4] sm:$0x33 pattern:$0x76325410] %v546_v7 }
  0xf6   :  { %6743 = vst.sshfl [vmem:[#allocation4 + $0x8] sm:$0x33 pattern:$0x76325410] %v547_v9 }
  0xf7   :  { %v562_v14 = vcombine.high %v554_v10, %v554_v10  ;;  %v563_v15 = vcombine.high %v561_v13, %v561_v13  ;;  %v9702_v17 = vpop.f32.mrb[10].mxu0 }
  0xf8   :  { %v719_v18 = vadd.f32 %v9702_v17, %v648_v16  ;;  %v7358_v19 = vpop.f32.mrb[11].mxu0 }
  0xf9   :  { %569 = vst [vmem:[#allocation4 + $0x4] sm:$0xf] %v562_v14  ;;  %571 = vst [vmem:[#allocation4 + $0xc] sm:$0xf] %v563_v15 }
  0xfa   :  { %v9111_v20 = vpop.eup %9110  ;;  %9112 = vtanh.f32 %v719_v18  ;;  %v6745_v24 = vmul.f32 -1.442695, %v719_v18 }
  0xfb   :  { %729 = vrot.lane.b32.xlu0 %v9111_v20, %s9418_s6  ;;  %9114 = vpow2.f32 %v6744_v22 }
  0xfc   :  { %9116 = vpow2.f32 %v6745_v24 }
 0x104   :  { %v9113_v21 = vpop.eup %9112 }
 0x105   :  { %753 = vrot.lane.b32.xlu0 %v9113_v21, %s9418_s6  ;;  %v9115_v25 = vpop.eup %9114 }
 0x106   :  { %v723_v26 = vadd.f32 1.0, %v9115_v25  ;;  %v9117_v27 = vpop.eup %9116 }
 0x107   :  { %v747_v11 = vadd.f32 1.0, %v9117_v27 }
 0x108   :  { %9118 = vrcp.f32 %v723_v26 }
 0x109   :  { %9120 = vrcp.f32 %v747_v11 }
 0x112   :  { %v9119_v28 = vpop.eup %9118 }
 0x113   :  { %v9121_v31 = vpop.eup %9120  ;;  %v727_v35 = vmul.f32 0.0, %v9119_v28 }
 0x114   :  { %v751_v39 = vmul.f32 0.0, %v9121_v31 }
 0x16d   :  { %v730_v29 = vpop.permute.xlu0 %729 }
 0x16e   :  { %v732_v30 = vmul.f32 %v9119_v28, %v730_v29 }
 0x170   :  { %734 = vrot.lane.b32.xlu1 %v732_v30, %s9419_s18 }
 0x177   :  { %v754_v32 = vpop.permute.xlu0 %753 }
 0x178   :  { %v756_v33 = vmul.f32 %v9121_v31, %v754_v32 }
 0x17a   :  { %758 = vrot.lane.b32.xlu1 %v756_v33, %s9419_s18  ;;  %v1022_v33 = vld [vmem:[#allocation2 + $0x8] sm:$0x3] }
 0x1e2   :  { %v735_v37 = vpop.permute.xlu1 %734 }
 0x1e3   :  { %v9709_v38 = vadd.f32 %v735_v37, %v727_v35 }
 0x1e5   :  { %9122 = vtanh.f32 %v9709_v38 }
 0x1ec   :  { %v759_v40 = vpop.permute.xlu1 %758 }
 0x1ed   :  { %v9712_v41 = vadd.f32 %v759_v40, %v751_v39  ;;  %v1097_v39 = vld [vmem:[#allocation2 + $0x16] sm:$0x3] }
 0x1ef   :  { %v9123_v42 = vpop.eup %9122  ;;  %9124 = vtanh.f32 %v9712_v41 }
 0x1f0   :  { %740 = vrot.lane.b32.xlu0 %v9123_v42, %s9418_s6 }
 0x1f9   :  { %v9125_v43 = vpop.eup %9124 }
 0x1fa   :  { %764 = vrot.lane.b32.xlu1 %v9125_v43, %s9418_s6 }
 0x262   :  { %v741_v44 = vpop.permute.xlu0 %740 }
 0x263   :  { %v743_v45 = vmul.f32 %v9119_v28, %v741_v44 }
 0x265   :  { %v775_v46 = vrot.slane %v743_v45, %v9554_v23 }
 0x267   :  { %776 = vrot.lane.b32.xlu0 %v775_v46, %s9419_s18 }
 0x26c   :  { %v765_v47 = vpop.permute.xlu1 %764 }
 0x26d   :  { %v767_v49 = vmul.f32 %v9121_v31, %v765_v47 }
 0x26f   :  { %v9720_v50 = vrot.slane %v767_v49, %v9554_v23 }
 0x271   :  { %872 = vrot.lane.b32.xlu1 %v9720_v50, %s9419_s18 }
 0x2d9   :  { %v777_v51 = vpop.permute.xlu0 %776 }
 0x2da   :  { %780 = vst.msk [vmem:[#allocation5] sm:$0x3] %vm779_vm2, %v777_v51  ;;  %7368 = vmatmul.mubr.msk.f32.vlgmr.msra.gmra.mrb[2].mxu1 %vm146_vm1, %v777_v51 }
 0x2db   :  { %8453 = vmatpush3.bf16.msra.mxu1 %v9577_v36  ;;  %7389 = vmatprep.mubr.msk.f32.mxu1 %vm9417_vm0, %v11496_v4 }
 0x2dc   :  { %8454 = vmatprep.subr.bf16.mxu1 %v11524_v12 }
 0x2df   :  { %8456 = vmatpush3.bf16.msra.mxu1 %v9603_v48 }
 0x2e0   :  { %8463 = vmatprep.subr.bf16.mxu1 %v11524_v12 }
 0x2e3   :  { %v873_v52 = vpop.permute.xlu1 %872 }
 0x2e4   :  { %7379 = vmatmul.mubr.msk.f32.vlgmr.msra.gmra.mrb[12].mxu0 %vm146_vm1, %v873_v52 }
 0x2e5   :  { %8459 = vmatpush3.bf16.msra.mxu0 %v9658_v5  ;;  %7400 = vmatprep.mubr.msk.f32.mxu0 %vm9417_vm0, %v11496_v4 }
 0x2e6   :  { %8460 = vmatprep.subr.bf16.mxu0 %v11524_v12 }
 0x2e9   :  { %8462 = vmatpush3.bf16.msra.mxu0 %v9669_v8 }
 0x2ea   :  { %8469 = vmatprep.subr.bf16.mxu0 %v11524_v12 }
 0x3ad   :  { %v865_v54 = vpop.f32.mrb[2].mxu1 }
 0x3ae   :  { %v869_v55 = vadd.f32 %v865_v54, %v796_v53  ;;  %v7369_v56 = vpop.f32.mrb[3].mxu1 }
 0x3b0   :  { %9126 = vtanh.f32 %v869_v55  ;;  %v6748_v63 = vmul.f32 -1.442695, %v869_v55 }
 0x3b7   :  { %v942_v58 = vpop.f32.mrb[12].mxu0 }
 0x3b8   :  { %v946_v59 = vadd.f32 %v942_v58, %v871_v57  ;;  %v7380_v60 = vpop.f32.mrb[13].mxu0 }
 0x3ba   :  { %v9127_v61 = vpop.eup %9126  ;;  %9128 = vtanh.f32 %v946_v59  ;;  %v6749_v0 = vmul.f32 -1.442695, %v946_v59 }
 0x3bb   :  { %956 = vrot.lane.b32.xlu0 %v9127_v61, %s9418_s6  ;;  %9130 = vpow2.f32 %v6748_v63 }
 0x3bc   :  { %9132 = vpow2.f32 %v6749_v0 }
 0x3c4   :  { %v9129_v62 = vpop.eup %9128 }
 0x3c5   :  { %980 = vrot.lane.b32.xlu1 %v9129_v62, %s9418_s6  ;;  %v9131_v1 = vpop.eup %9130 }
 0x3c6   :  { %v950_v2 = vadd.f32 1.0, %v9131_v1  ;;  %v9133_v3 = vpop.eup %9132 }
 0x3c7   :  { %v974_v6 = vadd.f32 1.0, %v9133_v3 }
 0x3c8   :  { %9134 = vrcp.f32 %v950_v2 }
 0x3c9   :  { %9136 = vrcp.f32 %v974_v6 }
 0x3d2   :  { %v9135_v7 = vpop.eup %9134 }
 0x3d3   :  { %v9137_v13 = vpop.eup %9136  ;;  %v954_v16 = vmul.f32 %v9135_v7, %v9709_v38 }
 0x3d4   :  { %v978_v20 = vmul.f32 %v9137_v13, %v9712_v41 }
 0x42d   :  { %v957_v9 = vpop.permute.xlu0 %956 }
 0x42e   :  { %v959_v10 = vmul.f32 %v9135_v7, %v957_v9 }
 0x430   :  { %961 = vrot.lane.b32.xlu0 %v959_v10, %s9419_s18 }
 0x437   :  { %v981_v14 = vpop.permute.xlu1 %980 }
 0x438   :  { %v983_v15 = vmul.f32 %v9137_v13, %v981_v14 }
 0x43a   :  { %985 = vrot.lane.b32.xlu1 %v983_v15, %s9419_s18 }
 0x4a2   :  { %v962_v18 = vpop.permute.xlu0 %961 }
 0x4a3   :  { %v9744_v19 = vadd.f32 %v962_v18, %v954_v16  ;;  %v1248_v16 = vld [vmem:[#allocation2 + $0xc] sm:$0x3] }
 0x4a5   :  { %9138 = vtanh.f32 %v9744_v19 }
 0x4ac   :  { %v986_v21 = vpop.permute.xlu1 %985 }
 0x4ad   :  { %v9748_v22 = vadd.f32 %v986_v21, %v978_v20  ;;  %v1323_v21 = vld [vmem:[#allocation2 + $0x12] sm:$0x3] }
 0x4af   :  { %v9139_v24 = vpop.eup %9138  ;;  %9140 = vtanh.f32 %v9748_v22 }
 0x4b0   :  { %967 = vrot.lane.b32.xlu0 %v9139_v24, %s9418_s6 }
 0x4b9   :  { %v9141_v25 = vpop.eup %9140 }
 0x4ba   :  { %991 = vrot.lane.b32.xlu1 %v9141_v25, %s9418_s6 }
 0x522   :  { %v968_v26 = vpop.permute.xlu0 %967 }
 0x523   :  { %v970_v27 = vmul.f32 %v9135_v7, %v968_v26 }
 0x525   :  { %v1002_v11 = vrot.slane %v970_v27, %v9554_v23 }
 0x527   :  { %1003 = vrot.lane.b32.xlu0 %v1002_v11, %s9419_s18 }
 0x52c   :  { %v992_v28 = vpop.permute.xlu1 %991 }
 0x52d   :  { %v994_v29 = vmul.f32 %v9137_v13, %v992_v28 }
 0x52f   :  { %v9756_v30 = vrot.slane %v994_v29, %v9554_v23 }
 0x531   :  { %1098 = vrot.lane.b32.xlu1 %v9756_v30, %s9419_s18 }
 0x599   :  { %v1004_v31 = vpop.permute.xlu0 %1003 }
 0x59a   :  { %1007 = vst.msk [vmem:[#allocation5 + $0x2] sm:$0x3] %vm779_vm2, %v1004_v31  ;;  %7390 = vmatmul.mubr.msk.f32.vlgmr.msra.gmra.mrb[4].mxu1 %vm146_vm1, %v1004_v31 }
 0x59b   :  { %8465 = vmatpush3.bf16.msra.mxu1 %v9577_v36  ;;  %7411 = vmatprep.mubr.msk.f32.mxu1 %vm9417_vm0, %v11496_v4 }
 0x59c   :  { %8466 = vmatprep.subr.bf16.mxu1 %v11524_v12 }
 0x59f   :  { %8468 = vmatpush3.bf16.msra.mxu1 %v9603_v48 }
 0x5a0   :  { %8475 = vmatprep.subr.bf16.mxu1 %v11524_v12 }
 0x5a3   :  { %v1099_v32 = vpop.permute.xlu1 %1098 }
 0x5a4   :  { %7401 = vmatmul.mubr.msk.f32.vlgmr.msra.gmra.mrb[14].mxu0 %vm146_vm1, %v1099_v32 }
 0x5a5   :  { %8471 = vmatpush3.bf16.msra.mxu0 %v9658_v5  ;;  %7422 = vmatprep.mubr.msk.f32.mxu0 %vm9417_vm0, %v11496_v4 }
 0x5a6   :  { %8472 = vmatprep.subr.bf16.mxu0 %v11524_v12 }
 0x5a9   :  { %8474 = vmatpush3.bf16.msra.mxu0 %v9669_v8 }
 0x5aa   :  { %8481 = vmatprep.subr.bf16.mxu0 %v11524_v12 }
 0x66d   :  { %v1091_v35 = vpop.f32.mrb[4].mxu1 }
 0x66e   :  { %v1095_v37 = vadd.f32 %v1091_v35, %v1022_v33  ;;  %v7391_v38 = vpop.f32.mrb[5].mxu1 }
 0x670   :  { %9142 = vtanh.f32 %v1095_v37  ;;  %v6752_v45 = vmul.f32 -1.442695, %v1095_v37 }
 0x677   :  { %v1168_v40 = vpop.f32.mrb[14].mxu0 }
 0x678   :  { %v1172_v41 = vadd.f32 %v1168_v40, %v1097_v39  ;;  %v7402_v42 = vpop.f32.mrb[15].mxu0 }
 0x67a   :  { %v9143_v43 = vpop.eup %9142  ;;  %9144 = vtanh.f32 %v1172_v41  ;;  %v6753_v46 = vmul.f32 -1.442695, %v1172_v41 }
 0x67b   :  { %1182 = vrot.lane.b32.xlu0 %v9143_v43, %s9418_s6  ;;  %9146 = vpow2.f32 %v6752_v45 }
 0x67c   :  { %9148 = vpow2.f32 %v6753_v46 }
 0x684   :  { %v9145_v44 = vpop.eup %9144 }
 0x685   :  { %1206 = vrot.lane.b32.xlu1 %v9145_v44, %s9418_s6  ;;  %v9147_v47 = vpop.eup %9146 }
 0x686   :  { %v1176_v49 = vadd.f32 1.0, %v9147_v47  ;;  %v9149_v51 = vpop.eup %9148 }
 0x687   :  { %v1200_v52 = vadd.f32 1.0, %v9149_v51 }
 0x688   :  { %9150 = vrcp.f32 %v1176_v49 }
 0x689   :  { %9152 = vrcp.f32 %v1200_v52 }
 0x692   :  { %v9151_v53 = vpop.eup %9150 }
 0x693   :  { %v9153_v56 = vpop.eup %9152  ;;  %v1180_v59 = vmul.f32 %v9151_v53, %v9744_v19 }
 0x694   :  { %v1204_v62 = vmul.f32 %v9153_v56, %v9748_v22 }
 0x6ed   :  { %v1183_v54 = vpop.permute.xlu0 %1182 }
 0x6ee   :  { %v1185_v55 = vmul.f32 %v9151_v53, %v1183_v54 }
 0x6f0   :  { %1187 = vrot.lane.b32.xlu0 %v1185_v55, %s9419_s18 }
 0x6f7   :  { %v1207_v57 = vpop.permute.xlu1 %1206 }
 0x6f8   :  { %v1209_v58 = vmul.f32 %v9153_v56, %v1207_v57 }
 0x6fa   :  { %1211 = vrot.lane.b32.xlu1 %v1209_v58, %s9419_s18 }
 0x762   :  { %v1188_v60 = vpop.permute.xlu0 %1187 }
 0x763   :  { %v9780_v61 = vadd.f32 %v1188_v60, %v1180_v59  ;;  %v1473_v60 = vld [vmem:[#allocation2 + $0x10] sm:$0x3] }
 0x765   :  { %9154 = vtanh.f32 %v9780_v61 }
 0x76c   :  { %v1212_v63 = vpop.permute.xlu1 %1211 }
 0x76d   :  { %v9784_v0 = vadd.f32 %v1212_v63, %v1204_v62 }
 0x76f   :  { %v9155_v1 = vpop.eup %9154  ;;  %9156 = vtanh.f32 %v9784_v0 }
 0x770   :  { %1193 = vrot.lane.b32.xlu0 %v9155_v1, %s9418_s6 }
 0x779   :  { %v9157_v2 = vpop.eup %9156 }
 0x77a   :  { %1217 = vrot.lane.b32.xlu1 %v9157_v2, %s9418_s6 }
 0x7e2   :  { %v1194_v3 = vpop.permute.xlu0 %1193 }
 0x7e3   :  { %v1196_v6 = vmul.f32 %v9151_v53, %v1194_v3 }
 0x7e5   :  { %v1228_v7 = vrot.slane %v1196_v6, %v9554_v23 }
 0x7e7   :  { %1229 = vrot.lane.b32.xlu0 %v1228_v7, %s9419_s18 }
 0x7ec   :  { %v1218_v9 = vpop.permute.xlu1 %1217 }
 0x7ed   :  { %v1220_v10 = vmul.f32 %v9153_v56, %v1218_v9 }
 0x7ef   :  { %v9792_v13 = vrot.slane %v1220_v10, %v9554_v23 }
 0x7f1   :  { %1324 = vrot.lane.b32.xlu1 %v9792_v13, %s9419_s18 }
 0x859   :  { %v1230_v14 = vpop.permute.xlu0 %1229 }
 0x85a   :  { %1233 = vst.msk [vmem:[#allocation5 + $0x4] sm:$0x3] %vm779_vm2, %v1230_v14  ;;  %7412 = vmatmul.mubr.msk.f32.vlgmr.msra.gmra.mrb[6].mxu1 %vm146_vm1, %v1230_v14 }
 0x85b   :  { %8477 = vmatpush3.bf16.msra.mxu1 %v9577_v36  ;;  %7433 = vmatprep.mubr.msk.f32.mxu1 %vm9417_vm0, %v11496_v4 }
 0x85c   :  { %8478 = vmatprep.subr.bf16.mxu1 %v11524_v12 }
 0x85f   :  { %8480 = vmatpush3.bf16.msra.mxu1 %v9603_v48 }
 0x860   :  { %8487 = vmatprep.subr.bf16.mxu1 %v11524_v12 }
 0x863   :  { %v1325_v15 = vpop.permute.xlu1 %1324 }
 0x864   :  { %7423 = vmatmul.mubr.msk.f32.vlgmr.msra.gmra.mrb[16].mxu0 %vm146_vm1, %v1325_v15 }
 0x865   :  { %8483 = vmatpush3.bf16.msra.mxu0 %v9658_v5  ;;  %7444 = vmatprep.mubr.msk.f32.mxu0 %vm9417_vm0, %v11496_v4 }
 0x866   :  { %8484 = vmatprep.subr.bf16.mxu0 %v11524_v12 }
 0x869   :  { %8486 = vmatpush3.bf16.msra.mxu0 %v9669_v8 }
 0x86a   :  { %8493 = vmatprep.subr.bf16.mxu0 %v11524_v12 }
 0x92d   :  { %v1317_v18 = vpop.f32.mrb[6].mxu1 }
 0x92e   :  { %v1321_v19 = vadd.f32 %v1317_v18, %v1248_v16  ;;  %v7413_v20 = vpop.f32.mrb[7].mxu1 }
 0x930   :  { %9158 = vtanh.f32 %v1321_v19  ;;  %v6756_v11 = vmul.f32 -1.442695, %v1321_v19 }
 0x937   :  { %v1394_v22 = vpop.f32.mrb[16].mxu0 }
 0x938   :  { %v1398_v24 = vadd.f32 %v1394_v22, %v1323_v21  ;;  %v7424_v25 = vpop.f32.mrb[17].mxu0 }
 0x93a   :  { %v9159_v26 = vpop.eup %9158  ;;  %9160 = vtanh.f32 %v1398_v24  ;;  %v6757_v28 = vmul.f32 -1.442695, %v1398_v24 }
 0x93b   :  { %1408 = vrot.lane.b32.xlu0 %v9159_v26, %s9418_s6  ;;  %9162 = vpow2.f32 %v6756_v11 }
 0x93c   :  { %9164 = vpow2.f32 %v6757_v28 }
 0x944   :  { %v9161_v27 = vpop.eup %9160 }
 0x945   :  { %1432 = vrot.lane.b32.xlu1 %v9161_v27, %s9418_s6  ;;  %v9163_v29 = vpop.eup %9162 }
 0x946   :  { %v1402_v31 = vadd.f32 1.0, %v9163_v29  ;;  %v9165_v32 = vpop.eup %9164 }
 0x947   :  { %v1426_v33 = vadd.f32 1.0, %v9165_v32 }
 0x948   :  { %9166 = vrcp.f32 %v1402_v31 }
 0x949   :  { %9168 = vrcp.f32 %v1426_v33 }
 0x952   :  { %v9167_v35 = vpop.eup %9166 }
 0x953   :  { %v9169_v39 = vpop.eup %9168  ;;  %v1406_v42 = vmul.f32 %v9167_v35, %v9780_v61 }
 0x954   :  { %v1430_v45 = vmul.f32 %v9169_v39, %v9784_v0  ;;  %v1547_v0 = vld [vmem:[#allocation2 + $0xe] sm:$0x3] }
 0x9ad   :  { %v1409_v37 = vpop.permute.xlu0 %1408 }
 0x9ae   :  { %v1411_v38 = vmul.f32 %v9167_v35, %v1409_v37 }
 0x9b0   :  { %1413 = vrot.lane.b32.xlu0 %v1411_v38, %s9419_s18 }
 0x9b7   :  { %v1433_v40 = vpop.permute.xlu1 %1432 }
 0x9b8   :  { %v1435_v41 = vmul.f32 %v9169_v39, %v1433_v40 }
 0x9ba   :  { %1437 = vrot.lane.b32.xlu1 %v1435_v41, %s9419_s18 }
 0xa22   :  { %v1414_v43 = vpop.permute.xlu0 %1413 }
 0xa23   :  { %v9816_v44 = vadd.f32 %v1414_v43, %v1406_v42 }
 0xa25   :  { %9170 = vtanh.f32 %v9816_v44 }
 0xa2c   :  { %v1438_v46 = vpop.permute.xlu1 %1437 }
 0xa2d   :  { %v9820_v47 = vadd.f32 %v1438_v46, %v1430_v45 }
 0xa2f   :  { %v9171_v49 = vpop.eup %9170  ;;  %9172 = vtanh.f32 %v9820_v47 }
 0xa30   :  { %1419 = vrot.lane.b32.xlu0 %v9171_v49, %s9418_s6  ;;  %v1769_v49 = vld [vmem:[#allocation2 + $0xa] sm:$0x3] }
 0xa39   :  { %v9173_v51 = vpop.eup %9172 }
 0xa3a   :  { %1443 = vrot.lane.b32.xlu1 %v9173_v51, %s9418_s6 }
 0xaa2   :  { %v1420_v52 = vpop.permute.xlu0 %1419 }
 0xaa3   :  { %v1422_v53 = vmul.f32 %v9167_v35, %v1420_v52 }
 0xaa5   :  { %v1454_v54 = vrot.slane %v1422_v53, %v9554_v23 }
 0xaa7   :  { %1455 = vrot.lane.b32.xlu0 %v1454_v54, %s9419_s18 }
 0xaac   :  { %v1444_v55 = vpop.permute.xlu1 %1443 }
 0xaad   :  { %v1446_v56 = vmul.f32 %v9169_v39, %v1444_v55 }
 0xaaf   :  { %v9828_v57 = vrot.slane %v1446_v56, %v9554_v23 }
 0xab1   :  { %1548 = vrot.lane.b32.xlu1 %v9828_v57, %s9419_s18 }
 0xb19   :  { %v1456_v58 = vpop.permute.xlu0 %1455 }
 0xb1a   :  { %1459 = vst.msk [vmem:[#allocation5 + $0x6] sm:$0x3] %vm779_vm2, %v1456_v58  ;;  %7434 = vmatmul.mubr.msk.f32.vlgmr.msra.gmra.mrb[8].mxu1 %vm146_vm1, %v1456_v58 }
 0xb1b   :  { %8489 = vmatpush3.bf16.msra.mxu1 %v9577_v36  ;;  %7455 = vmatprep.mubr.msk.f32.mxu1 %vm9417_vm0, %v11496_v4 }
 0xb1c   :  { %8490 = vmatprep.subr.bf16.mxu1 %v11524_v12 }
 0xb1f   :  { %8492 = vmatpush3.bf16.msra.mxu1 %v9603_v48 }
 0xb20   :  { %8499 = vmatprep.subr.bf16.mxu1 %v11524_v12 }
 0xb23   :  { %v1549_v59 = vpop.permute.xlu1 %1548 }
 0xb24   :  { %7445 = vmatmul.mubr.msk.f32.vlgmr.msra.gmra.mrb[18].mxu0 %vm146_vm1, %v1549_v59 }
 0xb25   :  { %8495 = vmatpush3.bf16.msra.mxu0 %v9658_v5  ;;  %7466 = vmatprep.mubr.msk.f32.mxu0 %vm9417_vm0, %v11496_v4 }
 0xb26   :  { %8496 = vmatprep.subr.bf16.mxu0 %v11524_v12 }
 0xb29   :  { %8498 = vmatpush3.bf16.msra.mxu0 %v9669_v8 }
 0xb2a   :  { %8505 = vmatprep.subr.bf16.mxu0 %v11524_v12 }
 0xbed   :  { %v1542_v61 = vpop.f32.mrb[8].mxu1 }
 0xbee   :  { %v1546_v62 = vadd.f32 %v1542_v61, %v1473_v60  ;;  %v7435_v63 = vpop.f32.mrb[9].mxu1 }
 0xbf0   :  { %9174 = vtanh.f32 %v1546_v62  ;;  %v6760_v9 = vmul.f32 -1.442695, %v1546_v62 }
 0xbf7   :  { %v1618_v1 = vpop.f32.mrb[18].mxu0 }
 0xbf8   :  { %v1622_v2 = vadd.f32 %v1618_v1, %v1547_v0  ;;  %v7446_v3 = vpop.f32.mrb[19].mxu0 }
 0xbfa   :  { %v9175_v6 = vpop.eup %9174  ;;  %9176 = vtanh.f32 %v1622_v2  ;;  %v6761_v10 = vmul.f32 -1.442695, %v1622_v2 }
 0xbfb   :  { %1632 = vrot.lane.b32.xlu0 %v9175_v6, %s9418_s6  ;;  %9178 = vpow2.f32 %v6760_v9 }
 0xbfc   :  { %9180 = vpow2.f32 %v6761_v10 }
 0xc04   :  { %v9177_v7 = vpop.eup %9176 }
 0xc05   :  { %1656 = vrot.lane.b32.xlu1 %v9177_v7, %s9418_s6  ;;  %v9179_v14 = vpop.eup %9178 }
 0xc06   :  { %v1626_v15 = vadd.f32 1.0, %v9179_v14  ;;  %v9181_v16 = vpop.eup %9180 }
 0xc07   :  { %v1650_v18 = vadd.f32 1.0, %v9181_v16 }
 0xc08   :  { %9182 = vrcp.f32 %v1626_v15 }
 0xc09   :  { %9184 = vrcp.f32 %v1650_v18 }
 0xc12   :  { %v9183_v19 = vpop.eup %9182 }
 0xc13   :  { %v9185_v22 = vpop.eup %9184  ;;  %v1630_v26 = vmul.f32 %v9183_v19, %v9816_v44  ;;  %v1695_v44 = vld [vmem:[#allocation2 + $0x14] sm:$0x3] }
 0xc14   :  { %v1654_v28 = vmul.f32 %v9185_v22, %v9820_v47 }
 0xc6d   :  { %v1633_v20 = vpop.permute.xlu0 %1632 }
 0xc6e   :  { %v1635_v21 = vmul.f32 %v9183_v19, %v1633_v20 }
 0xc70   :  { %1637 = vrot.lane.b32.xlu0 %v1635_v21, %s9419_s18 }
 0xc77   :  { %v1657_v24 = vpop.permute.xlu1 %1656 }
 0xc78   :  { %v1659_v25 = vmul.f32 %v9185_v22, %v1657_v24 }
 0xc7a   :  { %1661 = vrot.lane.b32.xlu1 %v1659_v25, %s9419_s18 }
 0xce2   :  { %v1638_v27 = vpop.permute.xlu0 %1637 }
 0xce3   :  { %v9852_v11 = vadd.f32 %v1638_v27, %v1630_v26 }
 0xce5   :  { %9186 = vtanh.f32 %v9852_v11 }
 0xcec   :  { %v1662_v29 = vpop.permute.xlu1 %1661 }
 0xced   :  { %v9856_v31 = vadd.f32 %v1662_v29, %v1654_v28  ;;  %v2361_v28 = vld [vmem:[#allocation3] sm:$0x3]  ;;  %v1917_v29 = vld [vmem:[#allocation2 + $0x18] sm:$0x3] }
 0xcef   :  { %v9187_v32 = vpop.eup %9186  ;;  %9188 = vtanh.f32 %v9856_v31 }
 0xcf0   :  { %1643 = vrot.lane.b32.xlu0 %v9187_v32, %s9418_s6 }
 0xcf9   :  { %v9189_v33 = vpop.eup %9188 }
 0xcfa   :  { %1667 = vrot.lane.b32.xlu1 %v9189_v33, %s9418_s6 }
 0xd62   :  { %v1644_v35 = vpop.permute.xlu0 %1643 }
 0xd63   :  { %v1646_v37 = vmul.f32 %v9183_v19, %v1644_v35  ;;  %v2362_v35 = vadd.f32 %v2361_v28, %v9692_v34 }
 0xd65   :  { %v1678_v38 = vrot.slane %v1646_v37, %v9554_v23  ;;  %v2364_v37 = vld [vmem:[#allocation3 + $0x16] sm:$0x3] }
 0xd67   :  { %1679 = vrot.lane.b32.xlu0 %v1678_v38, %s9419_s18  ;;  %v1991_v38 = vld [vmem:[#allocation2 + $0x6] sm:$0x3] }
 0xd6c   :  { %v1668_v39 = vpop.permute.xlu1 %1667 }
 0xd6d   :  { %v1670_v40 = vmul.f32 %v9185_v22, %v1668_v39 }
 0xd6f   :  { %v9864_v41 = vrot.slane %v1670_v40, %v9554_v23 }
 0xd71   :  { %1770 = vrot.lane.b32.xlu1 %v9864_v41, %s9419_s18 }
 0xdd9   :  { %v9868_v42 = vpop.permute.xlu0 %1679 }
 0xdda   :  { %7456 = vmatmul.mubr.msk.f32.vlgmr.msra.gmra.mrb[10].mxu1 %vm146_vm1, %v9868_v42 }
 0xddb   :  { %8501 = vmatpush3.bf16.msra.mxu1 %v9577_v36  ;;  %7477 = vmatprep.mubr.msk.f32.mxu1 %vm9417_vm0, %v11496_v4 }
 0xddc   :  { %8502 = vmatprep.subr.bf16.mxu1 %v11524_v12 }
 0xddf   :  { %8504 = vmatpush3.bf16.msra.mxu1 %v9603_v48 }
 0xde0   :  { %8511 = vmatprep.subr.bf16.mxu1 %v11524_v12 }
 0xde3   :  { %v1771_v43 = vpop.permute.xlu1 %1770 }
 0xde4   :  { %7467 = vmatmul.mubr.msk.f32.vlgmr.msra.gmra.mrb[20].mxu0 %vm146_vm1, %v1771_v43 }
 0xde5   :  { %8507 = vmatpush3.bf16.msra.mxu0 %v9658_v5  ;;  %7488 = vmatprep.mubr.msk.f32.mxu0 %vm9417_vm0, %v11496_v4 }
 0xde6   :  { %8508 = vmatprep.subr.bf16.mxu0 %v11524_v12 }
 0xde9   :  { %8510 = vmatpush3.bf16.msra.mxu0 %v9669_v8 }
 0xdea   :  { %8517 = vmatprep.subr.bf16.mxu0 %v11524_v12 }
 0xead   :  { %v1764_v45 = vpop.f32.mrb[10].mxu1 }
 0xeae   :  { %v1768_v46 = vadd.f32 %v1764_v45, %v1695_v44  ;;  %v7457_v47 = vpop.f32.mrb[11].mxu1  ;;  %v2365_v45 = vadd.f32 %v2364_v37, %v9702_v17 }
 0xeb0   :  { %9190 = vtanh.f32 %v1768_v46  ;;  %v6764_v56 = vmul.f32 -1.442695, %v1768_v46  ;;  %v6775_v17 = vmul.f32 -1.442695, %v2365_v45 }
 0xeb7   :  { %v1840_v51 = vpop.f32.mrb[20].mxu0 }
 0xeb8   :  { %v1844_v52 = vadd.f32 %v1840_v51, %v1769_v49  ;;  %v7468_v53 = vpop.f32.mrb[21].mxu0  ;;  %v6774_v51 = vmul.f32 -1.442695, %v2362_v35 }
 0xeba   :  { %v9191_v54 = vpop.eup %9190  ;;  %9192 = vtanh.f32 %v1844_v52  ;;  %v6765_v58 = vmul.f32 -1.442695, %v1844_v52 }
 0xebb   :  { %1854 = vrot.lane.b32.xlu0 %v9191_v54, %s9418_s6  ;;  %9194 = vpow2.f32 %v6764_v56 }
 0xebc   :  { %9196 = vpow2.f32 %v6765_v58 }
 0xec4   :  { %v9193_v55 = vpop.eup %9192 }
 0xec5   :  { %1878 = vrot.lane.b32.xlu1 %v9193_v55, %s9418_s6  ;;  %v9195_v59 = vpop.eup %9194 }
 0xec6   :  { %v1848_v60 = vadd.f32 1.0, %v9195_v59  ;;  %v9197_v61 = vpop.eup %9196 }
 0xec7   :  { %v1872_v62 = vadd.f32 1.0, %v9197_v61 }
 0xec8   :  { %9198 = vrcp.f32 %v1848_v60 }
 0xec9   :  { %9200 = vrcp.f32 %v1872_v62 }
 0xed2   :  { %v9199_v63 = vpop.eup %9198 }
 0xed3   :  { %v9201_v2 = vpop.eup %9200  ;;  %v1852_v7 = vmul.f32 %v9199_v63, %v9852_v11 }
 0xed4   :  { %v1876_v14 = vmul.f32 %v9201_v2, %v9856_v31 }
 0xf2d   :  { %v1855_v0 = vpop.permute.xlu0 %1854 }
 0xf2e   :  { %v1857_v1 = vmul.f32 %v9199_v63, %v1855_v0 }
 0xf30   :  { %1859 = vrot.lane.b32.xlu0 %v1857_v1, %s9419_s18 }
 0xf37   :  { %v1879_v3 = vpop.permute.xlu1 %1878 }
 0xf38   :  { %v1881_v6 = vmul.f32 %v9201_v2, %v1879_v3 }
 0xf3a   :  { %1883 = vrot.lane.b32.xlu1 %v1881_v6, %s9419_s18 }
 0xfa2   :  { %v1860_v9 = vpop.permute.xlu0 %1859 }
 0xfa3   :  { %v9890_v10 = vadd.f32 %v1860_v9, %v1852_v7 }
 0xfa5   :  { %9202 = vtanh.f32 %v9890_v10 }
 0xfac   :  { %v1884_v15 = vpop.permute.xlu1 %1883 }
 0xfad   :  { %v9894_v16 = vadd.f32 %v1884_v15, %v1876_v14 }
 0xfaf   :  { %v9203_v18 = vpop.eup %9202  ;;  %9204 = vtanh.f32 %v9894_v16 }
 0xfb0   :  { %1865 = vrot.lane.b32.xlu0 %v9203_v18, %s9418_s6 }
 0xfb9   :  { %v9205_v19 = vpop.eup %9204 }
 0xfba   :  { %1889 = vrot.lane.b32.xlu1 %v9205_v19, %s9418_s6 }
0x1022   :  { %v1866_v20 = vpop.permute.xlu0 %1865 }
0x1023   :  { %v1868_v21 = vmul.f32 %v9199_v63, %v1866_v20 }
0x1025   :  { %v1900_v22 = vrot.slane %v1868_v21, %v9554_v23 }
0x1027   :  { %1901 = vrot.lane.b32.xlu0 %v1900_v22, %s9419_s18 }
0x102c   :  { %v1890_v24 = vpop.permute.xlu1 %1889 }
0x102d   :  { %v1892_v25 = vmul.f32 %v9201_v2, %v1890_v24 }
0x102f   :  { %v9902_v26 = vrot.slane %v1892_v25, %v9554_v23 }
0x1031   :  { %1992 = vrot.lane.b32.xlu1 %v9902_v26, %s9419_s18 }
0x1099   :  { %v9906_v27 = vpop.permute.xlu0 %1901 }
0x109a   :  { %7478 = vmatmul.mubr.msk.f32.vlgmr.msra.gmra.mrb[12].mxu1 %vm146_vm1, %v9906_v27 }
0x109b   :  { %8513 = vmatpush3.bf16.msra.mxu1 %v9577_v36  ;;  %7499 = vmatprep.mubr.msk.f32.mxu1 %vm9417_vm0, %v11496_v4 }
0x109c   :  { %8514 = vmatprep.subr.bf16.mxu1 %v11524_v12 }
0x109f   :  { %8516 = vmatpush3.bf16.msra.mxu1 %v9603_v48 }
0x10a0   :  { %8523 = vmatprep.subr.bf16.mxu1 %v11524_v12 }
0x10a3   :  { %v1993_v11 = vpop.permute.xlu1 %1992 }
0x10a4   :  { %7489 = vmatmul.mubr.msk.f32.vlgmr.msra.gmra.mrb[22].mxu0 %vm146_vm1, %v1993_v11 }
0x10a5   :  { %8519 = vmatpush3.bf16.msra.mxu0 %v9658_v5  ;;  %7510 = vmatprep.mubr.msk.f32.mxu0 %vm9417_vm0, %v11496_v4 }
0x10a6   :  { %8520 = vmatprep.subr.bf16.mxu0 %v11524_v12 }
0x10a9   :  { %8522 = vmatpush3.bf16.msra.mxu0 %v9669_v8 }
0x10aa   :  { %8529 = vmatprep.subr.bf16.mxu0 %v11524_v12 }
0x116d   :  { %v1986_v31 = vpop.f32.mrb[12].mxu1 }
0x116e   :  { %v1990_v32 = vadd.f32 %v1986_v31, %v1917_v29  ;;  %v7479_v33 = vpop.f32.mrb[13].mxu1 }
0x1170   :  { %9206 = vtanh.f32 %v1990_v32  ;;  %v6768_v49 = vmul.f32 -1.442695, %v1990_v32 }
0x1171   :  { %9208 = vtanh.f32 %v2362_v35 }
0x1177   :  { %v2062_v39 = vpop.f32.mrb[22].mxu0 }
0x1178   :  { %v2066_v40 = vadd.f32 %v2062_v39, %v1991_v38  ;;  %v7490_v43 = vpop.f32.mrb[23].mxu0 }
0x117a   :  { %v9207_v44 = vpop.eup %9206  ;;  %9210 = vtanh.f32 %v2066_v40  ;;  %v6769_v52 = vmul.f32 -1.442695, %v2066_v40 }
0x117b   :  { %2076 = vrot.lane.b32.xlu0 %v9207_v44, %s9418_s6  ;;  %v9209_v46 = vpop.eup %9208  ;;  %9212 = vtanh.f32 %v2365_v45 }
0x117c   :  { %9214 = vpow2.f32 %v6768_v49 }
0x117d   :  { %9216 = vpow2.f32 %v6774_v51 }
0x117e   :  { %9218 = vpow2.f32 %v6769_v52 }
0x117f   :  { %2375 = vrot.lane.b32.xlu0 %v9209_v46, %s9418_s6  ;;  %9220 = vpow2.f32 %v6775_v17 }
0x1184   :  { %v9211_v47 = vpop.eup %9210 }
0x1185   :  { %2100 = vrot.lane.b32.xlu1 %v9211_v47, %s9418_s6  ;;  %v9213_v34 = vpop.eup %9212 }
0x1186   :  { %v9215_v53 = vpop.eup %9214 }
0x1187   :  { %v2070_v54 = vadd.f32 1.0, %v9215_v53  ;;  %v9217_v55 = vpop.eup %9216 }
0x1188   :  { %v2369_v56 = vadd.f32 1.0, %v9217_v55  ;;  %v9219_v58 = vpop.eup %9218 }
0x1189   :  { %2399 = vrot.lane.b32.xlu1 %v9213_v34, %s9418_s6  ;;  %9222 = vrcp.f32 %v2070_v54  ;;  %v2094_v59 = vadd.f32 1.0, %v9219_v58  ;;  %v9221_v60 = vpop.eup %9220 }
0x118a   :  { %9224 = vrcp.f32 %v2369_v56  ;;  %v2393_v62 = vadd.f32 1.0, %v9221_v60 }
0x118b   :  { %9226 = vrcp.f32 %v2094_v59  ;;  %v2440_v59 = vld [vmem:[#allocation3 + $0x4] sm:$0x3] }
0x118c   :  { %9228 = vrcp.f32 %v2393_v62 }
0x1193   :  { %v9223_v61 = vpop.eup %9222 }
0x1194   :  { %v9225_v1 = vpop.eup %9224  ;;  %v2074_v19 = vmul.f32 %v9223_v61, %v9890_v10 }
0x1195   :  { %v9227_v6 = vpop.eup %9226  ;;  %v2373_v22 = vmul.f32 0.0, %v9225_v1 }
0x1196   :  { %v9229_v14 = vpop.eup %9228  ;;  %v2098_v11 = vmul.f32 %v9227_v6, %v9894_v16 }
0x1197   :  { %v2397_v10 = vmul.f32 0.0, %v9229_v14 }
0x11ed   :  { %v2077_v63 = vpop.permute.xlu0 %2076 }
0x11ee   :  { %v2079_v0 = vmul.f32 %v9223_v61, %v2077_v63 }
0x11f0   :  { %2081 = vrot.lane.b32.xlu0 %v2079_v0, %s9419_s18 }
0x11f1   :  { %v2376_v2 = vpop.permute.xlu0 %2375 }
0x11f2   :  { %v2378_v3 = vmul.f32 %v9225_v1, %v2376_v2 }
0x11f4   :  { %2380 = vrot.lane.b32.xlu0 %v2378_v3, %s9419_s18 }
0x11f7   :  { %v2101_v7 = vpop.permute.xlu1 %2100 }
0x11f8   :  { %v2103_v9 = vmul.f32 %v9227_v6, %v2101_v7 }
0x11fa   :  { %2105 = vrot.lane.b32.xlu1 %v2103_v9, %s9419_s18 }
0x11fb   :  { %v2400_v15 = vpop.permute.xlu1 %2399 }
0x11fc   :  { %v2402_v18 = vmul.f32 %v9229_v14, %v2400_v15 }
0x11fe   :  { %2404 = vrot.lane.b32.xlu1 %v2402_v18, %s9419_s18 }
0x1262   :  { %v2082_v20 = vpop.permute.xlu0 %2081 }
0x1263   :  { %v9934_v21 = vadd.f32 %v2082_v20, %v2074_v19 }
0x1265   :  { %9230 = vtanh.f32 %v9934_v21 }
0x1266   :  { %v2381_v24 = vpop.permute.xlu0 %2380 }
0x1267   :  { %v9937_v25 = vadd.f32 %v2381_v24, %v2373_v22 }
0x1269   :  { %9232 = vtanh.f32 %v9937_v25 }
0x126c   :  { %v2106_v28 = vpop.permute.xlu1 %2105 }
0x126d   :  { %v9941_v29 = vadd.f32 %v2106_v28, %v2098_v11 }
0x126f   :  { %v9231_v31 = vpop.eup %9230  ;;  %9234 = vtanh.f32 %v9941_v29 }
0x1270   :  { %2087 = vrot.lane.b32.xlu0 %v9231_v31, %s9418_s6  ;;  %v2405_v32 = vpop.permute.xlu1 %2404 }
0x1271   :  { %v9945_v33 = vadd.f32 %v2405_v32, %v2397_v10 }
0x1273   :  { %v9233_v35 = vpop.eup %9232  ;;  %9236 = vtanh.f32 %v9945_v33 }
0x1274   :  { %2386 = vrot.lane.b32.xlu0 %v9233_v35, %s9418_s6 }
0x1279   :  { %v9235_v37 = vpop.eup %9234 }
0x127a   :  { %2111 = vrot.lane.b32.xlu1 %v9235_v37, %s9418_s6 }
0x127d   :  { %v9237_v16 = vpop.eup %9236 }
0x127e   :  { %2410 = vrot.lane.b32.xlu1 %v9237_v16, %s9418_s6 }
0x12e2   :  { %v2088_v38 = vpop.permute.xlu0 %2087 }
0x12e3   :  { %v2090_v39 = vmul.f32 %v9223_v61, %v2088_v38 }
0x12e5   :  { %v2122_v40 = vrot.slane %v2090_v39, %v9554_v23 }
0x12e6   :  { %v2387_v43 = vpop.permute.xlu0 %2386 }
0x12e7   :  { %v2389_v44 = vmul.f32 %v9225_v1, %v2387_v43  ;;  %2123 = vrot.lane.b32.xlu0 %v2122_v40, %s9419_s18  ;;  %v2515_v1 = vld [vmem:[#allocation3 + $0x12] sm:$0x3] }
0x12e9   :  { %v2421_v45 = vrot.slane %v2389_v44, %v9554_v23 }
0x12eb   :  { %2422 = vrot.lane.b32.xlu0 %v2421_v45, %s9419_s18 }
0x12ec   :  { %v2112_v46 = vpop.permute.xlu1 %2111 }
0x12ed   :  { %v2114_v47 = vmul.f32 %v9227_v6, %v2112_v46 }
0x12ef   :  { %v9956_v34 = vrot.slane %v2114_v47, %v9554_v23 }
0x12f0   :  { %v2411_v49 = vpop.permute.xlu1 %2410 }
0x12f1   :  { %v2413_v51 = vmul.f32 %v9229_v14, %v2411_v49  ;;  %2214 = vrot.lane.b32.xlu1 %v9956_v34, %s9419_s18 }
0x12f3   :  { %v9961_v52 = vrot.slane %v2413_v51, %v9554_v23 }
0x12f5   :  { %2516 = vrot.lane.b32.xlu1 %v9961_v52, %s9419_s18 }
0x1359   :  { %v9965_v53 = vpop.permute.xlu0 %2123 }
0x135a   :  { %7500 = vmatmul.mubr.msk.f32.vlgmr.msra.gmra.mrb[14].mxu1 %vm146_vm1, %v9965_v53 }
0x135b   :  { %8525 = vmatpush3.bf16.msra.mxu1 %v9577_v36  ;;  %7521 = vmatprep.mubr.msk.f32.mxu1 %vm9417_vm0, %v11496_v4 }
0x135c   :  { %8526 = vmatprep.subr.bf16.mxu1 %v11524_v12 }
0x135d   :  { %v2423_v17 = vpop.permute.xlu0 %2422 }
0x135e   :  { %2425 = vst.msk [vmem:[#allocation6] sm:$0x3] %vm779_vm2, %v2423_v17 }
0x135f   :  { %8528 = vmatpush3.bf16.msra.mxu1 %v9603_v48 }
0x1360   :  { %8535 = vmatprep.subr.bf16.mxu1 %v11524_v12 }
0x1362   :  { %7522 = vmatmul.mubr.msk.f32.vlgmr.msra.gmra.mrb[16].mxu1 %vm146_vm1, %v2423_v17 }
0x1363   :  { %v2215_v54 = vpop.permute.xlu1 %2214  ;;  %8537 = vmatpush3.bf16.msra.mxu1 %v9577_v36  ;;  %7543 = vmatprep.mubr.msk.f32.mxu1 %vm9417_vm0, %v11496_v4 }
0x1364   :  { %7511 = vmatmul.mubr.msk.f32.vlgmr.msra.gmra.mrb[24].mxu0 %vm146_vm1, %v2215_v54  ;;  %8538 = vmatprep.subr.bf16.mxu1 %v11524_v12  ;;  %v2666_v54 = vld [vmem:[#allocation3 + $0x8] sm:$0x3] }
0x1365   :  { %8531 = vmatpush3.bf16.msra.mxu0 %v9658_v5  ;;  %7532 = vmatprep.mubr.msk.f32.mxu0 %vm9417_vm0, %v11496_v4 }
0x1366   :  { %8532 = vmatprep.subr.bf16.mxu0 %v11524_v12 }
0x1367   :  { %8540 = vmatpush3.bf16.msra.mxu1 %v9603_v48  ;;  %v2517_v55 = vpop.permute.xlu1 %2516 }
0x1368   :  { %8547 = vmatprep.subr.bf16.mxu1 %v11524_v12 }
0x1369   :  { %8534 = vmatpush3.bf16.msra.mxu0 %v9669_v8 }
0x136a   :  { %8541 = vmatprep.subr.bf16.mxu0 %v11524_v12 }
0x136c   :  { %7533 = vmatmul.mubr.msk.f32.vlgmr.msra.gmra.mrb[26].mxu0 %vm146_vm1, %v2517_v55 }
0x136d   :  { %8543 = vmatpush3.bf16.msra.mxu0 %v9658_v5  ;;  %7554 = vmatprep.mubr.msk.f32.mxu0 %vm9417_vm0, %v11496_v4 }
0x136e   :  { %8544 = vmatprep.subr.bf16.mxu0 %v11524_v12 }
0x1371   :  { %8546 = vmatpush3.bf16.msra.mxu0 %v9669_v8 }
0x1372   :  { %8553 = vmatprep.subr.bf16.mxu0 %v11524_v12 }
0x142d   :  { %v9997_v56 = vpop.f32.mrb[14].mxu1 }
0x142e   :  { %v7501_v58 = vpop.f32.mrb[15].mxu1 }
0x1435   :  { %v2509_v60 = vpop.f32.mrb[16].mxu1 }
0x1436   :  { %v2513_v61 = vadd.f32 %v2509_v60, %v2440_v59  ;;  %v7523_v62 = vpop.f32.mrb[17].mxu1  ;;  %v2741_v60 = vld [vmem:[#allocation3 + $0xe] sm:$0x3] }
0x1437   :  { %v9999_v63 = vpop.f32.mrb[24].mxu0 }
0x1438   :  { %9238 = vtanh.f32 %v2513_v61  ;;  %v7512_v0 = vpop.f32.mrb[25].mxu0  ;;  %v6778_v14 = vmul.f32 -1.442695, %v2513_v61 }
0x143f   :  { %v2586_v2 = vpop.f32.mrb[26].mxu0 }
0x1440   :  { %v2590_v3 = vadd.f32 %v2586_v2, %v2515_v1  ;;  %v7534_v6 = vpop.f32.mrb[27].mxu0 }
0x1442   :  { %v9239_v7 = vpop.eup %9238  ;;  %9240 = vtanh.f32 %v2590_v3  ;;  %v6779_v15 = vmul.f32 -1.442695, %v2590_v3 }
0x1443   :  { %2600 = vrot.lane.b32.xlu0 %v9239_v7, %s9418_s6  ;;  %9242 = vpow2.f32 %v6778_v14 }
0x1444   :  { %9244 = vpow2.f32 %v6779_v15 }
0x144c   :  { %v9241_v9 = vpop.eup %9240 }
0x144d   :  { %2624 = vrot.lane.b32.xlu1 %v9241_v9, %s9418_s6  ;;  %v9243_v18 = vpop.eup %9242 }
0x144e   :  { %v2594_v19 = vadd.f32 1.0, %v9243_v18  ;;  %v9245_v20 = vpop.eup %9244 }
0x144f   :  { %v2618_v22 = vadd.f32 1.0, %v9245_v20 }
0x1450   :  { %9246 = vrcp.f32 %v2594_v19 }
0x1451   :  { %9248 = vrcp.f32 %v2618_v22 }
0x145a   :  { %v9247_v24 = vpop.eup %9246 }
0x145b   :  { %v9249_v31 = vpop.eup %9248  ;;  %v2598_v35 = vmul.f32 %v9247_v24, %v9937_v25 }
0x145c   :  { %v2622_v38 = vmul.f32 %v9249_v31, %v9945_v33 }
0x14b5   :  { %v2601_v11 = vpop.permute.xlu0 %2600 }
0x14b6   :  { %v2603_v28 = vmul.f32 %v9247_v24, %v2601_v11 }
0x14b8   :  { %2605 = vrot.lane.b32.xlu0 %v2603_v28, %s9419_s18 }
0x14bf   :  { %v2625_v10 = vpop.permute.xlu1 %2624 }
0x14c0   :  { %v2627_v32 = vmul.f32 %v9249_v31, %v2625_v10 }
0x14c2   :  { %2629 = vrot.lane.b32.xlu1 %v2627_v32, %s9419_s18 }
0x152a   :  { %v2606_v37 = vpop.permute.xlu0 %2605 }
0x152b   :  { %v10006_v16 = vadd.f32 %v2606_v37, %v2598_v35 }
0x152d   :  { %9250 = vtanh.f32 %v10006_v16 }
0x1534   :  { %v2630_v39 = vpop.permute.xlu1 %2629 }
0x1535   :  { %v10010_v40 = vadd.f32 %v2630_v39, %v2622_v38 }
0x1537   :  { %v9251_v43 = vpop.eup %9250  ;;  %9252 = vtanh.f32 %v10010_v40 }
0x1538   :  { %2611 = vrot.lane.b32.xlu0 %v9251_v43, %s9418_s6 }
0x1541   :  { %v9253_v44 = vpop.eup %9252 }
0x1542   :  { %2635 = vrot.lane.b32.xlu1 %v9253_v44, %s9418_s6 }
0x15aa   :  { %v2612_v45 = vpop.permute.xlu0 %2611 }
0x15ab   :  { %v2614_v25 = vmul.f32 %v9247_v24, %v2612_v45 }
0x15ad   :  { %v2646_v46 = vrot.slane %v2614_v25, %v9554_v23 }
0x15af   :  { %2647 = vrot.lane.b32.xlu0 %v2646_v46, %s9419_s18 }
0x15b4   :  { %v2636_v47 = vpop.permute.xlu1 %2635 }
0x15b5   :  { %v2638_v49 = vmul.f32 %v9249_v31, %v2636_v47 }
0x15b7   :  { %v10018_v33 = vrot.slane %v2638_v49, %v9554_v23  ;;  %v2891_v49 = vld [vmem:[#allocation3 + $0xc] sm:$0x3] }
0x15b9   :  { %2742 = vrot.lane.b32.xlu1 %v10018_v33, %s9419_s18 }
0x1621   :  { %v2648_v51 = vpop.permute.xlu0 %2647 }
0x1622   :  { %2651 = vst.msk [vmem:[#allocation6 + $0x2] sm:$0x3] %vm779_vm2, %v2648_v51  ;;  %7544 = vmatmul.mubr.msk.f32.vlgmr.msra.gmra.mrb[18].mxu1 %vm146_vm1, %v2648_v51 }
0x1623   :  { %8549 = vmatpush3.bf16.msra.mxu1 %v9577_v36  ;;  %7565 = vmatprep.mubr.msk.f32.mxu1 %vm9417_vm0, %v11496_v4 }
0x1624   :  { %8550 = vmatprep.subr.bf16.mxu1 %v11524_v12 }
0x1627   :  { %8552 = vmatpush3.bf16.msra.mxu1 %v9603_v48 }
0x1628   :  { %8559 = vmatprep.subr.bf16.mxu1 %v11524_v12 }
0x162b   :  { %v2743_v17 = vpop.permute.xlu1 %2742 }
0x162c   :  { %7555 = vmatmul.mubr.msk.f32.vlgmr.msra.gmra.mrb[28].mxu0 %vm146_vm1, %v2743_v17 }
0x162d   :  { %8555 = vmatpush3.bf16.msra.mxu0 %v9658_v5  ;;  %7576 = vmatprep.mubr.msk.f32.mxu0 %vm9417_vm0, %v11496_v4 }
0x162e   :  { %8556 = vmatprep.subr.bf16.mxu0 %v11524_v12 }
0x1631   :  { %8558 = vmatpush3.bf16.msra.mxu0 %v9669_v8 }
0x1632   :  { %8565 = vmatprep.subr.bf16.mxu0 %v11524_v12 }
0x16f5   :  { %v2735_v55 = vpop.f32.mrb[18].mxu1 }
0x16f6   :  { %v2739_v58 = vadd.f32 %v2735_v55, %v2666_v54  ;;  %v7545_v59 = vpop.f32.mrb[19].mxu1  ;;  %v2965_v55 = vld [vmem:[#allocation3 + $0xa] sm:$0x3] }
0x16f8   :  { %9254 = vtanh.f32 %v2739_v58  ;;  %v6782_v3 = vmul.f32 -1.442695, %v2739_v58 }
0x16ff   :  { %v2812_v61 = vpop.f32.mrb[28].mxu0 }
0x1700   :  { %v2816_v62 = vadd.f32 %v2812_v61, %v2741_v60  ;;  %v7556_v0 = vpop.f32.mrb[29].mxu0 }
0x1702   :  { %v9255_v1 = vpop.eup %9254  ;;  %9256 = vtanh.f32 %v2816_v62  ;;  %v6783_v6 = vmul.f32 -1.442695, %v2816_v62 }
0x1703   :  { %2826 = vrot.lane.b32.xlu0 %v9255_v1, %s9418_s6  ;;  %9258 = vpow2.f32 %v6782_v3 }
0x1704   :  { %9260 = vpow2.f32 %v6783_v6 }
0x170c   :  { %v9257_v2 = vpop.eup %9256 }
0x170d   :  { %2850 = vrot.lane.b32.xlu1 %v9257_v2, %s9418_s6  ;;  %v9259_v7 = vpop.eup %9258 }
0x170e   :  { %v2820_v9 = vadd.f32 1.0, %v9259_v7  ;;  %v9261_v14 = vpop.eup %9260 }
0x170f   :  { %v2844_v15 = vadd.f32 1.0, %v9261_v14 }
0x1710   :  { %9262 = vrcp.f32 %v2820_v9 }
0x1711   :  { %9264 = vrcp.f32 %v2844_v15 }
0x171a   :  { %v9263_v18 = vpop.eup %9262 }
0x171b   :  { %v9265_v22 = vpop.eup %9264  ;;  %v2824_v28 = vmul.f32 %v9263_v18, %v10006_v16 }
0x171c   :  { %v2848_v32 = vmul.f32 %v9265_v22, %v10010_v40 }
0x1775   :  { %v2827_v19 = vpop.permute.xlu0 %2826 }
0x1776   :  { %v2829_v20 = vmul.f32 %v9263_v18, %v2827_v19 }
0x1778   :  { %2831 = vrot.lane.b32.xlu0 %v2829_v20, %s9419_s18 }
0x177f   :  { %v2851_v24 = vpop.permute.xlu1 %2850 }
0x1780   :  { %v2853_v11 = vmul.f32 %v9265_v22, %v2851_v24 }
0x1782   :  { %2855 = vrot.lane.b32.xlu1 %v2853_v11, %s9419_s18 }
0x17ea   :  { %v2832_v31 = vpop.permute.xlu0 %2831 }
0x17eb   :  { %v10042_v10 = vadd.f32 %v2832_v31, %v2824_v28 }
0x17ed   :  { %9266 = vtanh.f32 %v10042_v10 }
0x17f4   :  { %v2856_v35 = vpop.permute.xlu1 %2855 }
0x17f5   :  { %v10046_v37 = vadd.f32 %v2856_v35, %v2848_v32 }
0x17f7   :  { %v9267_v38 = vpop.eup %9266  ;;  %9268 = vtanh.f32 %v10046_v37 }
0x17f8   :  { %2837 = vrot.lane.b32.xlu0 %v9267_v38, %s9418_s6 }
0x1801   :  { %v9269_v39 = vpop.eup %9268 }
0x1802   :  { %2861 = vrot.lane.b32.xlu1 %v9269_v39, %s9418_s6 }
0x186a   :  { %v2838_v43 = vpop.permute.xlu0 %2837 }
0x186b   :  { %v2840_v16 = vmul.f32 %v9263_v18, %v2838_v43 }
0x186d   :  { %v2872_v44 = vrot.slane %v2840_v16, %v9554_v23 }
0x186f   :  { %2873 = vrot.lane.b32.xlu0 %v2872_v44, %s9419_s18 }
0x1874   :  { %v2862_v45 = vpop.permute.xlu1 %2861 }
0x1875   :  { %v2864_v25 = vmul.f32 %v9265_v22, %v2862_v45 }
0x1877   :  { %v10054_v40 = vrot.slane %v2864_v25, %v9554_v23 }
0x1879   :  { %2966 = vrot.lane.b32.xlu1 %v10054_v40, %s9419_s18 }
0x18e1   :  { %v2874_v46 = vpop.permute.xlu0 %2873 }
0x18e2   :  { %2877 = vst.msk [vmem:[#allocation6 + $0x4] sm:$0x3] %vm779_vm2, %v2874_v46  ;;  %7566 = vmatmul.mubr.msk.f32.vlgmr.msra.gmra.mrb[20].mxu1 %vm146_vm1, %v2874_v46  ;;  %v3113_v46 = vld [vmem:[#allocation3 + $0x10] sm:$0x3] }
0x18e3   :  { %8561 = vmatpush3.bf16.msra.mxu1 %v9577_v36  ;;  %7587 = vmatprep.mubr.msk.f32.mxu1 %vm9417_vm0, %v11496_v4 }
0x18e4   :  { %8562 = vmatprep.subr.bf16.mxu1 %v11524_v12 }
0x18e7   :  { %8564 = vmatpush3.bf16.msra.mxu1 %v9603_v48 }
0x18e8   :  { %8571 = vmatprep.subr.bf16.mxu1 %v11524_v12 }
0x18eb   :  { %v2967_v47 = vpop.permute.xlu1 %2966 }
0x18ec   :  { %7577 = vmatmul.mubr.msk.f32.vlgmr.msra.gmra.mrb[30].mxu0 %vm146_vm1, %v2967_v47 }
0x18ed   :  { %8567 = vmatpush3.bf16.msra.mxu0 %v9658_v5  ;;  %7598 = vmatprep.mubr.msk.f32.mxu0 %vm9417_vm0, %v11496_v4 }
0x18ee   :  { %8568 = vmatprep.subr.bf16.mxu0 %v11524_v12 }
0x18f1   :  { %8570 = vmatpush3.bf16.msra.mxu0 %v9669_v8 }
0x18f2   :  { %8577 = vmatprep.subr.bf16.mxu0 %v11524_v12 }
0x19b5   :  { %v2960_v51 = vpop.f32.mrb[20].mxu1 }
0x19b6   :  { %v2964_v17 = vadd.f32 %v2960_v51, %v2891_v49  ;;  %v7567_v54 = vpop.f32.mrb[21].mxu1 }
0x19b8   :  { %9270 = vtanh.f32 %v2964_v17  ;;  %v6786_v0 = vmul.f32 -1.442695, %v2964_v17  ;;  %v3187_v17 = vld [vmem:[#allocation3 + $0x6] sm:$0x3] }
0x19bf   :  { %v3036_v58 = vpop.f32.mrb[30].mxu0 }
0x19c0   :  { %v3040_v59 = vadd.f32 %v3036_v58, %v2965_v55  ;;  %v7578_v60 = vpop.f32.mrb[31].mxu0 }
0x19c2   :  { %v9271_v61 = vpop.eup %9270  ;;  %9272 = vtanh.f32 %v3040_v59  ;;  %v6787_v1 = vmul.f32 -1.442695, %v3040_v59 }
0x19c3   :  { %3050 = vrot.lane.b32.xlu0 %v9271_v61, %s9418_s6  ;;  %9274 = vpow2.f32 %v6786_v0 }
0x19c4   :  { %9276 = vpow2.f32 %v6787_v1 }
0x19cc   :  { %v9273_v62 = vpop.eup %9272 }
0x19cd   :  { %3074 = vrot.lane.b32.xlu1 %v9273_v62, %s9418_s6  ;;  %v9275_v2 = vpop.eup %9274 }
0x19ce   :  { %v3044_v3 = vadd.f32 1.0, %v9275_v2  ;;  %v9277_v6 = vpop.eup %9276 }
0x19cf   :  { %v3068_v7 = vadd.f32 1.0, %v9277_v6 }
0x19d0   :  { %9278 = vrcp.f32 %v3044_v3 }
0x19d1   :  { %9280 = vrcp.f32 %v3068_v7 }
0x19da   :  { %v9279_v9 = vpop.eup %9278 }
0x19db   :  { %v9281_v18 = vpop.eup %9280  ;;  %v3048_v22 = vmul.f32 %v9279_v9, %v10042_v10 }
0x19dc   :  { %v3072_v28 = vmul.f32 %v9281_v18, %v10046_v37 }
0x1a35   :  { %v3051_v14 = vpop.permute.xlu0 %3050 }
0x1a36   :  { %v3053_v15 = vmul.f32 %v9279_v9, %v3051_v14 }
0x1a38   :  { %3055 = vrot.lane.b32.xlu0 %v3053_v15, %s9419_s18 }
0x1a3f   :  { %v3075_v19 = vpop.permute.xlu1 %3074 }
0x1a40   :  { %v3077_v20 = vmul.f32 %v9281_v18, %v3075_v19 }
0x1a42   :  { %3079 = vrot.lane.b32.xlu1 %v3077_v20, %s9419_s18 }
0x1aaa   :  { %v3056_v24 = vpop.permute.xlu0 %3055 }
0x1aab   :  { %v10078_v11 = vadd.f32 %v3056_v24, %v3048_v22 }
0x1aad   :  { %9282 = vtanh.f32 %v10078_v11 }
0x1ab4   :  { %v3080_v31 = vpop.permute.xlu1 %3079 }
0x1ab5   :  { %v10082_v32 = vadd.f32 %v3080_v31, %v3072_v28 }
0x1ab7   :  { %v9283_v35 = vpop.eup %9282  ;;  %9284 = vtanh.f32 %v10082_v32 }
0x1ab8   :  { %3061 = vrot.lane.b32.xlu0 %v9283_v35, %s9418_s6 }
0x1ac1   :  { %v9285_v38 = vpop.eup %9284 }
0x1ac2   :  { %3085 = vrot.lane.b32.xlu1 %v9285_v38, %s9418_s6 }
0x1b2a   :  { %v3062_v39 = vpop.permute.xlu0 %3061 }
0x1b2b   :  { %v3064_v10 = vmul.f32 %v9279_v9, %v3062_v39 }
0x1b2d   :  { %v3096_v43 = vrot.slane %v3064_v10, %v9554_v23 }
0x1b2f   :  { %3097 = vrot.lane.b32.xlu0 %v3096_v43, %s9419_s18 }
0x1b34   :  { %v3086_v16 = vpop.permute.xlu1 %3085 }
0x1b35   :  { %v3088_v44 = vmul.f32 %v9281_v18, %v3086_v16 }
0x1b37   :  { %v10090_v37 = vrot.slane %v3088_v44, %v9554_v23 }
0x1b39   :  { %3188 = vrot.lane.b32.xlu1 %v10090_v37, %s9419_s18 }
0x1ba1   :  { %v10094_v45 = vpop.permute.xlu0 %3097 }
0x1ba2   :  { %7588 = vmatmul.mubr.msk.f32.vlgmr.msra.gmra.mrb[22].mxu1 %vm146_vm1, %v10094_v45 }
0x1ba3   :  { %8573 = vmatpush3.bf16.msra.mxu1 %v9577_v36  ;;  %7609 = vmatprep.mubr.msk.f32.mxu1 %vm9417_vm0, %v11496_v4 }
0x1ba4   :  { %8574 = vmatprep.subr.bf16.mxu1 %v11524_v12 }
0x1ba7   :  { %8576 = vmatpush3.bf16.msra.mxu1 %v9603_v48 }
0x1ba8   :  { %8583 = vmatprep.subr.bf16.mxu1 %v11524_v12 }
0x1bab   :  { %v3189_v25 = vpop.permute.xlu1 %3188 }
0x1bac   :  { %7599 = vmatmul.mubr.msk.f32.vlgmr.msra.gmra.mrb[32].mxu0 %vm146_vm1, %v3189_v25 }
0x1bad   :  { %8579 = vmatpush3.bf16.msra.mxu0 %v9658_v5  ;;  %7620 = vmatprep.mubr.msk.f32.mxu0 %vm9417_vm0, %v11496_v4 }
0x1bae   :  { %8580 = vmatprep.subr.bf16.mxu0 %v11524_v12 }
0x1bb1   :  { %8582 = vmatpush3.bf16.msra.mxu0 %v9669_v8 }
0x1bb2   :  { %8589 = vmatprep.subr.bf16.mxu0 %v11524_v12 }
0x1c75   :  { %v3182_v47 = vpop.f32.mrb[22].mxu1 }
0x1c76   :  { %v3186_v49 = vadd.f32 %v3182_v47, %v3113_v46  ;;  %v7589_v51 = vpop.f32.mrb[23].mxu1  ;;  %v3335_v46 = vld [vmem:[#allocation3 + $0x14] sm:$0x3] }
0x1c78   :  { %9286 = vtanh.f32 %v3186_v49  ;;  %v6790_v61 = vmul.f32 -1.442695, %v3186_v49 }
0x1c7f   :  { %v3258_v54 = vpop.f32.mrb[32].mxu0 }
0x1c80   :  { %v3262_v55 = vadd.f32 %v3258_v54, %v3187_v17  ;;  %v7600_v58 = vpop.f32.mrb[33].mxu0  ;;  %v3409_v17 = vld [vmem:[#allocation3 + $0x2] sm:$0x3] }
0x1c82   :  { %v9287_v59 = vpop.eup %9286  ;;  %9288 = vtanh.f32 %v3262_v55  ;;  %v6791_v62 = vmul.f32 -1.442695, %v3262_v55 }
0x1c83   :  { %3272 = vrot.lane.b32.xlu0 %v9287_v59, %s9418_s6  ;;  %9290 = vpow2.f32 %v6790_v61 }
0x1c84   :  { %9292 = vpow2.f32 %v6791_v62 }
0x1c8c   :  { %v9289_v60 = vpop.eup %9288 }
0x1c8d   :  { %3296 = vrot.lane.b32.xlu1 %v9289_v60, %s9418_s6  ;;  %v9291_v0 = vpop.eup %9290 }
0x1c8e   :  { %v3266_v1 = vadd.f32 1.0, %v9291_v0  ;;  %v9293_v2 = vpop.eup %9292 }
0x1c8f   :  { %v3290_v3 = vadd.f32 1.0, %v9293_v2 }
0x1c90   :  { %9294 = vrcp.f32 %v3266_v1 }
0x1c91   :  { %9296 = vrcp.f32 %v3290_v3 }
0x1c9a   :  { %v9295_v6 = vpop.eup %9294 }
0x1c9b   :  { %v9297_v14 = vpop.eup %9296  ;;  %v3270_v19 = vmul.f32 %v9295_v6, %v10078_v11 }
0x1c9c   :  { %v3294_v24 = vmul.f32 %v9297_v14, %v10082_v32 }
0x1cf5   :  { %v3273_v7 = vpop.permute.xlu0 %3272 }
0x1cf6   :  { %v3275_v9 = vmul.f32 %v9295_v6, %v3273_v7 }
0x1cf8   :  { %3277 = vrot.lane.b32.xlu0 %v3275_v9, %s9419_s18 }
0x1cff   :  { %v3297_v15 = vpop.permute.xlu1 %3296 }
0x1d00   :  { %v3299_v18 = vmul.f32 %v9297_v14, %v3297_v15 }
0x1d02   :  { %3301 = vrot.lane.b32.xlu1 %v3299_v18, %s9419_s18 }
0x1d6a   :  { %v3278_v20 = vpop.permute.xlu0 %3277 }
0x1d6b   :  { %v10116_v22 = vadd.f32 %v3278_v20, %v3270_v19 }
0x1d6d   :  { %9298 = vtanh.f32 %v10116_v22 }
0x1d74   :  { %v3302_v28 = vpop.permute.xlu1 %3301 }
0x1d75   :  { %v10120_v31 = vadd.f32 %v3302_v28, %v3294_v24 }
0x1d77   :  { %v9299_v35 = vpop.eup %9298  ;;  %9300 = vtanh.f32 %v10120_v31 }
0x1d78   :  { %3283 = vrot.lane.b32.xlu0 %v9299_v35, %s9418_s6 }
0x1d81   :  { %v9301_v38 = vpop.eup %9300 }
0x1d82   :  { %3307 = vrot.lane.b32.xlu1 %v9301_v38, %s9418_s6 }
0x1dea   :  { %v3284_v39 = vpop.permute.xlu0 %3283 }
0x1deb   :  { %v3286_v11 = vmul.f32 %v9295_v6, %v3284_v39 }
0x1ded   :  { %v3318_v10 = vrot.slane %v3286_v11, %v9554_v23 }
0x1def   :  { %3319 = vrot.lane.b32.xlu0 %v3318_v10, %s9419_s18 }
0x1df4   :  { %v3308_v43 = vpop.permute.xlu1 %3307 }
0x1df5   :  { %v3310_v16 = vmul.f32 %v9297_v14, %v3308_v43 }
0x1df7   :  { %v10128_v32 = vrot.slane %v3310_v16, %v9554_v23 }
0x1df9   :  { %3410 = vrot.lane.b32.xlu1 %v10128_v32, %s9419_s18 }
0x1e61   :  { %v10132_v44 = vpop.permute.xlu0 %3319 }
0x1e62   :  { %7610 = vmatmul.mubr.msk.f32.vlgmr.msra.gmra.mrb[24].mxu1 %vm146_vm1, %v10132_v44 }
0x1e63   :  { %8585 = vmatpush3.bf16.msra.mxu1 %v9577_v36  ;;  %7631 = vmatprep.mubr.msk.f32.mxu1 %vm9417_vm0, %v11496_v4 }
0x1e64   :  { %8586 = vmatprep.subr.bf16.mxu1 %v11524_v12 }
0x1e67   :  { %8588 = vmatpush3.bf16.msra.mxu1 %v9603_v48 }
0x1e68   :  { %8595 = vmatprep.subr.bf16.mxu1 %v11524_v12 }
0x1e6b   :  { %v3411_v25 = vpop.permute.xlu1 %3410 }
0x1e6c   :  { %7621 = vmatmul.mubr.msk.f32.vlgmr.msra.gmra.mrb[34].mxu0 %vm146_vm1, %v3411_v25 }
0x1e6d   :  { %8591 = vmatpush3.bf16.msra.mxu0 %v9658_v5  ;;  %7642 = vmatprep.mubr.msk.f32.mxu0 %vm9417_vm0, %v11496_v4 }
0x1e6e   :  { %8592 = vmatprep.subr.bf16.mxu0 %v11524_v12 }
0x1e71   :  { %8594 = vmatpush3.bf16.msra.mxu0 %v9669_v8 }
0x1e72   :  { %8601 = vmatprep.subr.bf16.mxu0 %v11524_v12 }
0x1f35   :  { %v3404_v47 = vpop.f32.mrb[24].mxu1 }
0x1f36   :  { %v3408_v49 = vadd.f32 %v3404_v47, %v3335_v46  ;;  %v7611_v51 = vpop.f32.mrb[25].mxu1 }
0x1f38   :  { %9302 = vtanh.f32 %v3408_v49  ;;  %v6794_v61 = vmul.f32 -1.442695, %v3408_v49  ;;  %v3557_v49 = vld [vmem:[#allocation4] sm:$0x3] }
0x1f3f   :  { %v3480_v54 = vpop.f32.mrb[34].mxu0 }
0x1f40   :  { %v3484_v55 = vadd.f32 %v3480_v54, %v3409_v17  ;;  %v7622_v58 = vpop.f32.mrb[35].mxu0 }
0x1f42   :  { %v9303_v59 = vpop.eup %9302  ;;  %9304 = vtanh.f32 %v3484_v55  ;;  %v6795_v62 = vmul.f32 -1.442695, %v3484_v55  ;;  %v3632_v55 = vld [vmem:[#allocation4 + $0xe] sm:$0x3] }
0x1f43   :  { %3494 = vrot.lane.b32.xlu0 %v9303_v59, %s9418_s6  ;;  %9306 = vpow2.f32 %v6794_v61 }
0x1f44   :  { %9308 = vpow2.f32 %v6795_v62 }
0x1f4c   :  { %v9305_v60 = vpop.eup %9304 }
0x1f4d   :  { %3518 = vrot.lane.b32.xlu1 %v9305_v60, %s9418_s6  ;;  %v9307_v0 = vpop.eup %9306 }
0x1f4e   :  { %v3488_v1 = vadd.f32 1.0, %v9307_v0  ;;  %v9309_v2 = vpop.eup %9308 }
0x1f4f   :  { %v3512_v3 = vadd.f32 1.0, %v9309_v2 }
0x1f50   :  { %9310 = vrcp.f32 %v3488_v1 }
0x1f51   :  { %9312 = vrcp.f32 %v3512_v3 }
0x1f5a   :  { %v9311_v6 = vpop.eup %9310 }
0x1f5b   :  { %v9313_v14 = vpop.eup %9312  ;;  %v3492_v19 = vmul.f32 %v9311_v6, %v10116_v22 }
0x1f5c   :  { %v3516_v28 = vmul.f32 %v9313_v14, %v10120_v31 }
0x1fb5   :  { %v3495_v7 = vpop.permute.xlu0 %3494 }
0x1fb6   :  { %v3497_v9 = vmul.f32 %v9311_v6, %v3495_v7 }
0x1fb8   :  { %3499 = vrot.lane.b32.xlu0 %v3497_v9, %s9419_s18 }
0x1fbf   :  { %v3519_v15 = vpop.permute.xlu1 %3518 }
0x1fc0   :  { %v3521_v18 = vmul.f32 %v9313_v14, %v3519_v15 }
0x1fc2   :  { %3523 = vrot.lane.b32.xlu1 %v3521_v18, %s9419_s18 }
0x202a   :  { %v3500_v20 = vpop.permute.xlu0 %3499 }
0x202b   :  { %v10154_v24 = vadd.f32 %v3500_v20, %v3492_v19 }
0x202d   :  { %9314 = vtanh.f32 %v10154_v24 }
0x2034   :  { %v3524_v35 = vpop.permute.xlu1 %3523 }
0x2035   :  { %v10158_v38 = vadd.f32 %v3524_v35, %v3516_v28 }
0x2037   :  { %v9315_v39 = vpop.eup %9314  ;;  %9316 = vtanh.f32 %v10158_v38 }
0x2038   :  { %3505 = vrot.lane.b32.xlu0 %v9315_v39, %s9418_s6 }
0x2041   :  { %v9317_v11 = vpop.eup %9316 }
0x2042   :  { %3529 = vrot.lane.b32.xlu1 %v9317_v11, %s9418_s6 }
0x20aa   :  { %v3506_v10 = vpop.permute.xlu0 %3505 }
0x20ab   :  { %v3508_v22 = vmul.f32 %v9311_v6, %v3506_v10 }
0x20ad   :  { %v3540_v43 = vrot.slane %v3508_v22, %v9554_v23 }
0x20af   :  { %3541 = vrot.lane.b32.xlu0 %v3540_v43, %s9419_s18 }
0x20b4   :  { %v3530_v16 = vpop.permute.xlu1 %3529 }
0x20b5   :  { %v3532_v25 = vmul.f32 %v9313_v14, %v3530_v16 }
0x20b7   :  { %v10166_v31 = vrot.slane %v3532_v25, %v9554_v23 }
0x20b9   :  { %3633 = vrot.lane.b32.xlu1 %v10166_v31, %s9419_s18 }
0x2121   :  { %v10170_v46 = vpop.permute.xlu0 %3541 }
0x2122   :  { %7632 = vmatmul.mubr.msk.f32.vlgmr.msra.gmra.mrb[26].mxu1 %vm146_vm1, %v10170_v46 }
0x2123   :  { %8597 = vmatpush3.bf16.msra.mxu1 %v9577_v36  ;;  %7653 = vmatprep.mubr.msk.f32.mxu1 %vm9417_vm0, %v11496_v4 }
0x2124   :  { %8598 = vmatprep.subr.bf16.mxu1 %v11524_v12 }
0x2127   :  { %8600 = vmatpush3.bf16.msra.mxu1 %v9603_v48 }
0x2128   :  { %8607 = vmatprep.subr.bf16.mxu1 %v11524_v12 }
0x212b   :  { %v3634_v47 = vpop.permute.xlu1 %3633 }
0x212c   :  { %7643 = vmatmul.mubr.msk.f32.vlgmr.msra.gmra.mrb[36].mxu0 %vm146_vm1, %v3634_v47 }
0x212d   :  { %8603 = vmatpush3.bf16.msra.mxu0 %v9658_v5  ;;  %7664 = vmatprep.mubr.msk.f32.mxu0 %vm9417_vm0, %v11496_v4 }
0x212e   :  { %8604 = vmatprep.subr.bf16.mxu0 %v11524_v12 }
0x2131   :  { %8606 = vmatpush3.bf16.msra.mxu0 %v9669_v8 }
0x2132   :  { %8613 = vmatprep.subr.bf16.mxu0 %v11524_v12 }
0x21f5   :  { %v3626_v51 = vpop.f32.mrb[26].mxu1 }
0x21f6   :  { %v3630_v17 = vadd.f32 %v3626_v51, %v3557_v49  ;;  %v7633_v54 = vpop.f32.mrb[27].mxu1 }
0x21f8   :  { %9318 = vtanh.f32 %v3630_v17  ;;  %v6798_v0 = vmul.f32 -1.442695, %v3630_v17 }
0x21ff   :  { %v3703_v58 = vpop.f32.mrb[36].mxu0 }
0x2200   :  { %v3707_v59 = vadd.f32 %v3703_v58, %v3632_v55  ;;  %v7644_v60 = vpop.f32.mrb[37].mxu0  ;;  %v3782_v55 = vld [vmem:[#allocation4 + $0x4] sm:$0x3] }
0x2202   :  { %v9319_v61 = vpop.eup %9318  ;;  %9320 = vtanh.f32 %v3707_v59  ;;  %v6799_v1 = vmul.f32 -1.442695, %v3707_v59 }
0x2203   :  { %3717 = vrot.lane.b32.xlu0 %v9319_v61, %s9418_s6  ;;  %9322 = vpow2.f32 %v6798_v0  ;;  %v3857_v61 = vld [vmem:[#allocation4 + $0xa] sm:$0x3] }
0x2204   :  { %9324 = vpow2.f32 %v6799_v1 }
0x220c   :  { %v9321_v62 = vpop.eup %9320 }
0x220d   :  { %3741 = vrot.lane.b32.xlu1 %v9321_v62, %s9418_s6  ;;  %v9323_v2 = vpop.eup %9322 }
0x220e   :  { %v3711_v3 = vadd.f32 1.0, %v9323_v2  ;;  %v9325_v6 = vpop.eup %9324 }
0x220f   :  { %v3735_v7 = vadd.f32 1.0, %v9325_v6 }
0x2210   :  { %9326 = vrcp.f32 %v3711_v3 }
0x2211   :  { %9328 = vrcp.f32 %v3735_v7 }
0x221a   :  { %v9327_v9 = vpop.eup %9326 }
0x221b   :  { %v9329_v18 = vpop.eup %9328  ;;  %v3715_v28 = vmul.f32 %v9327_v9, %v10154_v24 }
0x221c   :  { %v3739_v11 = vmul.f32 %v9329_v18, %v10158_v38 }
0x2275   :  { %v3718_v14 = vpop.permute.xlu0 %3717 }
0x2276   :  { %v3720_v15 = vmul.f32 %v9327_v9, %v3718_v14 }
0x2278   :  { %3722 = vrot.lane.b32.xlu0 %v3720_v15, %s9419_s18 }
0x227f   :  { %v3742_v19 = vpop.permute.xlu1 %3741 }
0x2280   :  { %v3744_v20 = vmul.f32 %v9329_v18, %v3742_v19 }
0x2282   :  { %3746 = vrot.lane.b32.xlu1 %v3744_v20, %s9419_s18 }
0x22ea   :  { %v3723_v35 = vpop.permute.xlu0 %3722 }
0x22eb   :  { %v10192_v39 = vadd.f32 %v3723_v35, %v3715_v28 }
0x22ed   :  { %9330 = vtanh.f32 %v10192_v39 }
0x22f4   :  { %v3747_v10 = vpop.permute.xlu1 %3746 }
0x22f5   :  { %v10196_v22 = vadd.f32 %v3747_v10, %v3739_v11 }
0x22f7   :  { %v9331_v43 = vpop.eup %9330  ;;  %9332 = vtanh.f32 %v10196_v22 }
0x22f8   :  { %3728 = vrot.lane.b32.xlu0 %v9331_v43, %s9418_s6 }
0x2301   :  { %v9333_v16 = vpop.eup %9332 }
0x2302   :  { %3752 = vrot.lane.b32.xlu1 %v9333_v16, %s9418_s6 }
0x236a   :  { %v3729_v25 = vpop.permute.xlu0 %3728 }
0x236b   :  { %v3731_v24 = vmul.f32 %v9327_v9, %v3729_v25 }
0x236d   :  { %v3763_v47 = vrot.slane %v3731_v24, %v9554_v23 }
0x236f   :  { %3764 = vrot.lane.b32.xlu0 %v3763_v47, %s9419_s18 }
0x2374   :  { %v3753_v49 = vpop.permute.xlu1 %3752 }
0x2375   :  { %v3755_v51 = vmul.f32 %v9329_v18, %v3753_v49 }
0x2377   :  { %v10204_v38 = vrot.slane %v3755_v51, %v9554_v23 }
0x2379   :  { %3858 = vrot.lane.b32.xlu1 %v10204_v38, %s9419_s18 }
0x23e1   :  { %v3765_v17 = vpop.permute.xlu0 %3764 }
0x23e2   :  { %3767 = vst.msk [vmem:[#allocation7] sm:$0x3] %vm779_vm2, %v3765_v17  ;;  %7654 = vmatmul.mubr.msk.f32.vlgmr.msra.gmra.mrb[28].mxu1 %vm146_vm1, %v3765_v17 }
0x23e3   :  { %8609 = vmatpush3.bf16.msra.mxu1 %v9577_v36  ;;  %7675 = vmatprep.mubr.msk.f32.mxu1 %vm9417_vm0, %v11496_v4 }
0x23e4   :  { %8610 = vmatprep.subr.bf16.mxu1 %v11524_v12 }
0x23e7   :  { %8612 = vmatpush3.bf16.msra.mxu1 %v9603_v48 }
0x23e8   :  { %8619 = vmatprep.subr.bf16.mxu1 %v11524_v12 }
0x23eb   :  { %v3859_v54 = vpop.permute.xlu1 %3858 }
0x23ec   :  { %7665 = vmatmul.mubr.msk.f32.vlgmr.msra.gmra.mrb[38].mxu0 %vm146_vm1, %v3859_v54 }
0x23ed   :  { %8615 = vmatpush3.bf16.msra.mxu0 %v9658_v5  ;;  %7686 = vmatprep.mubr.msk.f32.mxu0 %vm9417_vm0, %v11496_v4 }
0x23ee   :  { %8616 = vmatprep.subr.bf16.mxu0 %v11524_v12 }
0x23f1   :  { %8618 = vmatpush3.bf16.msra.mxu0 %v9669_v8 }
0x23f2   :  { %8625 = vmatprep.subr.bf16.mxu0 %v11524_v12 }
0x24b5   :  { %v3851_v58 = vpop.f32.mrb[28].mxu1 }
0x24b6   :  { %v3855_v59 = vadd.f32 %v3851_v58, %v3782_v55  ;;  %v7655_v60 = vpop.f32.mrb[29].mxu1 }
0x24b8   :  { %9334 = vtanh.f32 %v3855_v59  ;;  %v6802_v6 = vmul.f32 -1.442695, %v3855_v59 }
0x24bf   :  { %v3928_v62 = vpop.f32.mrb[38].mxu0 }
0x24c0   :  { %v3932_v0 = vadd.f32 %v3928_v62, %v3857_v61  ;;  %v7666_v1 = vpop.f32.mrb[39].mxu0 }
0x24c2   :  { %v9335_v2 = vpop.eup %9334  ;;  %9336 = vtanh.f32 %v3932_v0  ;;  %v6803_v7 = vmul.f32 -1.442695, %v3932_v0 }
0x24c3   :  { %3942 = vrot.lane.b32.xlu0 %v9335_v2, %s9418_s6  ;;  %9338 = vpow2.f32 %v6802_v6  ;;  %v4081_v2 = vld [vmem:[#allocation4 + $0x6] sm:$0x3] }
0x24c4   :  { %9340 = vpow2.f32 %v6803_v7 }
0x24cc   :  { %v9337_v3 = vpop.eup %9336 }
0x24cd   :  { %3966 = vrot.lane.b32.xlu1 %v9337_v3, %s9418_s6  ;;  %v9339_v9 = vpop.eup %9338 }
0x24ce   :  { %v3936_v14 = vadd.f32 1.0, %v9339_v9  ;;  %v9341_v15 = vpop.eup %9340 }
0x24cf   :  { %v3960_v18 = vadd.f32 1.0, %v9341_v15 }
0x24d0   :  { %9342 = vrcp.f32 %v3936_v14 }
0x24d1   :  { %9344 = vrcp.f32 %v3960_v18 }
0x24da   :  { %v9343_v19 = vpop.eup %9342 }
0x24db   :  { %v9345_v35 = vpop.eup %9344  ;;  %v3940_v43 = vmul.f32 %v9343_v19, %v10192_v39 }
0x24dc   :  { %v3964_v24 = vmul.f32 %v9345_v35, %v10196_v22 }
0x2535   :  { %v3943_v20 = vpop.permute.xlu0 %3942 }
0x2536   :  { %v3945_v28 = vmul.f32 %v9343_v19, %v3943_v20 }
0x2538   :  { %3947 = vrot.lane.b32.xlu0 %v3945_v28, %s9419_s18 }
0x253f   :  { %v3967_v11 = vpop.permute.xlu1 %3966 }
0x2540   :  { %v3969_v10 = vmul.f32 %v9345_v35, %v3967_v11 }
0x2542   :  { %3971 = vrot.lane.b32.xlu1 %v3969_v10, %s9419_s18 }
0x25aa   :  { %v3948_v16 = vpop.permute.xlu0 %3947 }
0x25ab   :  { %v10228_v25 = vadd.f32 %v3948_v16, %v3940_v43 }
0x25ad   :  { %9346 = vtanh.f32 %v10228_v25 }
0x25b4   :  { %v3972_v47 = vpop.permute.xlu1 %3971 }
0x25b5   :  { %v10232_v49 = vadd.f32 %v3972_v47, %v3964_v24 }
0x25b7   :  { %v9347_v51 = vpop.eup %9346  ;;  %9348 = vtanh.f32 %v10232_v49 }
0x25b8   :  { %3953 = vrot.lane.b32.xlu0 %v9347_v51, %s9418_s6 }
0x25c1   :  { %v9349_v17 = vpop.eup %9348 }
0x25c2   :  { %3977 = vrot.lane.b32.xlu1 %v9349_v17, %s9418_s6 }
0x262a   :  { %v3954_v54 = vpop.permute.xlu0 %3953 }
0x262b   :  { %v3956_v39 = vmul.f32 %v9343_v19, %v3954_v54 }
0x262d   :  { %v3988_v55 = vrot.slane %v3956_v39, %v9554_v23 }
0x262f   :  { %3989 = vrot.lane.b32.xlu0 %v3988_v55, %s9419_s18 }
0x2634   :  { %v3978_v58 = vpop.permute.xlu1 %3977 }
0x2635   :  { %v3980_v59 = vmul.f32 %v9345_v35, %v3978_v58 }
0x2637   :  { %v10240_v22 = vrot.slane %v3980_v59, %v9554_v23 }
0x2639   :  { %4082 = vrot.lane.b32.xlu1 %v10240_v22, %s9419_s18 }
0x26a1   :  { %v3990_v60 = vpop.permute.xlu0 %3989 }
0x26a2   :  { %3993 = vst.msk [vmem:[#allocation7 + $0x2] sm:$0x3] %vm779_vm2, %v3990_v60  ;;  %7676 = vmatmul.mubr.msk.f32.vlgmr.msra.gmra.mrb[30].mxu1 %vm146_vm1, %v3990_v60 }
0x26a3   :  { %8621 = vmatpush3.bf16.msra.mxu1 %v9577_v36  ;;  %7697 = vmatprep.mubr.msk.f32.mxu1 %vm9417_vm0, %v11496_v4  ;;  %v4007_v36 = vld [vmem:[#allocation4 + $0x8] sm:$0x3] }
0x26a4   :  { %8622 = vmatprep.subr.bf16.mxu1 %v11524_v12 }
0x26a7   :  { %8624 = vmatpush3.bf16.msra.mxu1 %v9603_v48 }
0x26ab   :  { %v4083_v61 = vpop.permute.xlu1 %4082 }
0x26ac   :  { %7687 = vmatmul.mubr.msk.f32.vlgmr.msra.gmra.mrb[40].mxu0 %vm146_vm1, %v4083_v61 }
0x26ad   :  { %8627 = vmatpush3.bf16.msra.mxu0 %v9658_v5  ;;  %7708 = vmatprep.mubr.msk.f32.mxu0 %vm9417_vm0, %v11496_v4 }
0x26ae   :  { %8628 = vmatprep.subr.bf16.mxu0 %v11524_v12 }
0x26b1   :  { %8630 = vmatpush3.bf16.msra.mxu0 %v9669_v8 }
0x2775   :  { %v4076_v62 = vpop.f32.mrb[30].mxu1 }
0x2776   :  { %v4080_v0 = vadd.f32 %v4076_v62, %v4007_v36  ;;  %v7677_v1 = vpop.f32.mrb[31].mxu1 }
0x2778   :  { %9350 = vtanh.f32 %v4080_v0  ;;  %v6806_v9 = vmul.f32 -1.442695, %v4080_v0  ;;  %v4229_v0 = vld [vmem:[#allocation4 + $0xc] sm:$0x3] }
0x277f   :  { %v4152_v3 = vpop.f32.mrb[40].mxu0 }
0x2780   :  { %v4156_v48 = vadd.f32 %v4152_v3, %v4081_v2  ;;  %v7688_v6 = vpop.f32.mrb[41].mxu0 }
0x2782   :  { %v9351_v7 = vpop.eup %9350  ;;  %9352 = vtanh.f32 %v4156_v48  ;;  %v6807_v14 = vmul.f32 -1.442695, %v4156_v48  ;;  %v4303_v48 = vld [vmem:[#allocation4 + $0x2] sm:$0x3] }
0x2783   :  { %4166 = vrot.lane.b32.xlu0 %v9351_v7, %s9418_s6  ;;  %9354 = vpow2.f32 %v6806_v9 }
0x2784   :  { %9356 = vpow2.f32 %v6807_v14 }
0x278c   :  { %v9353_v5 = vpop.eup %9352 }
0x278d   :  { %4190 = vrot.lane.b32.xlu1 %v9353_v5, %s9418_s6  ;;  %v9355_v8 = vpop.eup %9354 }
0x278e   :  { %v4160_v15 = vadd.f32 1.0, %v9355_v8  ;;  %v9357_v18 = vpop.eup %9356 }
0x278f   :  { %v4184_v19 = vadd.f32 1.0, %v9357_v18 }
0x2790   :  { %9358 = vrcp.f32 %v4160_v15 }
0x2791   :  { %9360 = vrcp.f32 %v4184_v19 }
0x279a   :  { %v9359_v20 = vpop.eup %9358 }
0x279b   :  { %v9361_v11 = vpop.eup %9360  ;;  %v4164_v16 = vmul.f32 %v9359_v20, %v10228_v25 }
0x279c   :  { %v4188_v51 = vmul.f32 %v9361_v11, %v10232_v49 }
0x27f5   :  { %v4167_v28 = vpop.permute.xlu0 %4166 }
0x27f6   :  { %v4169_v35 = vmul.f32 %v9359_v20, %v4167_v28 }
0x27f8   :  { %4171 = vrot.lane.b32.xlu0 %v4169_v35, %s9419_s18 }
0x27ff   :  { %v4191_v10 = vpop.permute.xlu1 %4190 }
0x2800   :  { %v4193_v43 = vmul.f32 %v9361_v11, %v4191_v10 }
0x2802   :  { %4195 = vrot.lane.b32.xlu1 %v4193_v43, %s9419_s18 }
0x286a   :  { %v4172_v24 = vpop.permute.xlu0 %4171 }
0x286b   :  { %v4174_v47 = vadd.f32 %v4172_v24, %v4164_v16 }
0x286d   :  { %9362 = vtanh.f32 %v4174_v47 }
0x2874   :  { %v4196_v17 = vpop.permute.xlu1 %4195 }
0x2875   :  { %v4198_v54 = vadd.f32 %v4196_v17, %v4188_v51 }
0x2877   :  { %v9363_v39 = vpop.eup %9362  ;;  %9364 = vtanh.f32 %v4198_v54 }
0x2878   :  { %4177 = vrot.lane.b32.xlu0 %v9363_v39, %s9418_s6 }
0x2881   :  { %v9365_v55 = vpop.eup %9364 }
0x2882   :  { %4201 = vrot.lane.b32.xlu1 %v9365_v55, %s9418_s6 }
0x28ea   :  { %v4178_v58 = vpop.permute.xlu0 %4177 }
0x28eb   :  { %v4180_v59 = vmul.f32 %v9359_v20, %v4178_v58 }
0x28ed   :  { %v4212_v60 = vrot.slane %v4180_v59, %v9554_v23 }
0x28ef   :  { %4213 = vrot.lane.b32.xlu0 %v4212_v60, %s9419_s18 }
0x28f4   :  { %v4202_v25 = vpop.permute.xlu1 %4201 }
0x28f5   :  { %v4204_v61 = vmul.f32 %v9361_v11, %v4202_v25 }
0x28f7   :  { %v4224_v36 = vrot.slane %v4204_v61, %v9554_v23 }
0x28f9   :  { %4304 = vrot.lane.b32.xlu1 %v4224_v36, %s9419_s18 }
0x2961   :  { %v10269_v49 = vpop.permute.xlu0 %4213 }
0x2962   :  { %7698 = vmatmul.mubr.msk.f32.vlgmr.msra.gmra.mrb[32].mxu1 %vm146_vm1, %v10269_v49 }
0x296b   :  { %v4305_v62 = vpop.permute.xlu1 %4304 }
0x296c   :  { %7709 = vmatmul.mubr.msk.f32.vlgmr.msra.gmra.mrb[42].mxu0 %vm146_vm1, %v4305_v62  ;;  %vm4851_vm1 = vcmask 58368  }
0x2a35   :  { %v4298_v1 = vpop.f32.mrb[32].mxu1 }
0x2a36   :  { %v4302_v2 = vadd.f32 %v4298_v1, %v4229_v0  ;;  %v7699_v3 = vpop.f32.mrb[33].mxu1  ;;  %v4455_v0 = vld [vmem:[%s11486_s7 + $0x20] sm:$0xff]  ;;  %v4456_v1 = vld [vmem:[%s11486_s7 + $0x28] sm:$0xff] }
0x2a37   :  { %v10323_v3 = vpack.c.bf16 %v4456_v1, %v4455_v0 }
0x2a38   :  { %9366 = vtanh.f32 %v4302_v2  ;;  %v6810_v8 = vmul.f32 -1.442695, %v4302_v2  ;;  %v2139_v2 = vld [vmem:[#allocation2 + $0x1c] sm:$0x3] }
0x2a3f   :  { %v4374_v6 = vpop.f32.mrb[42].mxu0 }
0x2a40   :  { %v4378_v7 = vadd.f32 %v4374_v6, %v4303_v48  ;;  %v7710_v5 = vpop.f32.mrb[43].mxu0  ;;  %v2212_v48 = vadd.f32 %v9997_v56, %v2139_v2  ;;  %v4458_v56 = vld [vmem:[%s11486_s7 + $0x38] sm:$0xff] }
0x2a41   :  { %v4457_v5 = vld [vmem:[%s11486_s7 + $0x30] sm:$0xff] }
0x2a42   :  { %v9367_v9 = vpop.eup %9366  ;;  %9368 = vtanh.f32 %v4378_v7  ;;  %v6811_v15 = vmul.f32 -1.442695, %v4378_v7 }
0x2a43   :  { %4388 = vrot.lane.b32.xlu0 %v9367_v9, %s9418_s6  ;;  %9370 = vpow2.f32 %v6810_v8 }
0x2a44   :  { %9372 = vpow2.f32 %v6811_v15 }
0x2a4c   :  { %v9369_v14 = vpop.eup %9368 }
0x2a4d   :  { %4412 = vrot.lane.b32.xlu1 %v9369_v14, %s9418_s6  ;;  %v9371_v18 = vpop.eup %9370  ;;  %v10339_v14 = vpack.c.bf16 %v4458_v56, %v4457_v5 }
0x2a4e   :  { %v4382_v19 = vadd.f32 1.0, %v9371_v18  ;;  %v9373_v20 = vpop.eup %9372 }
0x2a4f   :  { %v4406_v28 = vadd.f32 1.0, %v9373_v20 }
0x2a50   :  { %9374 = vrcp.f32 %v4382_v19 }
0x2a51   :  { %9376 = vrcp.f32 %v4406_v28 }
0x2a5a   :  { %v9375_v35 = vpop.eup %9374 }
0x2a5b   :  { %v9377_v43 = vpop.eup %9376  ;;  %v4386_v51 = vmul.f32 %v9375_v35, %v4174_v47  ;;  %v4451_v47 = vld [vmem:[%s11486_s7] sm:$0xff] }
0x2a5c   :  { %v4410_v55 = vmul.f32 %v9377_v43, %v4198_v54 }
0x2ab5   :  { %v4389_v11 = vpop.permute.xlu0 %4388 }
0x2ab6   :  { %v4391_v10 = vmul.f32 %v9375_v35, %v4389_v11 }
0x2ab8   :  { %4393 = vrot.lane.b32.xlu0 %v4391_v10, %s9419_s18 }
0x2abf   :  { %v4413_v16 = vpop.permute.xlu1 %4412 }
0x2ac0   :  { %v4415_v24 = vmul.f32 %v9377_v43, %v4413_v16 }
0x2ac2   :  { %4417 = vrot.lane.b32.xlu1 %v4415_v24, %s9419_s18 }
0x2b2a   :  { %v4394_v17 = vpop.permute.xlu0 %4393 }
0x2b2b   :  { %v4396_v39 = vadd.f32 %v4394_v17, %v4386_v51 }
0x2b2d   :  { %9378 = vtanh.f32 %v4396_v39 }
0x2b34   :  { %v4418_v58 = vpop.permute.xlu1 %4417 }
0x2b35   :  { %v4420_v59 = vadd.f32 %v4418_v58, %v4410_v55 }
0x2b37   :  { %v9379_v60 = vpop.eup %9378  ;;  %9380 = vtanh.f32 %v4420_v59 }
0x2b38   :  { %4399 = vrot.lane.b32.xlu0 %v9379_v60, %s9418_s6 }
0x2b3c   :  { %3331 = vrot.lane.b32.xlu0 %v10128_v32, %s9418_s6  ;;  %v2213_v32 = vld [vmem:[#allocation2 + $0x2] sm:$0x3] }
0x2b40   :  { %4002 = vrot.lane.b32.xlu0 %v10240_v22, %s9418_s6  ;;  %v2288_v22 = vadd.f32 %v9999_v63, %v2213_v32  ;;  %v4453_v63 = vld [vmem:[%s11486_s7 + $0x10] sm:$0xff] }
0x2b41   :  { %v9381_v25 = vpop.eup %9380 }
0x2b42   :  { %4423 = vrot.lane.b32.xlu1 %v9381_v25, %s9418_s6  ;;  %9382 = vtanh.f32 %v2288_v22  ;;  %v6773_v28 = vmul.f32 -1.442695, %v2288_v22 }
0x2b43   :  { %9384 = vtanh.f32 %v2212_v48 }
0x2b44   :  { %2886 = vrot.lane.b32.xlu0 %v10054_v40, %s9418_s6  ;;  %v4452_v40 = vld [vmem:[%s11486_s7 + $0x8] sm:$0xff]  ;;  %9386 = vpow2.f32 %v6773_v28 }
0x2b46   :  { %3553 = vrot.lane.b32.xlu1 %v10166_v31, %s9418_s6  ;;  %v10300_v31 = vpack.c.bf16 %v4452_v40, %v4451_v47 }
0x2b48   :  { %3776 = vrot.lane.b32.xlu0 %v10204_v38, %s9418_s6  ;;  %8632 = vmatprep.subr.bf16.mxu1 %v10300_v31 }
0x2b49   :  { %8634 = vmatpush3.bf16.msra.mxu1 %v10300_v31 }
0x2b4a   :  { %4225 = vrot.lane.b32.xlu1 %v4224_v36, %s9418_s6 }
0x2b4e   :  { %3109 = vrot.lane.b32.xlu1 %v10090_v37, %s9418_s6  ;;  %v4454_v37 = vld [vmem:[%s11486_s7 + $0x18] sm:$0xff] }
0x2b4f   :  { %v10311_v36 = vpack.c.bf16 %v4454_v37, %v4453_v63 }
0x2b51   :  { %8636 = vmatprep.subr.bf16.mxu1 %v10311_v36 }
0x2b52   :  { %8638 = vmatpush3.bf16.msra.mxu1 %v10311_v36 }
0x2b53   :  { %8640 = vmatprep.subr.bf16.mxu1 %v10323_v3 }
0x2b56   :  { %8642 = vmatpush3.bf16.msra.mxu1 %v10323_v3 }
0x2b57   :  { %8644 = vmatprep.subr.bf16.mxu1 %v10339_v14 }
0x2b5a   :  { %8646 = vmatpush3.bf16.msra.mxu1 %v10339_v14 }
0x2b5b   :  { %8675 = vmatprep.subr.bf16.mxu1 %v11524_v12 }
0x2baa   :  { %v4400_v54 = vpop.permute.xlu0 %4399 }
0x2bab   :  { %v4402_v38 = vmul.f32 %v9375_v35, %v4400_v54  ;;  %v6772_v35 = vmul.f32 -1.442695, %v2212_v48 }
0x2bad   :  { %v4434_v61 = vrot.slane %v4402_v38, %v9554_v23  ;;  %9388 = vpow2.f32 %v6772_v35 }
0x2bae   :  { %v3332_v62 = vpop.permute.xlu0 %3331 }
0x2baf   :  { %3334 = vst.msk [vmem:[#allocation6 + $0x2] sm:$0x3] %vm793_vm3, %v3332_v62  ;;  %4435 = vrot.lane.b32.xlu1 %v4434_v61, %s9419_s18 }
0x2bb2   :  { %v4003_v6 = vpop.permute.xlu0 %4002 }
0x2bb3   :  { %4006 = vst.msk [vmem:[#allocation7 + $0x4] sm:$0x3] %vm793_vm3, %v4003_v6  ;;  %2434 = vrot.lane.b32.xlu1 %v9961_v52, %s9418_s6  ;;  %v9383_v52 = vpop.eup %9382 }
0x2bb4   :  { %4216 = vst.msk [vmem:[#allocation7 + $0x4] sm:$0x3] %vm779_vm2, %v10269_v49  ;;  %v4424_v7 = vpop.permute.xlu1 %4423  ;;  %v9385_v20 = vpop.eup %9384 }
0x2bb5   :  { %v4426_v9 = vmul.f32 %v9377_v43, %v4424_v7  ;;  %v9387_v11 = vpop.eup %9386 }
0x2bb6   :  { %v2887_v8 = vpop.permute.xlu0 %2886  ;;  %v2316_v10 = vadd.f32 1.0, %v9387_v11  ;;  %v4620_v60 = vld [vmem:[#allocation6 + $0x2] sm:$0x1] }
0x2bb7   :  { %v4446_v15 = vrot.slane %v4426_v9, %v9554_v23  ;;  %2890 = vst.msk [vmem:[#allocation6 + $0x6] sm:$0x3] %vm793_vm3, %v2887_v8  ;;  %2322 = vrot.lane.b32.xlu1 %v9383_v52, %s9418_s6  ;;  %v9389_v16 = vpop.eup %9388  ;;  %v4646_v40 = vrot.slane %v4620_v60, 3 }
0x2bb8   :  { %3100 = vst.msk [vmem:[#allocation6 + $0x6] sm:$0x3] %vm779_vm2, %v10094_v45  ;;  %v3554_v49 = vpop.permute.xlu1 %3553  ;;  %9390 = vrcp.f32 %v2316_v10  ;;  %v2292_v24 = vadd.f32 1.0, %v9389_v16 }
0x2bb9   :  { %3556 = vst.msk [vmem:[#allocation6] sm:$0x3] %vm793_vm3, %v3554_v49  ;;  %4447 = vrot.lane.b32.xlu0 %v4446_v15, %s9418_s6 }
0x2bba   :  { %v3777_v18 = vpop.permute.xlu0 %3776  ;;  %9392 = vrcp.f32 %v2292_v24 }
0x2bbb   :  { %3780 = vst.msk [vmem:[#allocation7 + $0x6] sm:$0x3] %vm793_vm3, %v3777_v18 }
0x2bbc   :  { %v4226_v19 = vpop.permute.xlu1 %4225 }
0x2bbd   :  { %4228 = vst.msk [vmem:[#allocation7 + $0x2] sm:$0x3] %vm793_vm3, %v4226_v19  ;;  %2660 = vrot.lane.b32.xlu0 %v10018_v33, %s9418_s6 }
0x2bbf   :  { %v4622_v38 = vld [vmem:[#allocation6 + $0x6] sm:$0x1] }
0x2bc0   :  { %v3110_v45 = vpop.permute.xlu1 %3109  ;;  %v4619_v58 = vld [vmem:[#allocation6] sm:$0x1]  ;;  %v4652_v5 = vrot.slane %v4622_v38, 1 }
0x2bc1   :  { %3112 = vst.msk [vmem:[#allocation6 + $0x4] sm:$0x3] %vm793_vm3, %v3110_v45  ;;  %2298 = vrot.lane.b32.xlu0 %v9385_v20, %s9418_s6  ;;  %v4645_v25 = vrot.slane %v4619_v58, 4 }
0x2bc2   :  { %v10361_v33 = vpop.eup %9390 }
0x2bc3   :  { %v4648_v37 = vsel %vm4647_vm4, %v4646_v40, %v4645_v25  ;;  %v2320_v20 = vmul.f32 %v10361_v33, %v9941_v29 }
0x2bc4   :  { %v4616_v22 = vld [vmem:[#allocation7 + $0x2] sm:$0x1]  ;;  %v9393_v61 = vpop.eup %9392 }
0x2bc5   :  { %v4629_v63 = vrot.slane %v4616_v22, 7  ;;  %v2296_v35 = vmul.f32 %v9393_v61, %v9934_v21 }
0x2bc8   :  { %v4621_v59 = vld [vmem:[#allocation6 + $0x4] sm:$0x1] }
0x2bc9   :  { %v4649_v47 = vrot.slane %v4621_v59, 2 }
0x2bcb   :  { %v4651_v2 = vsel %vm4650_vm5, %v4649_v47, %v4648_v37 }
0x2bcc   :  { %v4654_v52 = vsel %vm4653_vm8, %v4652_v5, %v4651_v2 }
0x2c21   :  { %v4436_v43 = vpop.permute.xlu1 %4435 }
0x2c22   :  { %4438 = vst.msk [vmem:[#allocation7 + $0x6] sm:$0x3] %vm779_vm2, %v4436_v43 }
0x2c25   :  { %v2435_v51 = vpop.permute.xlu1 %2434 }
0x2c26   :  { %2438 = vst.msk [vmem:[#allocation6 + $0xa] sm:$0x3] %vm793_vm3, %v2435_v51 }
0x2c27   :  { %3544 = vst.msk [vmem:[#allocation6 + $0xa] sm:$0x3] %vm779_vm2, %v10170_v46  ;;  %v4617_v46 = vld [vmem:[#allocation7 + $0x4] sm:$0x1] }
0x2c28   :  { %v4632_v1 = vrot.slane %v4617_v46, 6 }
0x2c29   :  { %v2323_v17 = vpop.permute.xlu1 %2322  ;;  %v4618_v54 = vld [vmem:[#allocation7 + $0x6] sm:$0x1] }
0x2c2a   :  { %v2325_v39 = vmul.f32 %v10361_v33, %v2323_v17  ;;  %v4635_v7 = vrot.slane %v4618_v54, 5 }
0x2c2b   :  { %v4448_v55 = vpop.permute.xlu0 %4447 }
0x2c2c   :  { %2327 = vrot.lane.b32.xlu1 %v2325_v39, %s9419_s18  ;;  %4450 = vst.msk [vmem:[#allocation7] sm:$0x3] %vm793_vm3, %v4448_v55 }
0x2c2e   :  { %v4624_v6 = vld [vmem:[#allocation6 + $0xa] sm:$0x1] }
0x2c2f   :  { %v2661_v32 = vpop.permute.xlu0 %2660  ;;  %v4655_v8 = vrot.slane %v4624_v6, 7 }
0x2c30   :  { %2664 = vst.msk [vmem:[#allocation6 + $0x8] sm:$0x3] %vm793_vm3, %v2661_v32 }
0x2c31   :  { %3322 = vst.msk [vmem:[#allocation6 + $0x8] sm:$0x3] %vm779_vm2, %v10132_v44 }
0x2c33   :  { %v2299_v62 = vpop.permute.xlu0 %2298  ;;  %v4615_v0 = vld [vmem:[#allocation7] sm:$0x1] }
0x2c34   :  { %v2301_v48 = vmul.f32 %v9393_v61, %v2299_v62  ;;  %v4631_v44 = vsel %vm4630_vm6, %v4629_v63, %v4615_v0 }
0x2c35   :  { %v4634_v56 = vsel %vm4633_vm7, %v4632_v1, %v4631_v44  ;;  %v4603_v44 = vld [vmem:[%s11489_s12 + $0x270] sm:$0xff] }
0x2c36   :  { %2303 = vrot.lane.b32.xlu0 %v2301_v48, %s9419_s18  ;;  %v4637_v9 = vsel %vm4636_vm9, %v4635_v7, %v4634_v56 }
0x2c37   :  { %v10377_v15 = vsel %vm4658_vm10, %v4637_v9, %v4654_v52 }
0x2c38   :  { %v4623_v49 = vld [vmem:[#allocation6 + $0x8] sm:$0x1]  ;;  %7727 = vmatprep.mubr.msk.f32.mxu1 %vm4660_vm11, %v10377_v15 }
0x2c39   :  { %v10382_v18 = vsel %vm4630_vm6, %v4655_v8, %v4623_v49 }
0x2c3a   :  { %v8648_v19 = vpack.c.bf16 %v10382_v18, %v10377_v15  ;;  %7728 = vmatmul.mubr.msk.f32.vlgmr.msra.gmra.mrb[34].mxu1 %vm4660_vm11, %v10382_v18 }
0x2c3b   :  { %7809 = vmatprep.mubr.msk.f32.mxu1 %vm9417_vm0, %v11496_v4 }
0x2c9e   :  { %v2328_v45 = vpop.permute.xlu1 %2327 }
0x2c9f   :  { %v2330_v28 = vadd.f32 %v2328_v45, %v2320_v20 }
0x2ca1   :  { %9394 = vtanh.f32 %v2330_v28 }
0x2ca8   :  { %v2304_v11 = vpop.permute.xlu0 %2303 }
0x2ca9   :  { %v2306_v10 = vadd.f32 %v2304_v11, %v2296_v35 }
0x2cab   :  { %v9395_v43 = vpop.eup %9394  ;;  %9396 = vtanh.f32 %v2306_v10 }
0x2cac   :  { %2333 = vrot.lane.b32.xlu1 %v9395_v43, %s9418_s6 }
0x2cb0   :  { %2135 = vrot.lane.b32.xlu1 %v9956_v34, %s9418_s6 }
0x2cb4   :  { %1468 = vrot.lane.b32.xlu1 %v9828_v57, %s9418_s6 }
0x2cb5   :  { %v9397_v16 = vpop.eup %9396 }
0x2cb6   :  { %2309 = vrot.lane.b32.xlu0 %v9397_v16, %s9418_s6 }
0x2cba   :  { %1913 = vrot.lane.b32.xlu0 %v9902_v26, %s9418_s6 }
0x2cbe   :  { %1691 = vrot.lane.b32.xlu0 %v9864_v41, %s9418_s6 }
0x2cc2   :  { %1242 = vrot.lane.b32.xlu0 %v9792_v13, %s9418_s6 }
0x2cc6   :  { %789 = vrot.lane.b32.xlu0 %v9720_v50, %s9418_s6 }
0x2d0d   :  { %v7729_v21 = vpop.f32.mrb[34].mxu1 }
0x2d0e   :  { %v4732_v29 = vpop.f32.mrb[35].mxu1 }
0x2d0f   :  { %7732 = vmatprep.mubr.msk.f32.mxu0 %vm4660_vm11, %v4732_v29 }
0x2d1e   :  { %v2334_v57 = vpop.permute.xlu1 %2333 }
0x2d1f   :  { %v2336_v34 = vmul.f32 %v10361_v33, %v2334_v57 }
0x2d21   :  { %v2356_v24 = vrot.slane %v2336_v34, %v9554_v23  ;;  %v4459_v34 = vld [vmem:[%s11487_s8] sm:$0xff] }
0x2d22   :  { %v2136_v51 = vpop.permute.xlu1 %2135 }
0x2d23   :  { %2138 = vst.msk [vmem:[#allocation5 + $0x2] sm:$0x3] %vm793_vm3, %v2136_v51  ;;  %2357 = vrot.lane.b32.xlu1 %v2356_v24, %s9418_s6  ;;  %v4460_v24 = vld [vmem:[%s11487_s8 + $0x8] sm:$0xff]  ;;  %v4492_v51 = vld [vmem:[%s11488_s10 + $0x80] sm:$0xff] }
0x2d26   :  { %v1469_v41 = vpop.permute.xlu1 %1468 }
0x2d27   :  { %1472 = vst.msk [vmem:[#allocation5 + $0x8] sm:$0x3] %vm793_vm3, %v1469_v41  ;;  %1016 = vrot.lane.b32.xlu1 %v9756_v30, %s9418_s6  ;;  %v10473_v41 = vpack.c.bf16 %v4460_v24, %v4459_v34  ;;  %v4478_v34 = vld [vmem:[%s11488_s10 + $0x10] sm:$0xff]  ;;  %v4479_v24 = vld [vmem:[%s11488_s10 + $0x18] sm:$0xff] }
0x2d28   :  { %1682 = vst.msk [vmem:[#allocation5 + $0x8] sm:$0x3] %vm779_vm2, %v9868_v42  ;;  %v2310_v50 = vpop.permute.xlu0 %2309 }
0x2d29   :  { %v2312_v13 = vmul.f32 %v9393_v61, %v2310_v50  ;;  %v4493_v50 = vld [vmem:[%s11488_s10 + $0x88] sm:$0xff] }
0x2d2a   :  { %v4608_v55 = vld [vmem:[#allocation5 + $0x2] sm:$0x1] }
0x2d2b   :  { %v2344_v26 = vrot.slane %v2312_v13, %v9554_v23  ;;  %v4749_v59 = vrot.slane %v4608_v55, 7  ;;  %v4461_v13 = vld [vmem:[%s11487_s8 + $0x10] sm:$0xff]  ;;  %v4464_v55 = vld [vmem:[%s11487_s8 + $0x28] sm:$0xff] }
0x2d2c   :  { %v1914_v33 = vpop.permute.xlu0 %1913 }
0x2d2d   :  { %1916 = vst.msk [vmem:[#allocation5 + $0x4] sm:$0x3] %vm793_vm3, %v1914_v33  ;;  %2345 = vrot.lane.b32.xlu1 %v2344_v26, %s9419_s18  ;;  %v4462_v26 = vld [vmem:[%s11487_s8 + $0x18] sm:$0xff]  ;;  %v10484_v33 = vpack.c.bf16 %v4493_v50, %v4492_v51 }
0x2d2f   :  { %v4611_v46 = vld [vmem:[#allocation5 + $0x8] sm:$0x1]  ;;  %8677 = vmatpush3.bf16.msra.mxu1 %v10484_v33 }
0x2d30   :  { %v1692_v17 = vpop.permute.xlu0 %1691  ;;  %v4755_v37 = vrot.slane %v4611_v46, 4  ;;  %8678 = vmatprep.subr.bf16.mxu1 %v11524_v12 }
0x2d31   :  { %1694 = vst.msk [vmem:[#allocation5 + $0x6] sm:$0x3] %vm793_vm3, %v1692_v17  ;;  %v4494_v17 = vld [vmem:[%s11488_s10 + $0x90] sm:$0xff] }
0x2d34   :  { %v1243_v39 = vpop.permute.xlu0 %1242  ;;  %v4609_v58 = vld [vmem:[#allocation5 + $0x4] sm:$0x1] }
0x2d35   :  { %1246 = vst.msk [vmem:[#allocation5 + $0xa] sm:$0x3] %vm793_vm3, %v1243_v39  ;;  %v4751_v32 = vrot.slane %v4609_v58, 6  ;;  %v4495_v39 = vld [vmem:[%s11488_s10 + $0x98] sm:$0xff]  ;;  %v4496_v58 = vld [vmem:[%s11488_s10 + $0xa0] sm:$0xff] }
0x2d36   :  { %1904 = vst.msk [vmem:[#allocation5 + $0xa] sm:$0x3] %vm779_vm2, %v9906_v27 }
0x2d38   :  { %v790_v30 = vpop.permute.xlu0 %789  ;;  %v4610_v25 = vld [vmem:[#allocation5 + $0x6] sm:$0x1] }
0x2d39   :  { %794 = vst.msk [vmem:[#allocation5 + $0xe] sm:$0x3] %vm793_vm3, %v790_v30  ;;  %v4753_v40 = vrot.slane %v4610_v25, 5  ;;  %v10493_v30 = vpack.c.bf16 %v4462_v26, %v4461_v13  ;;  %v4510_v26 = vld [vmem:[%s11488_s10 + $0x110] sm:$0xff] }
0x2d3d   :  { %v4612_v63 = vld [vmem:[#allocation5 + $0xa] sm:$0x1] }
0x2d3e   :  { %v4758_v62 = vrot.slane %v4612_v63, 3  ;;  %v4500_v63 = vld [vmem:[%s11488_s10 + $0xc0] sm:$0xff] }
0x2d95   :  { %v2358_v42 = vpop.permute.xlu1 %2357 }
0x2d96   :  { %2360 = vst.msk [vmem:[#allocation5] sm:$0x3] %vm793_vm3, %v2358_v42  ;;  %v10497_v42 = vpack.c.bf16 %v4495_v39, %v4494_v17  ;;  %v4511_v17 = vld [vmem:[%s11488_s10 + $0x118] sm:$0xff]  ;;  %v10660_v39 = vpack.c.bf16 %v4479_v24, %v4478_v34  ;;  %v4522_v24 = vld [vmem:[%s11488_s10 + $0x170] sm:$0xff] }
0x2d98   :  { %8680 = vmatpush3.bf16.msra.mxu1 %v10497_v42 }
0x2d99   :  { %v1017_v23 = vpop.permute.xlu1 %1016  ;;  %8681 = vmatprep.subr.bf16.mxu1 %v11524_v12 }
0x2d9a   :  { %1020 = vst.msk [vmem:[#allocation5 + $0xc] sm:$0x3] %vm793_vm3, %v1017_v23  ;;  %vm4903_vm3 = vcmask 80896   ;;  %v4463_v23 = vld [vmem:[%s11487_s8 + $0x20] sm:$0xff] }
0x2d9b   :  { %2126 = vst.msk [vmem:[#allocation5 + $0xc] sm:$0x3] %vm779_vm2, %v9965_v53 }
0x2d9d   :  { %v4607_v60 = vld [vmem:[#allocation5] sm:$0x1] }
0x2d9e   :  { %v4750_v27 = vsel %vm4630_vm6, %v4749_v59, %v4607_v60  ;;  %v4497_v59 = vld [vmem:[%s11488_s10 + $0xa8] sm:$0xff]  ;;  %v10513_v60 = vpack.c.bf16 %v4464_v55, %v4463_v23  ;;  %v10674_v55 = vpack.c.bf16 %v4511_v17, %v4510_v26  ;;  %v4523_v26 = vld [vmem:[%s11488_s10 + $0x178] sm:$0xff] }
0x2d9f   :  { %v2346_v22 = vpop.permute.xlu1 %2345  ;;  %v4752_v47 = vsel %vm4633_vm7, %v4751_v32, %v4750_v27  ;;  %v10517_v25 = vpack.c.bf16 %v4497_v59, %v4496_v58  ;;  %v4465_v32 = vld [vmem:[%s11487_s8 + $0x30] sm:$0xff]  ;;  %v4466_v27 = vld [vmem:[%s11487_s8 + $0x38] sm:$0xff]  ;;  %v4481_v23 = vld [vmem:[%s11488_s10 + $0x28] sm:$0xff] }
0x2da0   :  { %2348 = vst.msk [vmem:[#allocation5 + $0xe] sm:$0x3] %vm779_vm2, %v2346_v22  ;;  %v4754_v38 = vsel %vm4636_vm9, %v4753_v40, %v4752_v47  ;;  %vm4847_vm2 = vcmask 64512   ;;  %v4498_v22 = vld [vmem:[%s11488_s10 + $0xb0] sm:$0xff]  ;;  %v4499_v47 = vld [vmem:[%s11488_s10 + $0xb8] sm:$0xff]  ;;  %v10533_v46 = vpack.c.bf16 %v4466_v27, %v4465_v32  ;;  %v4512_v58 = vld [vmem:[%s11488_s10 + $0x120] sm:$0xff] }
0x2da1   :  { %v4757_v53 = vsel %vm4756_vm12, %v4755_v37, %v4754_v38  ;;  %8683 = vmatpush3.bf16.msra.mxu1 %v10517_v25  ;;  %v10537_v40 = vpack.c.bf16 %v4499_v47, %v4498_v22  ;;  %v4468_v38 = vld [vmem:[%s11487_s8 + $0x48] sm:$0xff]  ;;  %v4482_v27 = vld [vmem:[%s11488_s10 + $0x30] sm:$0xff]  ;;  %v4483_v22 = vld [vmem:[%s11488_s10 + $0x38] sm:$0xff] }
0x2da2   :  { %v4613_v54 = vld [vmem:[#allocation5 + $0xc] sm:$0x1]  ;;  %v4759_v1 = vsel %vm4647_vm4, %v4758_v62, %v4757_v53  ;;  %8684 = vmatprep.subr.bf16.mxu1 %v11524_v12  ;;  %v4501_v37 = vld [vmem:[%s11488_s10 + $0xc8] sm:$0xff] }
0x2da3   :  { %v4760_v61 = vrot.slane %v4613_v54, 2  ;;  %v4467_v54 = vld [vmem:[%s11487_s8 + $0x40] sm:$0xff]  ;;  %v4469_v62 = vld [vmem:[%s11487_s8 + $0x50] sm:$0xff]  ;;  %v4513_v59 = vld [vmem:[%s11488_s10 + $0x128] sm:$0xff] }
0x2da4   :  { %v10553_v53 = vpack.c.bf16 %v4468_v38, %v4467_v54  ;;  %v10696_v47 = vpack.c.bf16 %v4513_v59, %v4512_v58  ;;  %v4514_v54 = vld [vmem:[%s11488_s10 + $0x130] sm:$0xff]  ;;  %v4515_v38 = vld [vmem:[%s11488_s10 + $0x138] sm:$0xff]  ;;  %v10796_v58 = vpack.c.bf16 %v4523_v26, %v4522_v24  ;;  %v4525_v59 = vld [vmem:[%s11489_s12] sm:$0xff] }
0x2da5   :  { %v4761_v48 = vsel %vm4650_vm5, %v4760_v61, %v4759_v1  ;;  %8686 = vmatpush3.bf16.msra.mxu1 %v10537_v40  ;;  %v10557_v61 = vpack.c.bf16 %v4501_v37, %v4500_v63  ;;  %v4502_v1 = vld [vmem:[%s11488_s10 + $0xd0] sm:$0xff]  ;;  %v10706_v63 = vpack.c.bf16 %v4483_v22, %v4482_v27  ;;  %v4484_v37 = vld [vmem:[%s11488_s10 + $0x40] sm:$0xff]  ;;  %v4526_v27 = vld [vmem:[%s11489_s12 + $0x8] sm:$0xff] }
0x2da6   :  { %8687 = vmatprep.subr.bf16.mxu1 %v11524_v12  ;;  %v4531_v24 = vld [vmem:[%s11489_s12 + $0x30] sm:$0xff]  ;;  %v4532_v26 = vld [vmem:[%s11489_s12 + $0x38] sm:$0xff] }
0x2da7   :  { %v4614_v0 = vld [vmem:[#allocation5 + $0xe] sm:$0x1] }
0x2da8   :  { %v4762_v2 = vrot.slane %v4614_v0, 1  ;;  %v4470_v0 = vld [vmem:[%s11487_s8 + $0x58] sm:$0xff] }
0x2da9   :  { %8689 = vmatpush3.bf16.msra.mxu1 %v10557_v61 }
0x2daa   :  { %v10437_v6 = vsel %vm4653_vm8, %v4762_v2, %v4761_v48  ;;  %v4503_v2 = vld [vmem:[%s11488_s10 + $0xd8] sm:$0xff]  ;;  %v10573_v48 = vpack.c.bf16 %v4470_v0, %v4469_v62  ;;  %8690 = vmatprep.subr.bf16.mxu1 %v11524_v12  ;;  %v4485_v62 = vld [vmem:[%s11488_s10 + $0x48] sm:$0xff]  ;;  %v10716_v0 = vpack.c.bf16 %v4515_v38, %v4514_v54  ;;  %v4543_v54 = vld [vmem:[%s11489_s12 + $0x90] sm:$0xff] }
0x2dab   :  { %7730 = vmatprep.subr.msk.mxu0 %vm4660_vm11, %v10437_v6  ;;  %v4544_v38 = vld [vmem:[%s11489_s12 + $0x98] sm:$0xff] }
0x2dac   :  { %7731 = vmatpush3.xpose.msk.msra.mxu0 %vm4660_vm11, %v10437_v6 }
0x2dad   :  { %8647 = vmatprep.subr.bf16.mxu0 %v11524_v12 }
0x2daf   :  { %7733 = vmatmul.mubr.msk.f32.vlgmr.msra.gmra.mrb[44].mxu0 %vm4660_vm11, %v7729_v21 }
0x2db0   :  { %8650 = vmatpush3.bf16.msk.msra.mxu0 %vm10444_vm15, %v8648_v19  ;;  %7739 = vmatprep.mubr.msk.f32.mxu0 %vm9417_vm0, %v11496_v4 }
0x2db1   :  { %8651 = vmatprep.subr.bf16.mxu0 %v11524_v12 }
0x2e82   :  { %v7734_v7 = vpop.f32.mrb[44].mxu0 }
0x2e83   :  { %v4838_v5 = vpop.f32.mrb[45].mxu0  ;;  %v4852_v56 = vsel %vm4851_vm1, %v7734_v7, -inf }
0x2e84   :  { %4853 = vmax.xlane.f32.xlu1 %v4852_v56  ;;  %v4848_v9 = vsel %vm4847_vm2, %v4838_v5, -inf  ;;  %v4472_v56 = vld [vmem:[%s11487_s8 + $0x68] sm:$0xff] }
0x2e85   :  { %4849 = vmax.xlane.f32.xlu0 %v4848_v9  ;;  %v4504_v9 = vld [vmem:[%s11488_s10 + $0xe0] sm:$0xff] }
0x2f11   :  { %v4854_v52 = vpop.xlane.xlu1 %4853 }
0x2f12   :  { %v4856_v8 = vsub.f32 %v7734_v7, %v4854_v52  ;;  %v4850_v15 = vpop.xlane.xlu0 %4849  ;;  %v10577_v7 = vpack.c.bf16 %v4503_v2, %v4502_v1  ;;  %v4505_v52 = vld [vmem:[%s11488_s10 + $0xe8] sm:$0xff]  ;;  %v4516_v1 = vld [vmem:[%s11488_s10 + $0x140] sm:$0xff] }
0x2f13   :  { %v4855_v49 = vsub.f32 %v4838_v5, %v4850_v15  ;;  %v4471_v5 = vld [vmem:[%s11487_s8 + $0x60] sm:$0xff]  ;;  %v10597_v15 = vpack.c.bf16 %v4505_v52, %v4504_v9  ;;  %v4517_v2 = vld [vmem:[%s11488_s10 + $0x148] sm:$0xff]  ;;  %v4487_v9 = vld [vmem:[%s11488_s10 + $0x58] sm:$0xff] }
0x2f14   :  { %v4859_v18 = vmul.f32 1.442695, %v4856_v8  ;;  %v10593_v8 = vpack.c.bf16 %v4472_v56, %v4471_v5  ;;  %8692 = vmatpush3.bf16.msra.mxu1 %v10577_v7  ;;  %v10726_v5 = vpack.c.bf16 %v4485_v62, %v4484_v37  ;;  %v4486_v56 = vld [vmem:[%s11488_s10 + $0x50] sm:$0xff]  ;;  %v10736_v52 = vpack.c.bf16 %v4517_v2, %v4516_v1  ;;  %v4528_v2 = vld [vmem:[%s11489_s12 + $0x18] sm:$0xff] }
0x2f15   :  { %v4857_v19 = vmul.f32 1.442695, %v4855_v49  ;;  %v4473_v49 = vld [vmem:[%s11487_s8 + $0x70] sm:$0xff]  ;;  %8693 = vmatprep.subr.bf16.mxu1 %v11524_v12  ;;  %v10816_v37 = vpack.c.bf16 %v4526_v27, %v4525_v59  ;;  %v4550_v59 = vld [vmem:[%s11489_s12 + $0xc8] sm:$0xff]  ;;  %v10884_v27 = vpack.c.bf16 %v4532_v26, %v4531_v24 }
0x2f16   :  { %v4527_v1 = vld [vmem:[%s11489_s12 + $0x10] sm:$0xff]  ;;  %v4554_v24 = vld [vmem:[%s11489_s12 + $0xe8] sm:$0xff] }
0x2f17   :  { %9398 = vpow2.f32 %v4857_v19  ;;  %v4506_v19 = vld [vmem:[%s11488_s10 + $0xf0] sm:$0xff]  ;;  %11542 = vst [vmem:[#allocation12_spill] sm:$0xff] %v10884_v27 }
0x2f18   :  { %9400 = vpow2.f32 %v4859_v18  ;;  %v4474_v18 = vld [vmem:[%s11487_s8 + $0x78] sm:$0xff]  ;;  %8695 = vmatpush3.bf16.msra.mxu1 %v10597_v15 }
0x2f19   :  { %8696 = vmatprep.subr.bf16.mxu1 %v11524_v12 }
0x2f21   :  { %v9399_v20 = vpop.eup %9398 }
0x2f22   :  { %v4861_v45 = vsel %vm4847_vm2, %v9399_v20, 0.0  ;;  %v9401_v28 = vpop.eup %9400 }
0x2f23   :  { %4862 = vadd.xlane.f32.xlu0 %v4861_v45  ;;  %v4864_v35 = vsel %vm4851_vm1, %v9401_v28, 0.0  ;;  %v10613_v45 = vpack.c.bf16 %v4474_v18, %v4473_v49  ;;  %v4518_v49 = vld [vmem:[%s11488_s10 + $0x150] sm:$0xff]  ;;  %v4519_v18 = vld [vmem:[%s11488_s10 + $0x158] sm:$0xff] }
0x2f27   :  { %4865 = vadd.xlane.f32.xlu0 %v4864_v35 }
0x2fb0   :  { %v4863_v11 = vpop.xlane.xlu0 %4862 }
0x2fb1   :  { %9402 = vrcp.f32 %v4863_v11 }
0x2fb4   :  { %v4866_v10 = vpop.xlane.xlu0 %4865 }
0x2fb5   :  { %9404 = vrcp.f32 %v4866_v10  ;;  %v4476_v10 = vld [vmem:[%s11488_s10] sm:$0xff] }
0x2fbb   :  { %v9403_v43 = vpop.eup %9402 }
0x2fbc   :  { %v4869_v16 = vmul.f32 %v9403_v43, %v9399_v20  ;;  %v4507_v20 = vld [vmem:[%s11488_s10 + $0xf8] sm:$0xff]  ;;  %v4477_v43 = vld [vmem:[%s11488_s10 + $0x8] sm:$0xff] }
0x2fbe   :  { %4871 = vxpose.xlu1.b32.start [1/2] (short) (narrow) %v4869_v16, 8  ;;  %v4508_v16 = vld [vmem:[%s11488_s10 + $0x100] sm:$0xff] }
0x2fbf   :  { %v9405_v21 = vpop.eup %9404 }
0x2fc0   :  { %v4870_v29 = vmul.f32 %v9405_v21, %v9401_v28  ;;  %v10617_v28 = vpack.c.bf16 %v4507_v20, %v4506_v19  ;;  %v4509_v21 = vld [vmem:[%s11488_s10 + $0x108] sm:$0xff]  ;;  %v10746_v19 = vpack.c.bf16 %v4487_v9, %v4486_v56  ;;  %v4488_v20 = vld [vmem:[%s11488_s10 + $0x60] sm:$0xff]  ;;  %v10828_v56 = vpack.c.bf16 %v4544_v38, %v4543_v54 }
0x2fc1   :  { %v10649_v50 = vpack.c.bf16 %v4509_v21, %v4508_v16  ;;  %v4490_v21 = vld [vmem:[%s11488_s10 + $0x70] sm:$0xff]  ;;  %v4545_v9 = vld [vmem:[%s11489_s12 + $0xa0] sm:$0xff]  ;;  %v4534_v38 = vld [vmem:[%s11489_s12 + $0x48] sm:$0xff] }
0x2fc2   :  { %4872 = vxpose.xlu1.b32.end [2/2] (short) (narrow) %v4870_v29, 8  ;;  %8698 = vmatpush3.bf16.msra.mxu1 %v10617_v28  ;;  %v10637_v29 = vpack.c.bf16 %v4477_v43, %v4476_v10  ;;  %v4520_v10 = vld [vmem:[%s11488_s10 + $0x160] sm:$0xff]  ;;  %v4521_v43 = vld [vmem:[%s11488_s10 + $0x168] sm:$0xff] }
0x2fc3   :  { %8723 = vmatprep.subr.bf16.mxu1 %v11524_v12  ;;  %v10776_v34 = vpack.c.bf16 %v4521_v43, %v4520_v10  ;;  %v4547_v43 = vld [vmem:[%s11489_s12 + $0xb0] sm:$0xff]  ;;  %v4533_v54 = vld [vmem:[%s11489_s12 + $0x40] sm:$0xff] }
0x303e   :  { %v4887_v57 = vpop.trf.xlu1 }
0x303f   :  { %7740 = vmatmul.mubr.msk.f32.vlgmr.msra.gmra.mrb[46].mxu0 %vm4903_vm3, %v4887_v57 }
0x3040   :  { %7774 = vmatprep.mubr.msk.f32.mxu0 %vm9417_vm0, %v11496_v4  ;;  %8653 = vmatpush3.bf16.msra.mxu0 %v10473_v41 }
0x3041   :  { %8654 = vmatprep.subr.bf16.mxu0 %v11524_v12 }
0x3044   :  { %8656 = vmatpush3.bf16.msra.mxu0 %v10493_v30 }
0x3045   :  { %8657 = vmatprep.subr.bf16.mxu0 %v11524_v12 }
0x3048   :  { %8659 = vmatpush3.bf16.msra.mxu0 %v10513_v60 }
0x3049   :  { %8660 = vmatprep.subr.bf16.mxu0 %v11524_v12 }
0x304c   :  { %8662 = vmatpush3.bf16.msra.mxu0 %v10533_v46 }
0x304d   :  { %8663 = vmatprep.subr.bf16.mxu0 %v11524_v12 }
0x3050   :  { %8665 = vmatpush3.bf16.msra.mxu0 %v10553_v53 }
0x3051   :  { %8666 = vmatprep.subr.bf16.mxu0 %v11524_v12 }
0x3054   :  { %8668 = vmatpush3.bf16.msra.mxu0 %v10573_v48 }
0x3055   :  { %8669 = vmatprep.subr.bf16.mxu0 %v11524_v12 }
0x3058   :  { %8671 = vmatpush3.bf16.msra.mxu0 %v10593_v8 }
0x3059   :  { %8672 = vmatprep.subr.bf16.mxu0 %v11524_v12 }
0x305c   :  { %8674 = vmatpush3.bf16.msra.mxu0 %v10613_v45 }
0x305d   :  { %8699 = vmatprep.subr.bf16.mxu0 %v11524_v12 }
0x3112   :  { %v4976_v35 = vpop.f32.mrb[46].mxu0 }
0x3113   :  { %4982 = vrot.lane.b32.xlu0 %v4976_v35, %s9418_s6  ;;  %v7741_v11 = vpop.f32.mrb[47].mxu0  ;;  %v4489_v35 = vld [vmem:[%s11488_s10 + $0x68] sm:$0xff] }
0x3114   :  { %v10756_v11 = vpack.c.bf16 %v4519_v18, %v4518_v49  ;;  %v10766_v16 = vpack.c.bf16 %v4489_v35, %v4488_v20  ;;  %v4546_v49 = vld [vmem:[%s11489_s12 + $0xa8] sm:$0xff]  ;;  %v10842_v18 = vpack.c.bf16 %v4528_v2, %v4527_v1  ;;  %v4529_v20 = vld [vmem:[%s11489_s12 + $0x20] sm:$0xff]  ;;  %v4551_v2 = vld [vmem:[%s11489_s12 + $0xd0] sm:$0xff] }
0x3115   :  { %v4530_v35 = vld [vmem:[%s11489_s12 + $0x28] sm:$0xff]  ;;  %v10854_v10 = vpack.c.bf16 %v4546_v49, %v4545_v9  ;;  %v4552_v9 = vld [vmem:[%s11489_s12 + $0xd8] sm:$0xff]  ;;  %v10904_v49 = vpack.c.bf16 %v4534_v38, %v4533_v54  ;;  %v4555_v38 = vld [vmem:[%s11489_s12 + $0xf0] sm:$0xff] }
0x3116   :  { %11538 = vst [vmem:[#allocation8_spill] sm:$0xff] %v10842_v18 }
0x3117   :  { %11539 = vst [vmem:[#allocation9_spill] sm:$0xff] %v10854_v10  ;;  %11544 = vst [vmem:[#allocation14_spill] sm:$0xff] %v10904_v49 }
0x3185   :  { %v4983_v57 = vpop.permute.xlu0 %4982 }
0x3186   :  { %v10647_v51 = vsel %vm4660_vm11, %v10437_v6, %v4983_v57  ;;  %v4480_v6 = vld [vmem:[%s11488_s10 + $0x20] sm:$0xff]  ;;  %v4491_v57 = vld [vmem:[%s11488_s10 + $0x78] sm:$0xff] }
0x3187   :  { %7775 = vmatmul.mubr.f32.vlgmr.msra.gmra.mrb[48].mxu0 %v10647_v51  ;;  %v5070_v13 = vrot.slane %v10647_v51, 1  ;;  %v10686_v32 = vpack.c.bf16 %v4481_v23, %v4480_v6  ;;  %v10786_v17 = vpack.c.bf16 %v4491_v57, %v4490_v21  ;;  %v4541_v6 = vld [vmem:[%s11489_s12 + $0x80] sm:$0xff]  ;;  %v4542_v23 = vld [vmem:[%s11489_s12 + $0x88] sm:$0xff]  ;;  %v11495_v62 = vrot.slane %v10647_v51, 2  ;;  %v4548_v21 = vld [vmem:[%s11489_s12 + $0xb8] sm:$0xff] }
0x3188   :  { %8701 = vmatpush3.bf16.msra.mxu0 %v10637_v29  ;;  %7844 = vmatprep.mubr.msk.f32.mxu0 %vm9417_vm0, %v11496_v4  ;;  %v10806_v22 = vpack.c.bf16 %v4542_v23, %v4541_v6  ;;  %v10864_v57 = vpack.c.bf16 %v4530_v35, %v4529_v20  ;;  %v10874_v6 = vpack.c.bf16 %v4548_v21, %v4547_v43  ;;  %v4549_v23 = vld [vmem:[%s11489_s12 + $0xc0] sm:$0xff]  ;;  %v4535_v20 = vld [vmem:[%s11489_s12 + $0x50] sm:$0xff]  ;;  %v4536_v35 = vld [vmem:[%s11489_s12 + $0x58] sm:$0xff] }
0x3189   :  { %7810 = vmatmul.mubr.f32.vlgmr.msra.gmra.mrb[36].mxu1 %v5070_v13  ;;  %8702 = vmatprep.subr.bf16.mxu0 %v11524_v12  ;;  %v10894_v1 = vpack.c.bf16 %v4550_v59, %v4549_v23  ;;  %v10914_v43 = vpack.c.bf16 %v4552_v9, %v4551_v2  ;;  %v4553_v21 = vld [vmem:[%s11489_s12 + $0xe0] sm:$0xff]  ;;  %v10924_v26 = vpack.c.bf16 %v4536_v35, %v4535_v20  ;;  %v4538_v59 = vld [vmem:[%s11489_s12 + $0x68] sm:$0xff]  ;;  %v4556_v2 = vld [vmem:[%s11489_s12 + $0xf8] sm:$0xff] }
0x318a   :  { %8725 = vmatpush3.bf16.msra.mxu1 %v10649_v50  ;;  %7879 = vmatprep.mubr.msk.f32.mxu1 %vm9417_vm0, %v11496_v4  ;;  %11540 = vst [vmem:[#allocation10_spill] sm:$0xff] %v10864_v57  ;;  %11541 = vst [vmem:[#allocation11_spill] sm:$0xff] %v10874_v6  ;;  %v4537_v23 = vld [vmem:[%s11489_s12 + $0x60] sm:$0xff]  ;;  %v10934_v54 = vpack.c.bf16 %v4554_v24, %v4553_v21  ;;  %v4539_v20 = vld [vmem:[%s11489_s12 + $0x70] sm:$0xff]  ;;  %v10954_v21 = vpack.c.bf16 %v4556_v2, %v4555_v38 }
0x318b   :  { %8726 = vmatprep.subr.bf16.mxu1 %v11524_v12  ;;  %11543 = vst [vmem:[#allocation13_spill] sm:$0xff] %v10894_v1  ;;  %11545 = vst [vmem:[#allocation15_spill] sm:$0xff] %v10914_v43  ;;  %v10944_v9 = vpack.c.bf16 %v4538_v59, %v4537_v23  ;;  %v4540_v35 = vld [vmem:[%s11489_s12 + $0x78] sm:$0xff]  ;;  %v4557_v24 = vld [vmem:[%s11489_s12 + $0x100] sm:$0xff] }
0x318c   :  { %8704 = vmatpush3.bf16.msra.mxu0 %v10660_v39  ;;  %11546 = vst [vmem:[#allocation16_spill] sm:$0xff] %v10924_v26  ;;  %11547 = vst [vmem:[#allocation17_spill] sm:$0xff] %v10934_v54  ;;  %v4558_v23 = vld [vmem:[%s11489_s12 + $0x108] sm:$0xff]  ;;  %v10964_v59 = vpack.c.bf16 %v4540_v35, %v4539_v20  ;;  %v4573_v38 = vld [vmem:[%s11489_s12 + $0x180] sm:$0xff] }
0x318d   :  { %8705 = vmatprep.subr.bf16.mxu0 %v11524_v12  ;;  %11548 = vst [vmem:[#allocation18_spill] sm:$0xff] %v10944_v9  ;;  %11549 = vst [vmem:[#allocation19_spill] sm:$0xff] %v10954_v21  ;;  %v4574_v2 = vld [vmem:[%s11489_s12 + $0x188] sm:$0xff]  ;;  %v4559_v20 = vld [vmem:[%s11489_s12 + $0x110] sm:$0xff] }
0x318e   :  { %8728 = vmatpush3.bf16.msra.mxu1 %v10674_v55  ;;  %11550 = vst [vmem:[#allocation20_spill] sm:$0xff] %v10964_v59  ;;  %v4560_v35 = vld [vmem:[%s11489_s12 + $0x118] sm:$0xff] }
0x318f   :  { %8729 = vmatprep.subr.bf16.mxu1 %v11524_v12 }
0x3190   :  { %8707 = vmatpush3.bf16.msra.mxu0 %v10686_v32 }
0x3191   :  { %8708 = vmatprep.subr.bf16.mxu0 %v11524_v12 }
0x3192   :  { %8731 = vmatpush3.bf16.msra.mxu1 %v10696_v47 }
0x3193   :  { %8732 = vmatprep.subr.bf16.mxu1 %v11524_v12 }
0x3194   :  { %8710 = vmatpush3.bf16.msra.mxu0 %v10706_v63 }
0x3195   :  { %8711 = vmatprep.subr.bf16.mxu0 %v11524_v12 }
0x3196   :  { %8734 = vmatpush3.bf16.msra.mxu1 %v10716_v0 }
0x3197   :  { %8735 = vmatprep.subr.bf16.mxu1 %v11524_v12 }
0x3198   :  { %8713 = vmatpush3.bf16.msra.mxu0 %v10726_v5 }
0x3199   :  { %8714 = vmatprep.subr.bf16.mxu0 %v11524_v12 }
0x319a   :  { %8737 = vmatpush3.bf16.msra.mxu1 %v10736_v52 }
0x319b   :  { %8738 = vmatprep.subr.bf16.mxu1 %v11524_v12 }
0x319c   :  { %8716 = vmatpush3.bf16.msra.mxu0 %v10746_v19 }
0x319d   :  { %8717 = vmatprep.subr.bf16.mxu0 %v11524_v12 }
0x319e   :  { %8740 = vmatpush3.bf16.msra.mxu1 %v10756_v11 }
0x319f   :  { %8741 = vmatprep.subr.bf16.mxu1 %v11524_v12 }
0x31a0   :  { %8719 = vmatpush3.bf16.msra.mxu0 %v10766_v16 }
0x31a1   :  { %8720 = vmatprep.subr.bf16.mxu0 %v11524_v12 }
0x31a2   :  { %8743 = vmatpush3.bf16.msra.mxu1 %v10776_v34 }
0x31a3   :  { %8744 = vmatprep.subr.bf16.mxu1 %v11524_v12 }
0x31a4   :  { %8722 = vmatpush3.bf16.msra.mxu0 %v10786_v17 }
0x31a5   :  { %8747 = vmatprep.subr.bf16.mxu0 %v11524_v12 }
0x31a6   :  { %8746 = vmatpush3.bf16.msra.mxu1 %v10796_v58 }
0x31a7   :  { %7845 = vmatmul.mubr.f32.vlgmr.msra.gmra.mrb[50].mxu0 %v10647_v51  ;;  %8771 = vmatprep.subr.bf16.mxu1 %v11524_v12 }
0x31a8   :  { %8749 = vmatpush3.bf16.msra.mxu0 %v10806_v22  ;;  %7914 = vmatprep.mubr.msk.f32.mxu0 %vm9417_vm0, %v11496_v4 }
0x31a9   :  { %7880 = vmatmul.mubr.f32.vlgmr.msra.gmra.mrb[38].mxu1 %v11495_v62  ;;  %8750 = vmatprep.subr.bf16.mxu0 %v11524_v12  ;;  %v10974_v62 = vpack.c.bf16 %v4558_v23, %v4557_v24  ;;  %v4575_v24 = vld [vmem:[%s11489_s12 + $0x190] sm:$0xff]  ;;  %v4576_v23 = vld [vmem:[%s11489_s12 + $0x198] sm:$0xff] }
0x31aa   :  { %8773 = vmatpush3.bf16.msra.mxu1 %v10816_v37  ;;  %7949 = vmatprep.mubr.msk.f32.mxu1 %vm9417_vm0, %v11496_v4  ;;  %v10984_v4 = vpack.c.bf16 %v4574_v2, %v4573_v38  ;;  %v4562_v38 = vld [vmem:[%s11489_s12 + $0x128] sm:$0xff]  ;;  %v11009_v2 = vpack.c.bf16 %v4576_v23, %v4575_v24  ;;  %v4563_v24 = vld [vmem:[%s11489_s12 + $0x130] sm:$0xff]  ;;  %v4564_v23 = vld [vmem:[%s11489_s12 + $0x138] sm:$0xff] }
0x31ab   :  { %8774 = vmatprep.subr.bf16.mxu1 %v11524_v12  ;;  %11551 = vst [vmem:[#allocation21_spill] sm:$0xff] %v10974_v62 }
0x31ac   :  { %8752 = vmatpush3.bf16.msra.mxu0 %v10828_v56  ;;  %11552 = vst [vmem:[#allocation22_spill] sm:$0xff] %v10984_v4  ;;  %11555 = vst [vmem:[#allocation24_spill] sm:$0xff] %v11009_v2 }
0x31ad   :  { %8753 = vmatprep.subr.bf16.mxu0 %v11524_v12 }
0x31ae   :  { %8776 = vmatpush3.bf16.msra.mxu1 %v10842_v18 }
0x31af   :  { %8777 = vmatprep.subr.bf16.mxu1 %v11524_v12 }
0x31b0   :  { %8755 = vmatpush3.bf16.msra.mxu0 %v10854_v10 }
0x31b1   :  { %8756 = vmatprep.subr.bf16.mxu0 %v11524_v12 }
0x31b2   :  { %8779 = vmatpush3.bf16.msra.mxu1 %v10864_v57 }
0x31b3   :  { %8780 = vmatprep.subr.bf16.mxu1 %v11524_v12 }
0x31b4   :  { %8758 = vmatpush3.bf16.msra.mxu0 %v10874_v6  ;;  %v5691_v6 = vld [vmem:[#allocation7 + $0x7] sm:$0x1] }
0x31b5   :  { %8759 = vmatprep.subr.bf16.mxu0 %v11524_v12 }
0x31b6   :  { %8782 = vmatpush3.bf16.msra.mxu1 %v10884_v27 }
0x31b7   :  { %8783 = vmatprep.subr.bf16.mxu1 %v11524_v12 }
0x31b8   :  { %8761 = vmatpush3.bf16.msra.mxu0 %v10894_v1  ;;  %v5693_v1 = vld [vmem:[#allocation6 + $0x3] sm:$0x1] }
0x31b9   :  { %8762 = vmatprep.subr.bf16.mxu0 %v11524_v12 }
0x31ba   :  { %8785 = vmatpush3.bf16.msra.mxu1 %v10904_v49  ;;  %v4588_v49 = vld [vmem:[%s11489_s12 + $0x1f8] sm:$0xff] }
0x31bb   :  { %8786 = vmatprep.subr.bf16.mxu1 %v11524_v12 }
0x31bc   :  { %8764 = vmatpush3.bf16.msra.mxu0 %v10914_v43  ;;  %v5690_v43 = vld [vmem:[#allocation7 + $0x5] sm:$0x1] }
0x31bd   :  { %8765 = vmatprep.subr.bf16.mxu0 %v11524_v12  ;;  %v5704_v57 = vrot.slane %v5690_v43, 6 }
0x31be   :  { %8788 = vmatpush3.bf16.msra.mxu1 %v10924_v26 }
0x31bf   :  { %8789 = vmatprep.subr.bf16.mxu1 %v11524_v12 }
0x31c0   :  { %8767 = vmatpush3.bf16.msra.mxu0 %v10934_v54  ;;  %v5692_v54 = vld [vmem:[#allocation6 + $0x1] sm:$0x1] }
0x31c1   :  { %8768 = vmatprep.subr.bf16.mxu0 %v11524_v12 }
0x31c2   :  { %8791 = vmatpush3.bf16.msra.mxu1 %v10944_v9 }
0x31c3   :  { %8792 = vmatprep.subr.bf16.mxu1 %v11524_v12 }
0x31c4   :  { %8770 = vmatpush3.bf16.msra.mxu0 %v10954_v21  ;;  %v10996_v21 = vpack.c.bf16 %v4560_v35, %v4559_v20  ;;  %v4577_v20 = vld [vmem:[%s11489_s12 + $0x1a0] sm:$0xff]  ;;  %v4578_v35 = vld [vmem:[%s11489_s12 + $0x1a8] sm:$0xff] }
0x31c5   :  { %8795 = vmatprep.subr.bf16.mxu0 %v11524_v12 }
0x31c6   :  { %8794 = vmatpush3.bf16.msra.mxu1 %v10964_v59  ;;  %11553 = vst [vmem:[#allocation23_spill] sm:$0xff] %v10996_v21  ;;  %v11554_v59 = vmov 0.0  }
0x31c7   :  { %7915 = vmatmul.mubr.f32.vlgmr.msra.gmra.mrb[52].mxu0 %v5070_v13  ;;  %8819 = vmatprep.subr.bf16.mxu1 %v11524_v12  ;;  %v4561_v13 = vld [vmem:[%s11489_s12 + $0x120] sm:$0xff] }
0x31c8   :  { %8797 = vmatpush3.bf16.msra.mxu0 %v10974_v62  ;;  %7984 = vmatprep.mubr.msk.f32.mxu0 %vm9417_vm0, %v11554_v59  ;;  %v11021_v62 = vpack.c.bf16 %v4562_v38, %v4561_v13  ;;  %v4579_v13 = vld [vmem:[%s11489_s12 + $0x1b0] sm:$0xff]  ;;  %v4580_v38 = vld [vmem:[%s11489_s12 + $0x1b8] sm:$0xff] }
0x31c9   :  { %7950 = vmatmul.mubr.f32.vlgmr.msra.gmra.mrb[40].mxu1 %v10647_v51  ;;  %8798 = vmatprep.subr.bf16.mxu0 %v11524_v12 }
0x31ca   :  { %8821 = vmatpush3.bf16.msra.mxu1 %v10984_v4  ;;  %8019 = vmatprep.mubr.msk.f32.mxu1 %vm9417_vm0, %v11554_v59  ;;  %11556 = vst [vmem:[#allocation25_spill] sm:$0xff] %v11021_v62  ;;  %v11031_v4 = vpack.c.bf16 %v4578_v35, %v4577_v20  ;;  %v4565_v20 = vld [vmem:[%s11489_s12 + $0x140] sm:$0xff]  ;;  %v4566_v35 = vld [vmem:[%s11489_s12 + $0x148] sm:$0xff] }
0x31cb   :  { %8822 = vmatprep.subr.bf16.mxu1 %v11524_v12 }
0x31cc   :  { %8800 = vmatpush3.bf16.msra.mxu0 %v10996_v21  ;;  %11557 = vst [vmem:[#allocation26_spill] sm:$0xff] %v11031_v4  ;;  %v11041_v21 = vpack.c.bf16 %v4564_v23, %v4563_v24  ;;  %v4581_v24 = vld [vmem:[%s11489_s12 + $0x1c0] sm:$0xff]  ;;  %v4582_v23 = vld [vmem:[%s11489_s12 + $0x1c8] sm:$0xff] }
0x31cd   :  { %8801 = vmatprep.subr.bf16.mxu0 %v11524_v12 }
0x31ce   :  { %8824 = vmatpush3.bf16.msra.mxu1 %v11009_v2  ;;  %11558 = vst [vmem:[#allocation27_spill] sm:$0xff] %v11041_v21  ;;  %v11051_v2 = vpack.c.bf16 %v4580_v38, %v4579_v13  ;;  %v4567_v13 = vld [vmem:[%s11489_s12 + $0x150] sm:$0xff]  ;;  %v4568_v38 = vld [vmem:[%s11489_s12 + $0x158] sm:$0xff] }
0x31cf   :  { %8825 = vmatprep.subr.bf16.mxu1 %v11524_v12 }
0x31d0   :  { %8803 = vmatpush3.bf16.msra.mxu0 %v11021_v62  ;;  %11559 = vst [vmem:[#allocation28_spill] sm:$0xff] %v11051_v2  ;;  %v11061_v62 = vpack.c.bf16 %v4566_v35, %v4565_v20  ;;  %v4583_v20 = vld [vmem:[%s11489_s12 + $0x1d0] sm:$0xff]  ;;  %v4584_v35 = vld [vmem:[%s11489_s12 + $0x1d8] sm:$0xff] }
0x31d1   :  { %8804 = vmatprep.subr.bf16.mxu0 %v11524_v12 }
0x31d2   :  { %8827 = vmatpush3.bf16.msra.mxu1 %v11031_v4  ;;  %11560 = vst [vmem:[#allocation29_spill] sm:$0xff] %v11061_v62  ;;  %v11071_v4 = vpack.c.bf16 %v4582_v23, %v4581_v24  ;;  %v4569_v24 = vld [vmem:[%s11489_s12 + $0x160] sm:$0xff]  ;;  %v4570_v23 = vld [vmem:[%s11489_s12 + $0x168] sm:$0xff] }
0x31d3   :  { %8828 = vmatprep.subr.bf16.mxu1 %v11524_v12  ;;  %v11101_v9 = vpack.c.bf16 %v4570_v23, %v4569_v24  ;;  %v4587_v23 = vld [vmem:[%s11489_s12 + $0x1f0] sm:$0xff] }
0x31d4   :  { %8806 = vmatpush3.bf16.msra.mxu0 %v11041_v21  ;;  %11561 = vst [vmem:[#allocation30_spill] sm:$0xff] %v11071_v4  ;;  %v11081_v21 = vpack.c.bf16 %v4568_v38, %v4567_v13  ;;  %v4585_v13 = vld [vmem:[%s11489_s12 + $0x1e0] sm:$0xff]  ;;  %v4586_v38 = vld [vmem:[%s11489_s12 + $0x1e8] sm:$0xff] }
0x31d5   :  { %8807 = vmatprep.subr.bf16.mxu0 %v11524_v12  ;;  %11564 = vst [vmem:[#allocation33_spill] sm:$0xff] %v11101_v9  ;;  %v11111_v26 = vpack.c.bf16 %v4586_v38, %v4585_v13  ;;  %v5715_v38 = vrot.slane %v5692_v54, 4 }
0x31d6   :  { %8830 = vmatpush3.bf16.msra.mxu1 %v11051_v2  ;;  %11562 = vst [vmem:[#allocation31_spill] sm:$0xff] %v11081_v21  ;;  %v11091_v2 = vpack.c.bf16 %v4584_v35, %v4583_v20  ;;  %v4571_v20 = vld [vmem:[%s11489_s12 + $0x170] sm:$0xff]  ;;  %v4572_v35 = vld [vmem:[%s11489_s12 + $0x178] sm:$0xff] }
0x31d7   :  { %8831 = vmatprep.subr.bf16.mxu1 %v11524_v12  ;;  %v11121_v27 = vpack.c.bf16 %v4572_v35, %v4571_v20  ;;  %v11132_v20 = vpack.c.bf16 %v4588_v49, %v4587_v23  ;;  %v5716_v35 = vrot.slane %v5693_v1, 3  ;;  %v4591_v1 = vld [vmem:[%s11489_s12 + $0x210] sm:$0xff]  ;;  %v4592_v49 = vld [vmem:[%s11489_s12 + $0x218] sm:$0xff]  ;;  %v4593_v23 = vld [vmem:[%s11489_s12 + $0x220] sm:$0xff] }
0x31d8   :  { %8809 = vmatpush3.bf16.msra.mxu0 %v11061_v62  ;;  %11563 = vst [vmem:[#allocation32_spill] sm:$0xff] %v11091_v2  ;;  %v5689_v62 = vld [vmem:[#allocation7 + $0x3] sm:$0x1] }
0x31d9   :  { %8810 = vmatprep.subr.bf16.mxu0 %v11524_v12  ;;  %v5702_v24 = vrot.slane %v5689_v62, 7  ;;  %v4589_v62 = vld [vmem:[%s11489_s12 + $0x200] sm:$0xff]  ;;  %v5717_v18 = vsel %vm4647_vm4, %v5716_v35, %v5715_v38  ;;  %v4596_v35 = vld [vmem:[%s11489_s12 + $0x238] sm:$0xff] }
0x31da   :  { %8833 = vmatpush3.bf16.msra.mxu1 %v11071_v4  ;;  %v5688_v4 = vld [vmem:[#allocation7 + $0x1] sm:$0x1] }
0x31db   :  { %8834 = vmatprep.subr.bf16.mxu1 %v11524_v12  ;;  %v5703_v13 = vsel %vm4630_vm6, %v5702_v24, %v5688_v4  ;;  %v5695_v4 = vld [vmem:[#allocation6 + $0x7] sm:$0x1] }
0x31dc   :  { %8812 = vmatpush3.bf16.msra.mxu0 %v11081_v21  ;;  %v5694_v21 = vld [vmem:[#allocation6 + $0x5] sm:$0x1]  ;;  %v5705_v54 = vsel %vm4633_vm7, %v5704_v57, %v5703_v13  ;;  %v4594_v13 = vld [vmem:[%s11489_s12 + $0x228] sm:$0xff] }
0x31dd   :  { %8813 = vmatprep.subr.bf16.mxu0 %v11524_v12  ;;  %v5718_v10 = vrot.slane %v5694_v21, 2  ;;  %v5720_v21 = vrot.slane %v5695_v4, 1  ;;  %v11172_v38 = vpack.c.bf16 %v4594_v13, %v4593_v23  ;;  %v4599_v23 = vld [vmem:[%s11489_s12 + $0x250] sm:$0xff] }
0x31de   :  { %8836 = vmatpush3.bf16.msra.mxu1 %v11091_v2  ;;  %v4590_v2 = vld [vmem:[%s11489_s12 + $0x208] sm:$0xff] }
0x31df   :  { %8837 = vmatprep.subr.bf16.mxu1 %v11524_v12  ;;  %v11137_v24 = vpack.c.bf16 %v4590_v2, %v4589_v62  ;;  %v5719_v43 = vsel %vm4650_vm5, %v5718_v10, %v5717_v18  ;;  %v5512_v2 = vrot.slane %v10647_v51, 3  ;;  %v11156_v10 = vpack.c.bf16 %v4592_v49, %v4591_v1  ;;  %11568 = vst [vmem:[#allocation36_spill] sm:$0xff] %v11172_v38  ;;  %v4595_v62 = vld [vmem:[%s11489_s12 + $0x230] sm:$0xff]  ;;  %v5681_v1 = vld [vmem:[#allocation5 + $0x3] sm:$0x1] }
0x31e0   :  { %8815 = vmatpush3.bf16.msra.mxu0 %v11101_v9  ;;  %v5706_v9 = vrot.slane %v5691_v6, 5  ;;  %v11566_v6 = vrot.slane %v10647_v51, 2  ;;  %v5721_v18 = vsel %vm4653_vm8, %v5720_v21, %v5719_v43  ;;  %v11184_v4 = vpack.c.bf16 %v4596_v35, %v4595_v62  ;;  %v4598_v43 = vld [vmem:[%s11489_s12 + $0x248] sm:$0xff]  ;;  %v5696_v49 = vld [vmem:[#allocation6 + $0x9] sm:$0x1] }
0x31e1   :  { %8816 = vmatprep.subr.bf16.mxu0 %v11524_v12  ;;  %11565 = vst [vmem:[#allocation34_spill] sm:$0xff] %v11137_v24  ;;  %11567 = vst [vmem:[#allocation35_spill] sm:$0xff] %v11156_v10  ;;  %v5683_v62 = vld [vmem:[#allocation5 + $0x7] sm:$0x1] }
0x31e2   :  { %8839 = vmatpush3.bf16.msra.mxu1 %v11111_v26  ;;  %v5707_v57 = vsel %vm4636_vm9, %v5706_v9, %v5705_v54  ;;  %11569 = vst [vmem:[#allocation37_spill] sm:$0xff] %v11184_v4  ;;  %v4597_v54 = vld [vmem:[%s11489_s12 + $0x240] sm:$0xff] }
0x31e3   :  { %8840 = vmatprep.subr.bf16.mxu1 %v11524_v12  ;;  %v5725_v9 = vsel %vm4658_vm10, %v5707_v57, %v5721_v18  ;;  %v5680_v57 = vld [vmem:[#allocation5 + $0x1] sm:$0x1]  ;;  %v11196_v21 = vpack.c.bf16 %v4598_v43, %v4597_v54  ;;  %v4601_v43 = vld [vmem:[%s11489_s12 + $0x260] sm:$0xff] }
0x31e4   :  { %8818 = vmatpush3.bf16.msra.mxu0 %v11121_v27 }
0x31e5   :  { %8843 = vmatprep.subr.bf16.mxu0 %v11524_v12  ;;  %11570 = vst [vmem:[#allocation38_spill] sm:$0xff] %v11196_v21 }
0x31e6   :  { %8842 = vmatpush3.bf16.msra.mxu1 %v11132_v20 }
0x31e7   :  { %7985 = vmatmul.mubr.f32.vlgmr.msra.gmra.mrb[54].mxu0 %v11566_v6  ;;  %8868 = vmatprep.subr.bf16.mxu1 %v10300_v31  ;;  %v5682_v6 = vld [vmem:[#allocation5 + $0x5] sm:$0x1] }
0x31e8   :  { %8845 = vmatpush3.bf16.msra.mxu0 %v11137_v24  ;;  %8054 = vmatprep.mubr.msk.f32.mxu0 %vm9417_vm0, %v11554_v59  ;;  %v5816_v35 = vrot.slane %v5682_v6, 6  ;;  %v5686_v6 = vld [vmem:[#allocation5 + $0xd] sm:$0x1] }
0x31e9   :  { %8020 = vmatmul.mubr.f32.vlgmr.msra.gmra.mrb[42].mxu1 %v5512_v2  ;;  %8846 = vmatprep.subr.bf16.mxu0 %v11524_v12  ;;  %v5814_v2 = vrot.slane %v5681_v1, 7 }
0x31ea   :  { %8870 = vmatpush3.bf16.msra.mxu1 %v10300_v31  ;;  %8073 = vmatprep.mubr.msk.f32.mxu1 %vm4660_vm11, %v5725_v9  ;;  %v5697_v31 = vld [vmem:[#allocation6 + $0xb] sm:$0x1] }
0x31eb   :  { %8872 = vmatprep.subr.bf16.mxu1 %v10311_v36  ;;  %v5815_v13 = vsel %vm4630_vm6, %v5814_v2, %v5680_v57  ;;  %v5685_v57 = vld [vmem:[#allocation5 + $0xb] sm:$0x1] }
0x31ec   :  { %8848 = vmatpush3.bf16.msra.mxu0 %v11156_v10  ;;  %v5817_v1 = vsel %vm4633_vm7, %v5816_v35, %v5815_v13 }
0x31ed   :  { %8849 = vmatprep.subr.bf16.mxu0 %v11524_v12 }
0x31ee   :  { %8874 = vmatpush3.bf16.msra.mxu1 %v10311_v36  ;;  %v5722_v36 = vrot.slane %v5697_v31, 7 }
0x31ef   :  { %8876 = vmatprep.subr.bf16.mxu1 %v10323_v3 }
0x31f0   :  { %8851 = vmatpush3.bf16.msra.mxu0 %v11172_v38  ;;  %v5723_v18 = vsel %vm4630_vm6, %v5722_v36, %v5696_v49  ;;  %v5818_v49 = vrot.slane %v5683_v62, 5  ;;  %v5824_v62 = vrot.slane %v5686_v6, 2 }
0x31f1   :  { %8852 = vmatprep.subr.bf16.mxu0 %v11524_v12  ;;  %v8884_v31 = vpack.c.bf16 %v5723_v18, %v5725_v9  ;;  %v5684_v9 = vld [vmem:[#allocation5 + $0x9] sm:$0x1] }
0x31f2   :  { %8878 = vmatpush3.bf16.msra.mxu1 %v10323_v3  ;;  %v4600_v3 = vld [vmem:[%s11489_s12 + $0x258] sm:$0xff]  ;;  %v5819_v2 = vsel %vm4636_vm9, %v5818_v49, %v5817_v1 }
0x31f3   :  { %8880 = vmatprep.subr.bf16.mxu1 %v10339_v14  ;;  %v11210_v54 = vpack.c.bf16 %v4600_v3, %v4599_v23  ;;  %v5687_v23 = vld [vmem:[#allocation5 + $0xf] sm:$0x1]  ;;  %v5820_v3 = vrot.slane %v5684_v9, 4  ;;  %v5585_v9 = vrot.slane %v10647_v51, 4 }
0x31f4   :  { %8854 = vmatpush3.bf16.msra.mxu0 %v11184_v4 }
0x31f5   :  { %8855 = vmatprep.subr.bf16.mxu0 %v11524_v12  ;;  %11571 = vst [vmem:[#allocation39_spill] sm:$0xff] %v11210_v54  ;;  %v5821_v13 = vsel %vm4756_vm12, %v5820_v3, %v5819_v2 }
0x31f6   :  { %8882 = vmatpush3.bf16.msra.mxu1 %v10339_v14  ;;  %v4602_v14 = vld [vmem:[%s11489_s12 + $0x268] sm:$0xff] }
0x31f7   :  { %8883 = vmatprep.subr.bf16.mxu1 %v11524_v12  ;;  %v11227_v36 = vpack.c.bf16 %v4602_v14, %v4601_v43  ;;  %v5826_v43 = vrot.slane %v5687_v23, 1 }
0x31f8   :  { %8857 = vmatpush3.bf16.msra.mxu0 %v11196_v21 }
0x31f9   :  { %8074 = vmatmul.mubr.msk.f32.vlgmr.msra.gmra.mrb[44].mxu1 %vm4660_vm11, %v5723_v18  ;;  %8858 = vmatprep.subr.bf16.mxu0 %v11524_v12  ;;  %11572 = vst [vmem:[#allocation40_spill] sm:$0xff] %v11227_v36  ;;  %v4604_v18 = vld [vmem:[%s11489_s12 + $0x278] sm:$0xff] }
0x31fa   :  { %8886 = vmatpush3.bf16.msk.msra.mxu1 %vm10444_vm15, %v8884_v31  ;;  %8085 = vmatprep.mubr.msk.f32.mxu1 %vm9417_vm0, %v11554_v59  ;;  %v11239_v35 = vpack.c.bf16 %v4604_v18, %v4603_v44  ;;  %v5822_v31 = vrot.slane %v5685_v57, 3  ;;  %v11257_v18 = vld [vmem:[%s11490_s9] ss:$0 sm:$0xff] }
0x31fb   :  { %8887 = vmatprep.subr.bf16.mxu1 %v11524_v12  ;;  %11574 = vst [vmem:[#allocation42_spill] sm:$0xff] %v11257_v18 }
0x31fc   :  { %8860 = vmatpush3.bf16.msra.mxu0 %v11210_v54  ;;  %11573 = vst [vmem:[#allocation41_spill] sm:$0xff] %v11239_v35  ;;  %v5823_v14 = vsel %vm4647_vm4, %v5822_v31, %v5821_v13  ;;  %vm5293_vm4 = vcmask 1045504  }
0x31fd   :  { %8861 = vmatprep.subr.bf16.mxu0 %v11524_v12  ;;  %v5825_v1 = vsel %vm4650_vm5, %v5824_v62, %v5823_v14  ;;  %vm5676_vm5 = vcmask 1040384  }
0x31fe   :  { %v11246_v49 = vsel %vm4653_vm8, %v5826_v43, %v5825_v1  ;;  %v11263_v43 = vld [vmem:[%s11491_s11] ss:$0 sm:$0xff] }
0x31ff   :  { %11575 = vst [vmem:[#allocation43_spill] sm:$0xff] %v11263_v43 }
0x3200   :  { %8863 = vmatpush3.bf16.msra.mxu0 %v11227_v36 }
0x3201   :  { %8864 = vmatprep.subr.bf16.mxu0 %v11524_v12 }
0x3204   :  { %8866 = vmatpush3.bf16.msra.mxu0 %v11239_v35 }
0x3205   :  { %8076 = vmatprep.subr.msk.mxu0 %vm4660_vm11, %v11246_v49 }
0x3207   :  { %8055 = vmatmul.mubr.f32.vlgmr.msra.gmra.mrb[56].mxu0 %v5585_v9 }
0x320d   :  { %8077 = vmatpush3.xpose.msk.msra.mxu0 %vm4660_vm11, %v11246_v49 }
0x320e   :  { %8911 = vmatprep.subr.bf16.mxu0 %v11524_v12 }
0x325a   :  { %v5058_v57 = vpop.f32.mrb[48].mxu0 }
0x325b   :  { %v7776_v6 = vpop.f32.mrb[49].mxu0  ;;  %v5059_v23 = vadd.f32 %v11257_v18, %v5058_v57 }
0x325c   :  { %v5138_v2 = vpop.f32.mrb[36].mxu1 }
0x325d   :  { %v7811_v44 = vpop.f32.mrb[37].mxu1  ;;  %v5062_v3 = vmax.f32 %v5059_v23, 0.0 }
0x325f   :  { %v5063_v13 = vrot.slane %v5062_v3, 4 }
0x3261   :  { %v5064_v6 = vmax.f32 %v5062_v3, %v5063_v13 }
0x3263   :  { %v5065_v35 = vrot.slane %v5064_v6, 2 }
0x3265   :  { %v5066_v18 = vmax.f32 %v5064_v6, %v5065_v35 }
0x327a   :  { %v5208_v51 = vpop.f32.mrb[50].mxu0 }
0x327b   :  { %v5209_v62 = vadd.f32 %v5208_v51, %v5138_v2  ;;  %v7846_v31 = vpop.f32.mrb[51].mxu0 }
0x327c   :  { %v5280_v14 = vpop.f32.mrb[38].mxu1  ;;  %v5067_v31 = vrot.slane %v5066_v18, 1 }
0x327d   :  { %v5284_v1 = vadd.f32 %v5280_v14, %v5209_v62  ;;  %v7881_v9 = vpop.f32.mrb[39].mxu1 }
0x327e   :  { %v5068_v21 = vmax.f32 %v5066_v18, %v5067_v31 }
0x327f   :  { %v5291_v44 = vadd.f32 %v11263_v43, %v5284_v1 }
0x3281   :  { %v5292_v12 = vmax.f32 %v5291_v44, 0.0 }
0x3283   :  { %v5294_v57 = vsel %vm5293_vm4, %v5292_v12, -inf }
0x3284   :  { %v5295_v23 = vrot.slane %v5294_v57, 4 }
0x3286   :  { %v5296_v2 = vmax.f32 %v5294_v57, %v5295_v23 }
0x3288   :  { %v5297_v51 = vrot.slane %v5296_v2, 2 }
0x328a   :  { %v5298_v36 = vmax.f32 %v5296_v2, %v5297_v51 }
0x328c   :  { %v5299_v54 = vrot.slane %v5298_v36, 1 }
0x328e   :  { %v5300_v4 = vmax.f32 %v5298_v36, %v5299_v54 }
0x3290   :  { %v5673_v38 = vmax.f32 %v5068_v21, %v5300_v4  ;;  %v11576_v4 = vmov 0.0|0.0  }
0x329a   :  { %v5367_v62 = vpop.f32.mrb[52].mxu0 }
0x329b   :  { %v7916_v14 = vpop.f32.mrb[53].mxu0 }
0x329c   :  { %v5437_v3 = vpop.f32.mrb[40].mxu1 }
0x329d   :  { %v5438_v13 = vadd.f32 %v5437_v3, %v5367_v62  ;;  %v7951_v1 = vpop.f32.mrb[41].mxu1 }
0x32ba   :  { %v5507_v9 = vpop.f32.mrb[54].mxu0 }
0x32bb   :  { %v5511_v44 = vadd.f32 %v5507_v9, %v5438_v13  ;;  %v7986_v43 = vpop.f32.mrb[55].mxu0 }
0x32bc   :  { %v5580_v10 = vpop.f32.mrb[42].mxu1 }
0x32bd   :  { %v5584_v12 = vadd.f32 %v5580_v10, %v5511_v44  ;;  %v8021_v24 = vpop.f32.mrb[43].mxu1 }
0x32be   :  { %v11280_v24 = vld [vmem:[%s11492_s13] ss:$0 sm:$0xff] }
0x32cc   :  { %v8075_v35 = vpop.f32.mrb[44].mxu1 }
0x32cd   :  { %v5797_v6 = vpop.f32.mrb[45].mxu1 }
0x32ce   :  { %8078 = vmatprep.mubr.msk.f32.mxu0 %vm4660_vm11, %v5797_v6 }
0x32cf   :  { %8079 = vmatmul.mubr.msk.f32.vlgmr.msra.gmra.mrb[58].mxu0 %vm4660_vm11, %v8075_v35 }
0x32d0   :  { %8913 = vmatpush3.bf16.msra.mxu0 %v10484_v33  ;;  %8155 = vmatprep.mubr.msk.f32.mxu0 %vm9417_vm0, %v11554_v59 }
0x32d1   :  { %8914 = vmatprep.subr.bf16.mxu0 %v11576_v4 }
0x32d4   :  { %8916 = vmatpush3.bf16.msra.mxu0 %v10497_v42 }
0x32d5   :  { %8917 = vmatprep.subr.bf16.mxu0 %v11576_v4 }
0x32d8   :  { %8919 = vmatpush3.bf16.msra.mxu0 %v10517_v25 }
0x32d9   :  { %8920 = vmatprep.subr.bf16.mxu0 %v11576_v4 }
0x32da   :  { %v5653_v10 = vpop.f32.mrb[56].mxu0 }
0x32db   :  { %v5657_v33 = vadd.f32 %v5653_v10, %v5584_v12  ;;  %v8056_v21 = vpop.f32.mrb[57].mxu0 }
0x32dc   :  { %8922 = vmatpush3.bf16.msra.mxu0 %v10537_v40 }
0x32dd   :  { %v5664_v54 = vadd.f32 %v11280_v24, %v5657_v33  ;;  %8923 = vmatprep.subr.bf16.mxu0 %v11576_v4 }
0x32df   :  { %v5665_v42 = vmax.f32 %v5664_v54, 0.0  ;;  %v11301_v54 = vld [vmem:[%s11493_s14] sm:$0x1] }
0x32e0   :  { %8925 = vmatpush3.bf16.msra.mxu0 %v10557_v61 }
0x32e1   :  { %v5666_v25 = vsel %vm4658_vm10, %v5665_v42, -inf  ;;  %8926 = vmatprep.subr.bf16.mxu0 %v11576_v4 }
0x32e2   :  { %v5667_v36 = vrot.slane %v5666_v25, 4 }
0x32e4   :  { %v5668_v18 = vmax.f32 %v5666_v25, %v5667_v36  ;;  %8928 = vmatpush3.bf16.msra.mxu0 %v10577_v7 }
0x32e5   :  { %8929 = vmatprep.subr.bf16.mxu0 %v11576_v4 }
0x32e6   :  { %v5669_v43 = vrot.slane %v5668_v18, 2 }
0x32e8   :  { %v5670_v57 = vmax.f32 %v5668_v18, %v5669_v43  ;;  %8931 = vmatpush3.bf16.msra.mxu0 %v10597_v15  ;;  %v11599_v18 = vld [vmem:[#allocation30_spill] sm:$0xff]  ;;  %v11600_v43 = vld [vmem:[#allocation31_spill] sm:$0xff] }
0x32e9   :  { %8932 = vmatprep.subr.bf16.mxu0 %v11576_v4 }
0x32ea   :  { %v5671_v40 = vrot.slane %v5670_v57, 1 }
0x32ec   :  { %v5672_v23 = vmax.f32 %v5670_v57, %v5671_v40  ;;  %8934 = vmatpush3.bf16.msra.mxu0 %v10617_v28  ;;  %v11601_v57 = vld [vmem:[#allocation32_spill] sm:$0xff]  ;;  %v11602_v40 = vld [vmem:[#allocation33_spill] sm:$0xff] }
0x32ed   :  { %8959 = vmatprep.subr.bf16.mxu0 %v11576_v4 }
0x32ee   :  { %v5674_v61 = vmax.f32 %v5673_v38, %v5672_v23 }
0x32f0   :  { %v5675_v42 = vmul.f32 %v5674_v61, %v11301_v54  ;;  %v11603_v61 = vld [vmem:[#allocation34_spill] sm:$0xff] }
0x32f2   :  { %v5677_v25 = vsel %vm5676_vm5, %v5675_v42, 0.0 }
0x33a2   :  { %v8080_v2 = vpop.f32.mrb[58].mxu0 }
0x33a3   :  { %v5902_v51 = vpop.f32.mrb[59].mxu0  ;;  %v5914_v31 = vsel %vm4851_vm1, %v8080_v2, -inf }
0x33a4   :  { %5915 = vmax.xlane.f32.xlu1 %v5914_v31  ;;  %v5911_v7 = vsel %vm4847_vm2, %v5902_v51, -inf  ;;  %v11610_v31 = vld [vmem:[#allocation41_spill] sm:$0xff] }
0x33a5   :  { %5912 = vmax.xlane.f32.xlu0 %v5911_v7 }
0x3431   :  { %v5916_v62 = vpop.xlane.xlu1 %5915 }
0x3432   :  { %v5918_v14 = vsub.f32 %v8080_v2, %v5916_v62  ;;  %v5913_v15 = vpop.xlane.xlu0 %5912  ;;  %v11607_v2 = vld [vmem:[#allocation38_spill] sm:$0xff] }
0x3433   :  { %v5917_v3 = vsub.f32 %v5902_v51, %v5913_v15  ;;  %v11609_v51 = vld [vmem:[#allocation40_spill] sm:$0xff] }
0x3434   :  { %v5921_v13 = vmul.f32 1.442695, %v5918_v14 }
0x3435   :  { %v5919_v1 = vmul.f32 1.442695, %v5917_v3 }
0x3437   :  { %9406 = vpow2.f32 %v5919_v1 }
0x3438   :  { %9408 = vpow2.f32 %v5921_v13  ;;  %v11611_v13 = vld [vmem:[#allocation42_spill] sm:$0xff] }
0x3441   :  { %v9407_v28 = vpop.eup %9406 }
0x3442   :  { %v5923_v9 = vsel %vm4847_vm2, %v9407_v28, 0.0  ;;  %v9409_v38 = vpop.eup %9408 }
0x3443   :  { %5924 = vadd.xlane.f32.xlu0 %v5923_v9  ;;  %v5926_v44 = vsel %vm4851_vm1, %v9409_v38, 0.0 }
0x3447   :  { %5927 = vadd.xlane.f32.xlu0 %v5926_v44 }
0x34d0   :  { %v5925_v12 = vpop.xlane.xlu0 %5924 }
0x34d1   :  { %9410 = vrcp.f32 %v5925_v12 }
0x34d4   :  { %v5928_v35 = vpop.xlane.xlu0 %5927 }
0x34d5   :  { %9412 = vrcp.f32 %v5928_v35 }
0x34db   :  { %v9411_v6 = vpop.eup %9410 }
0x34dc   :  { %v5931_v10 = vmul.f32 %v9411_v6, %v9407_v28 }
0x34de   :  { %5933 = vxpose.xlu0.b32.start [1/2] (short) (narrow) %v5931_v10, 8 }
0x34df   :  { %v9413_v33 = vpop.eup %9412 }
0x34e0   :  { %v5932_v21 = vmul.f32 %v9413_v33, %v9409_v38  ;;  %v11612_v33 = vld [vmem:[#allocation43_spill] sm:$0xff] }
0x34e2   :  { %5934 = vxpose.xlu0.b32.end [2/2] (short) (narrow) %v5932_v21, 8 }
0x350f   :  { %5678 = vadd.xlane.f32.xlu0 %v5677_v25 }
0x355e   :  { %v5949_v36 = vpop.trf.xlu0 }
0x355f   :  { %8086 = vmatmul.mubr.msk.f32.vlgmr.msra.gmra.mrb[46].mxu1 %vm4903_vm3, %v5949_v36 }
0x3560   :  { %8889 = vmatpush3.bf16.msra.mxu1 %v10473_v41  ;;  %8120 = vmatprep.mubr.msk.f32.mxu1 %vm9417_vm0, %v11554_v59 }
0x3561   :  { %8890 = vmatprep.subr.bf16.mxu1 %v11576_v4 }
0x3564   :  { %8892 = vmatpush3.bf16.msra.mxu1 %v10493_v30 }
0x3565   :  { %8893 = vmatprep.subr.bf16.mxu1 %v11576_v4 }
0x3568   :  { %8895 = vmatpush3.bf16.msra.mxu1 %v10513_v60 }
0x3569   :  { %8896 = vmatprep.subr.bf16.mxu1 %v11576_v4 }
0x356c   :  { %8898 = vmatpush3.bf16.msra.mxu1 %v10533_v46 }
0x356d   :  { %8899 = vmatprep.subr.bf16.mxu1 %v11576_v4 }
0x3570   :  { %8901 = vmatpush3.bf16.msra.mxu1 %v10553_v53 }
0x3571   :  { %8902 = vmatprep.subr.bf16.mxu1 %v11576_v4 }
0x3574   :  { %8904 = vmatpush3.bf16.msra.mxu1 %v10573_v48 }
0x3575   :  { %8905 = vmatprep.subr.bf16.mxu1 %v11576_v4 }
0x3578   :  { %8907 = vmatpush3.bf16.msra.mxu1 %v10593_v8  ;;  %v11577_v8 = vld [vmem:[#allocation8_spill] sm:$0xff] }
0x3579   :  { %8908 = vmatprep.subr.bf16.mxu1 %v11576_v4 }
0x357c   :  { %8910 = vmatpush3.bf16.msra.mxu1 %v10613_v45  ;;  %v11578_v45 = vld [vmem:[#allocation9_spill] sm:$0xff] }
0x357d   :  { %8935 = vmatprep.subr.bf16.mxu1 %v11576_v4 }
0x3632   :  { %v6036_v41 = vpop.f32.mrb[46].mxu1 }
0x3633   :  { %6042 = vrot.lane.b32.xlu1 %v6036_v41, %s9418_s6  ;;  %v8087_v30 = vpop.f32.mrb[47].mxu1 }
0x36a5   :  { %v6043_v60 = vpop.permute.xlu1 %6042 }
0x36a6   :  { %v11327_v46 = vsel %vm4660_vm11, %v11246_v49, %v6043_v60  ;;  %v11598_v49 = vld [vmem:[#allocation29_spill] sm:$0xff] }
0x36a7   :  { %8121 = vmatmul.mubr.f32.vlgmr.msra.gmra.mrb[48].mxu1 %v11327_v46  ;;  %v6124_v53 = vrot.slane %v11327_v46, 1  ;;  %v6266_v48 = vrot.slane %v11327_v46, 2  ;;  %v6559_v23 = vrot.slane %v11327_v46, 3  ;;  %v6632_v7 = vrot.slane %v11327_v46, 4 }
0x36a8   :  { %8937 = vmatpush3.bf16.msra.mxu1 %v10637_v29  ;;  %8190 = vmatprep.mubr.msk.f32.mxu1 %vm9417_vm0, %v11554_v59  ;;  %v11579_v29 = vld [vmem:[#allocation10_spill] sm:$0xff] }
0x36a9   :  { %8156 = vmatmul.mubr.f32.vlgmr.msra.gmra.mrb[60].mxu0 %v6124_v53  ;;  %8938 = vmatprep.subr.bf16.mxu1 %v11576_v4 }
0x36aa   :  { %8961 = vmatpush3.bf16.msra.mxu0 %v10649_v50  ;;  %8225 = vmatprep.mubr.msk.f32.mxu0 %vm9417_vm0, %v11554_v59  ;;  %v11580_v50 = vld [vmem:[#allocation11_spill] sm:$0xff] }
0x36ab   :  { %8962 = vmatprep.subr.bf16.mxu0 %v11576_v4 }
0x36ac   :  { %8940 = vmatpush3.bf16.msra.mxu1 %v10660_v39  ;;  %v11581_v39 = vld [vmem:[#allocation12_spill] sm:$0xff] }
0x36ad   :  { %8941 = vmatprep.subr.bf16.mxu1 %v11576_v4 }
0x36ae   :  { %8964 = vmatpush3.bf16.msra.mxu0 %v10674_v55  ;;  %v11582_v55 = vld [vmem:[#allocation13_spill] sm:$0xff] }
0x36af   :  { %8965 = vmatprep.subr.bf16.mxu0 %v11576_v4 }
0x36b0   :  { %8943 = vmatpush3.bf16.msra.mxu1 %v10686_v32  ;;  %v11583_v32 = vld [vmem:[#allocation14_spill] sm:$0xff] }
0x36b1   :  { %8944 = vmatprep.subr.bf16.mxu1 %v11576_v4 }
0x36b2   :  { %8967 = vmatpush3.bf16.msra.mxu0 %v10696_v47  ;;  %v11584_v47 = vld [vmem:[#allocation15_spill] sm:$0xff] }
0x36b3   :  { %8968 = vmatprep.subr.bf16.mxu0 %v11576_v4 }
0x36b4   :  { %8946 = vmatpush3.bf16.msra.mxu1 %v10706_v63  ;;  %v11585_v63 = vld [vmem:[#allocation16_spill] sm:$0xff] }
0x36b5   :  { %8947 = vmatprep.subr.bf16.mxu1 %v11576_v4 }
0x36b6   :  { %8970 = vmatpush3.bf16.msra.mxu0 %v10716_v0  ;;  %v11586_v0 = vld [vmem:[#allocation17_spill] sm:$0xff] }
0x36b7   :  { %8971 = vmatprep.subr.bf16.mxu0 %v11576_v4 }
0x36b8   :  { %8949 = vmatpush3.bf16.msra.mxu1 %v10726_v5  ;;  %v11587_v5 = vld [vmem:[#allocation18_spill] sm:$0xff] }
0x36b9   :  { %8950 = vmatprep.subr.bf16.mxu1 %v11576_v4 }
0x36ba   :  { %8973 = vmatpush3.bf16.msra.mxu0 %v10736_v52  ;;  %v11588_v52 = vld [vmem:[#allocation19_spill] sm:$0xff] }
0x36bb   :  { %8974 = vmatprep.subr.bf16.mxu0 %v11576_v4 }
0x36bc   :  { %8952 = vmatpush3.bf16.msra.mxu1 %v10746_v19  ;;  %v11589_v19 = vld [vmem:[#allocation20_spill] sm:$0xff] }
0x36bd   :  { %8953 = vmatprep.subr.bf16.mxu1 %v11576_v4 }
0x36be   :  { %8976 = vmatpush3.bf16.msra.mxu0 %v10756_v11  ;;  %v11590_v11 = vld [vmem:[#allocation21_spill] sm:$0xff] }
0x36bf   :  { %8977 = vmatprep.subr.bf16.mxu0 %v11576_v4 }
0x36c0   :  { %8955 = vmatpush3.bf16.msra.mxu1 %v10766_v16  ;;  %v11591_v16 = vld [vmem:[#allocation22_spill] sm:$0xff] }
0x36c1   :  { %8956 = vmatprep.subr.bf16.mxu1 %v11576_v4 }
0x36c2   :  { %8979 = vmatpush3.bf16.msra.mxu0 %v10776_v34  ;;  %v11592_v34 = vld [vmem:[#allocation23_spill] sm:$0xff] }
0x36c3   :  { %8980 = vmatprep.subr.bf16.mxu0 %v11576_v4 }
0x36c4   :  { %8958 = vmatpush3.bf16.msra.mxu1 %v10786_v17  ;;  %v11593_v17 = vld [vmem:[#allocation24_spill] sm:$0xff] }
0x36c5   :  { %8983 = vmatprep.subr.bf16.mxu1 %v11576_v4 }
0x36c6   :  { %8982 = vmatpush3.bf16.msra.mxu0 %v10796_v58  ;;  %v11594_v58 = vld [vmem:[#allocation25_spill] sm:$0xff] }
0x36c7   :  { %8191 = vmatmul.mubr.f32.vlgmr.msra.gmra.mrb[50].mxu1 %v11327_v46  ;;  %9007 = vmatprep.subr.bf16.mxu0 %v11576_v4 }
0x36c8   :  { %8985 = vmatpush3.bf16.msra.mxu1 %v10806_v22  ;;  %8260 = vmatprep.mubr.msk.f32.mxu1 %vm9417_vm0, %v11554_v59  ;;  %v11595_v22 = vld [vmem:[#allocation26_spill] sm:$0xff] }
0x36c9   :  { %8226 = vmatmul.mubr.f32.vlgmr.msra.gmra.mrb[62].mxu0 %v6266_v48  ;;  %8986 = vmatprep.subr.bf16.mxu1 %v11576_v4 }
0x36ca   :  { %9009 = vmatpush3.bf16.msra.mxu0 %v10816_v37  ;;  %8295 = vmatprep.mubr.msk.f32.mxu0 %vm9417_vm0, %v11554_v59  ;;  %v11596_v37 = vld [vmem:[#allocation27_spill] sm:$0xff] }
0x36cb   :  { %9010 = vmatprep.subr.bf16.mxu0 %v11576_v4 }
0x36cc   :  { %8988 = vmatpush3.bf16.msra.mxu1 %v10828_v56  ;;  %v11597_v56 = vld [vmem:[#allocation28_spill] sm:$0xff] }
0x36cd   :  { %8989 = vmatprep.subr.bf16.mxu1 %v11576_v4 }
0x36ce   :  { %9012 = vmatpush3.bf16.msra.mxu0 %v11577_v8 }
0x36cf   :  { %9013 = vmatprep.subr.bf16.mxu0 %v11576_v4 }
0x36d0   :  { %8991 = vmatpush3.bf16.msra.mxu1 %v11578_v45 }
0x36d1   :  { %8992 = vmatprep.subr.bf16.mxu1 %v11576_v4 }
0x36d2   :  { %9015 = vmatpush3.bf16.msra.mxu0 %v11579_v29 }
0x36d3   :  { %9016 = vmatprep.subr.bf16.mxu0 %v11576_v4 }
0x36d4   :  { %8994 = vmatpush3.bf16.msra.mxu1 %v11580_v50 }
0x36d5   :  { %8995 = vmatprep.subr.bf16.mxu1 %v11576_v4 }
0x36d6   :  { %9018 = vmatpush3.bf16.msra.mxu0 %v11581_v39 }
0x36d7   :  { %9019 = vmatprep.subr.bf16.mxu0 %v11576_v4 }
0x36d8   :  { %8997 = vmatpush3.bf16.msra.mxu1 %v11582_v55 }
0x36d9   :  { %8998 = vmatprep.subr.bf16.mxu1 %v11576_v4 }
0x36da   :  { %9021 = vmatpush3.bf16.msra.mxu0 %v11583_v32 }
0x36db   :  { %9022 = vmatprep.subr.bf16.mxu0 %v11576_v4 }
0x36dc   :  { %9000 = vmatpush3.bf16.msra.mxu1 %v11584_v47 }
0x36dd   :  { %9001 = vmatprep.subr.bf16.mxu1 %v11576_v4 }
0x36de   :  { %9024 = vmatpush3.bf16.msra.mxu0 %v11585_v63 }
0x36df   :  { %9025 = vmatprep.subr.bf16.mxu0 %v11576_v4 }
0x36e0   :  { %9003 = vmatpush3.bf16.msra.mxu1 %v11586_v0 }
0x36e1   :  { %9004 = vmatprep.subr.bf16.mxu1 %v11576_v4 }
0x36e2   :  { %9027 = vmatpush3.bf16.msra.mxu0 %v11587_v5 }
0x36e3   :  { %9028 = vmatprep.subr.bf16.mxu0 %v11576_v4 }
0x36e4   :  { %9006 = vmatpush3.bf16.msra.mxu1 %v11588_v52 }
0x36e5   :  { %9031 = vmatprep.subr.bf16.mxu1 %v11576_v4 }
0x36e6   :  { %9030 = vmatpush3.bf16.msra.mxu0 %v11589_v19 }
0x36e7   :  { %8261 = vmatmul.mubr.f32.vlgmr.msra.gmra.mrb[52].mxu1 %v6124_v53  ;;  %9055 = vmatprep.subr.bf16.mxu0 %v11576_v4 }
0x36e8   :  { %9033 = vmatpush3.bf16.msra.mxu1 %v11590_v11  ;;  %8330 = vmatprep.mubr.msk.f32.mxu1 %vm9417_vm0, %v11554_v59 }
0x36e9   :  { %8296 = vmatmul.mubr.f32.vlgmr.msra.gmra.mrb[64].mxu0 %v11327_v46  ;;  %9034 = vmatprep.subr.bf16.mxu1 %v11576_v4 }
0x36ea   :  { %9057 = vmatpush3.bf16.msra.mxu0 %v11591_v16  ;;  %8365 = vmatprep.mubr.msk.f32.mxu0 %vm9417_vm0, %v11554_v59 }
0x36eb   :  { %9058 = vmatprep.subr.bf16.mxu0 %v11576_v4 }
0x36ec   :  { %9036 = vmatpush3.bf16.msra.mxu1 %v11592_v34 }
0x36ed   :  { %9037 = vmatprep.subr.bf16.mxu1 %v11576_v4 }
0x36ee   :  { %9060 = vmatpush3.bf16.msra.mxu0 %v11593_v17 }
0x36ef   :  { %9061 = vmatprep.subr.bf16.mxu0 %v11576_v4 }
0x36f0   :  { %9039 = vmatpush3.bf16.msra.mxu1 %v11594_v58 }
0x36f1   :  { %9040 = vmatprep.subr.bf16.mxu1 %v11576_v4 }
0x36f2   :  { %9063 = vmatpush3.bf16.msra.mxu0 %v11595_v22 }
0x36f3   :  { %9064 = vmatprep.subr.bf16.mxu0 %v11576_v4 }
0x36f4   :  { %9042 = vmatpush3.bf16.msra.mxu1 %v11596_v37 }
0x36f5   :  { %9043 = vmatprep.subr.bf16.mxu1 %v11576_v4 }
0x36f6   :  { %9066 = vmatpush3.bf16.msra.mxu0 %v11597_v56 }
0x36f7   :  { %9067 = vmatprep.subr.bf16.mxu0 %v11576_v4 }
0x36f8   :  { %9045 = vmatpush3.bf16.msra.mxu1 %v11598_v49 }
0x36f9   :  { %9046 = vmatprep.subr.bf16.mxu1 %v11576_v4 }
0x36fa   :  { %9069 = vmatpush3.bf16.msra.mxu0 %v11599_v18 }
0x36fb   :  { %9070 = vmatprep.subr.bf16.mxu0 %v11576_v4 }
0x36fc   :  { %9048 = vmatpush3.bf16.msra.mxu1 %v11600_v43 }
0x36fd   :  { %9049 = vmatprep.subr.bf16.mxu1 %v11576_v4 }
0x36fe   :  { %9072 = vmatpush3.bf16.msra.mxu0 %v11601_v57 }
0x36ff   :  { %9073 = vmatprep.subr.bf16.mxu0 %v11576_v4 }
0x3700   :  { %9051 = vmatpush3.bf16.msra.mxu1 %v11602_v40 }
0x3701   :  { %9052 = vmatprep.subr.bf16.mxu1 %v11576_v4 }
0x3702   :  { %9075 = vmatpush3.bf16.msra.mxu0 %v11111_v26  ;;  %v11604_v26 = vld [vmem:[#allocation35_spill] sm:$0xff] }
0x3703   :  { %9076 = vmatprep.subr.bf16.mxu0 %v11576_v4 }
0x3704   :  { %9054 = vmatpush3.bf16.msra.mxu1 %v11121_v27  ;;  %v11605_v27 = vld [vmem:[#allocation36_spill] sm:$0xff] }
0x3705   :  { %9079 = vmatprep.subr.bf16.mxu1 %v11576_v4 }
0x3706   :  { %9078 = vmatpush3.bf16.msra.mxu0 %v11132_v20  ;;  %v11606_v20 = vld [vmem:[#allocation37_spill] sm:$0xff] }
0x3707   :  { %8331 = vmatmul.mubr.f32.vlgmr.msra.gmra.mrb[54].mxu1 %v6266_v48 }
0x3708   :  { %9081 = vmatpush3.bf16.msra.mxu1 %v11603_v61  ;;  %8400 = vmatprep.mubr.msk.f32.mxu1 %vm9417_vm0, %v11554_v59  ;;  %v11608_v59 = vld [vmem:[#allocation39_spill] sm:$0xff]  ;;  %vm6724_vm0 = vcmask 1024  }
0x3709   :  { %8366 = vmatmul.mubr.f32.vlgmr.msra.gmra.mrb[66].mxu0 %v6559_v23  ;;  %9082 = vmatprep.subr.bf16.mxu1 %v11576_v4 }
0x370c   :  { %9084 = vmatpush3.bf16.msra.mxu1 %v11604_v26 }
0x370d   :  { %9085 = vmatprep.subr.bf16.mxu1 %v11576_v4 }
0x3710   :  { %9087 = vmatpush3.bf16.msra.mxu1 %v11605_v27 }
0x3711   :  { %9088 = vmatprep.subr.bf16.mxu1 %v11576_v4 }
0x3714   :  { %9090 = vmatpush3.bf16.msra.mxu1 %v11606_v20 }
0x3715   :  { %9091 = vmatprep.subr.bf16.mxu1 %v11576_v4 }
0x3718   :  { %9093 = vmatpush3.bf16.msra.mxu1 %v11607_v2 }
0x3719   :  { %9094 = vmatprep.subr.bf16.mxu1 %v11576_v4 }
0x371c   :  { %9096 = vmatpush3.bf16.msra.mxu1 %v11608_v59  ;;  %v5679_v59 = vpop.xlane.xlu0 %5678 }
0x371d   :  { %9097 = vmatprep.subr.bf16.mxu1 %v11576_v4 }
0x3720   :  { %9099 = vmatpush3.bf16.msra.mxu1 %v11609_v51 }
0x3721   :  { %9100 = vmatprep.subr.bf16.mxu1 %v11576_v4 }
0x3724   :  { %9102 = vmatpush3.bf16.msra.mxu1 %v11610_v31 }
0x3727   :  { %8401 = vmatmul.mubr.f32.vlgmr.msra.gmra.mrb[56].mxu1 %v6632_v7 }
0x377a   :  { %v6112_v62 = vpop.f32.mrb[48].mxu1 }
0x377b   :  { %v8122_v14 = vpop.f32.mrb[49].mxu1  ;;  %v6113_v1 = vadd.f32 %v11611_v13, %v6112_v62 }
0x377c   :  { %v6192_v15 = vpop.f32.mrb[60].mxu0 }
0x377d   :  { %v8157_v3 = vpop.f32.mrb[61].mxu0  ;;  %v6116_v28 = vmax.f32 %v6113_v1, 0.0 }
0x377f   :  { %v6117_v9 = vrot.slane %v6116_v28, 4 }
0x3781   :  { %v6118_v4 = vmax.f32 %v6116_v28, %v6117_v9 }
0x3783   :  { %v6119_v25 = vrot.slane %v6118_v4, 2 }
0x3785   :  { %v6120_v30 = vmax.f32 %v6118_v4, %v6119_v25 }
0x3787   :  { %v6121_v53 = vrot.slane %v6120_v30, 1 }
0x3789   :  { %v6122_v45 = vmax.f32 %v6120_v30, %v6121_v53 }
0x379a   :  { %v6262_v38 = vpop.f32.mrb[50].mxu1 }
0x379b   :  { %v6263_v44 = vadd.f32 %v6262_v38, %v6192_v15  ;;  %v8192_v12 = vpop.f32.mrb[51].mxu1 }
0x379c   :  { %v6334_v35 = vpop.f32.mrb[62].mxu0 }
0x379d   :  { %v6338_v6 = vadd.f32 %v6334_v35, %v6263_v44  ;;  %v8227_v10 = vpop.f32.mrb[63].mxu0 }
0x379f   :  { %v6339_v21 = vadd.f32 %v11612_v33, %v6338_v6 }
0x37a1   :  { %v6340_v42 = vmax.f32 %v6339_v21, 0.0 }
0x37a3   :  { %v6341_v36 = vsel %vm5293_vm4, %v6340_v42, -inf }
0x37a4   :  { %v6342_v41 = vrot.slane %v6341_v36, 4 }
0x37a6   :  { %v6343_v60 = vmax.f32 %v6341_v36, %v6342_v41 }
0x37a8   :  { %v6344_v46 = vrot.slane %v6343_v60, 2 }
0x37aa   :  { %v6345_v48 = vmax.f32 %v6343_v60, %v6344_v46 }
0x37ac   :  { %v6346_v8 = vrot.slane %v6345_v48, 1 }
0x37ae   :  { %v6347_v29 = vmax.f32 %v6345_v48, %v6346_v8 }
0x37b0   :  { %v6714_v50 = vmax.f32 %v6122_v45, %v6347_v29 }
0x37ba   :  { %v6414_v39 = vpop.f32.mrb[52].mxu1 }
0x37bb   :  { %v8262_v55 = vpop.f32.mrb[53].mxu1 }
0x37bc   :  { %v6484_v32 = vpop.f32.mrb[64].mxu0 }
0x37bd   :  { %v6485_v47 = vadd.f32 %v6484_v32, %v6414_v39  ;;  %v8297_v63 = vpop.f32.mrb[65].mxu0 }
0x37da   :  { %v6554_v0 = vpop.f32.mrb[54].mxu1 }
0x37db   :  { %v6558_v5 = vadd.f32 %v6554_v0, %v6485_v47  ;;  %v8332_v52 = vpop.f32.mrb[55].mxu1 }
0x37dc   :  { %v6627_v19 = vpop.f32.mrb[66].mxu0 }
0x37dd   :  { %v6631_v11 = vadd.f32 %v6627_v19, %v6558_v5  ;;  %v8367_v16 = vpop.f32.mrb[67].mxu0 }
0x37fa   :  { %v6700_v34 = vpop.f32.mrb[56].mxu1 }
0x37fb   :  { %v6704_v17 = vadd.f32 %v6700_v34, %v6631_v11  ;;  %v8402_v58 = vpop.f32.mrb[57].mxu1 }
0x37fd   :  { %v6705_v22 = vadd.f32 %v11280_v24, %v6704_v17 }
0x37ff   :  { %v6706_v37 = vmax.f32 %v6705_v22, 0.0 }
0x3801   :  { %v6707_v56 = vsel %vm4658_vm10, %v6706_v37, -inf }
0x3802   :  { %v6708_v49 = vrot.slane %v6707_v56, 4 }
0x3804   :  { %v6709_v18 = vmax.f32 %v6707_v56, %v6708_v49 }
0x3806   :  { %v6710_v43 = vrot.slane %v6709_v18, 2 }
0x3808   :  { %v6711_v57 = vmax.f32 %v6709_v18, %v6710_v43 }
0x380a   :  { %v6712_v40 = vrot.slane %v6711_v57, 1 }
0x380c   :  { %v6713_v23 = vmax.f32 %v6711_v57, %v6712_v40 }
0x380e   :  { %v6715_v61 = vmax.f32 %v6714_v50, %v6713_v23 }
0x3810   :  { %v6716_v26 = vmul.f32 %v6715_v61, %v11301_v54 }
0x3812   :  { %v6717_v27 = vsel %vm5676_vm5, %v6716_v26, 0.0 }
0x3813   :  { %6718 = vadd.xlane.f32.xlu1 %v6717_v27 }
0x38a0   :  { %v6719_v20 = vpop.xlane.xlu1 %6718 }
0x38a1   :  { %v6721_v2 = vrot.slane %v6719_v20, 7 }
0x38a3   :  { %v6723_v24 = vsel %vm5676_vm5, %v5679_v59, %v6721_v2 }
0x38a4   :  { %6725 = vst.msk [vmem:[%s11494_s15] sm:$0x3] %vm6724_vm0, %v6723_v24 }

</bundles_post_ra>
